<compile_context>
chip_gen: v5e
topology: v5e:2x2
jax: 0.10.0
libtpu: 0.0.40
codegen_flags: <defaults>
</compile_context>

<pallas_src>
import numpy as np
import jax
import jax.numpy as jnp
from jax.experimental import pallas as pl
from jax.experimental.pallas import tpu as pltpu


# ---------------------------------------------------------------------------
# Pallas kernel factory: one grid step = Bt batch elements, (C, HW) tiles in VMEM.
# ---------------------------------------------------------------------------
def _make_kernel(W, HW, Bt, C):
    inv_hw = 1.0 / HW

    def kernel(x_ref, mask_ref, wqkv_ref, dww_ref, dwb_ref, ws_ref, wc_ref, o_ref):

        def sigmoid(z):
            # exp on the EUP, approx reciprocal stays off the VPU divide path.
            return pl.reciprocal(1.0 + jnp.exp(-z), approx=True)

        def dw_conv(inp, widx):
            # depthwise 3x3, padding=1: 9 lane-rolls + boundary masks + per-channel FMA.
            acc = None
            t = 0
            for dy in (-1, 0, 1):
                for dx in (-1, 0, 1):
                    off = dy * W + dx
                    w_t = dww_ref[widx * 9 + t]                      # (C, 1)
                    if off == 0:
                        term = inp * w_t                              # center tap: always valid
                    else:
                        shifted = pltpu.roll(inp, shift=(-off) % HW, axis=1)
                        term = (shifted * mask_ref[t]) * w_t          # mask: (1, HW)
                    acc = term if acc is None else acc + term
                    t += 1
            return acc + dwb_ref[widx]                                # (C, HW) + (C, 1)

        def spatial_op(inp, idx):
            # BN already folded into dw weights/bias for idx 0 (q) / 1 (k).
            h = jnp.maximum(dw_conv(inp, idx), 0.0)                   # ReLU
            s = jnp.sum(h * ws_ref[idx], axis=0, keepdims=True)       # 1x1 conv C -> 1: (1, HW)
            return inp * sigmoid(s)

        def channel_op(inp, idx):
            pooled = jnp.sum(inp, axis=1, keepdims=True) * inv_hw     # global avg pool (C, 1)
            g = jnp.dot(wc_ref[idx], pooled,
                        preferred_element_type=jnp.float32)           # 1x1 conv C -> C: (C, 1)
            return inp * sigmoid(g)

        wqkv = wqkv_ref[...]                                          # (3C, C) bf16
        for bi in range(Bt):                                          # static unroll over batch block
            x = x_ref[bi]                                             # (C, HW) bf16
            # fused qkv 1x1 conv: one MXU pass, f32 accumulation
            qkv = jnp.dot(wqkv, x, preferred_element_type=jnp.float32)   # (3C, HW) f32
            q, k, v = qkv[:C], qkv[C:2 * C], qkv[2 * C:]

            q = channel_op(spatial_op(q, 0), 0)                       # oper_q
            k = channel_op(spatial_op(k, 1), 1)                       # oper_k

            out = dw_conv(dw_conv(q + k, 2) * v, 3)                   # proj(dwc(q + k) * v)
            o_ref[bi] = out.astype(o_ref.dtype)

    return kernel


# ---------------------------------------------------------------------------
# Host-side helpers: boundary masks, parameter init & packing, pallas_call wrapper.
# ---------------------------------------------------------------------------
def make_tap_masks(H, W):
    """(9, 1, H*W) 0/1 masks: tap t=(dy,dx) valid iff (i+dy, j+dx) is inside the image."""
    HW = H * W
    ii, jj = np.meshgrid(np.arange(H), np.arange(W), indexing='ij')
    masks = np.zeros((9, 1, HW), np.float32)
    t = 0
    for dy in (-1, 0, 1):
        for dx in (-1, 0, 1):
            valid = ((ii + dy >= 0) & (ii + dy < H) & (jj + dx >= 0) & (jj + dx < W))
            masks[t, 0] = valid.reshape(HW).astype(np.float32)
            t += 1
    return jnp.asarray(masks)


def init_params(key, dim):
    ks = jax.random.split(key, 21)
    p = {}

    def n(i, shape, scale=0.2):
        return jax.random.normal(ks[i], shape, jnp.float32) * scale

    p['wqkv'] = n(0, (3 * dim, dim))
    for j, pref in enumerate(('q', 'k')):
        o = 1 + j * 8
        p[pref + '_dw_w'] = n(o, (dim, 1, 3, 3))
        p[pref + '_dw_b'] = n(o + 1, (dim,), 0.1)
        p[pref + '_bn_gamma'] = 1.0 + n(o + 2, (dim,), 0.1)
        p[pref + '_bn_beta'] = n(o + 3, (dim,), 0.1)
        p[pref + '_bn_mean'] = n(o + 4, (dim,), 0.1)
        p[pref + '_bn_var'] = jnp.abs(n(o + 5, (dim,), 0.1)) + 1.0
        p[pref + '_ws'] = n(o + 6, (1, dim))
        p[pref + '_wc'] = n(o + 7, (dim, dim))
    p['dwc_w'] = n(17, (dim, 1, 3, 3))
    p['dwc_b'] = n(18, (dim,), 0.1)
    p['proj_w'] = n(19, (dim, 1, 3, 3))
    p['proj_b'] = n(20, (dim,), 0.1)
    return p


def pack_params(p, dim):
    eps = 1e-5
    wqkv = p['wqkv'].astype(jnp.bfloat16)                           # (3C, C) for W @ x

    def dwpack(w):                                                  # (C,1,3,3) -> (9, C)
        return w.reshape(dim, 9).T

    def bn_fold(pref):
        scale = p[pref + '_bn_gamma'] / jnp.sqrt(p[pref + '_bn_var'] + eps)
        shift = p[pref + '_bn_beta'] - p[pref + '_bn_mean'] * scale
        return scale, shift

    qs, qsh = bn_fold('q')
    ks_, ksh = bn_fold('k')

    # Depthwise weights: [q(BN-folded), k(BN-folded), dwc, proj] -> (4*9, C, 1)
    dww = jnp.stack([
        dwpack(p['q_dw_w']) * qs[None, :],
        dwpack(p['k_dw_w']) * ks_[None, :],
        dwpack(p['dwc_w']),
        dwpack(p['proj_w']),
    ]).reshape(36, dim)[..., None]                                  # (36, C, 1)
    dwb = jnp.stack([
        p['q_dw_b'] * qs + qsh,
        p['k_dw_b'] * ks_ + ksh,
        p['dwc_b'],
        p['proj_b'],
    ])[..., None]                                                   # (4, C, 1)
    ws = jnp.stack([p['q_ws'][0], p['k_ws'][0]])[..., None]         # (2, C, 1)
    wc = jnp.stack([p['q_wc'], p['k_wc']])                          # (2, C, C)  (out, in)
    return wqkv, dww, dwb, ws, wc


def casatt_forward(x_nchw, params):
    B, C, H, W = x_nchw.shape
    HW = H * W
    x_flat = x_nchw.reshape(B, C, HW).astype(jnp.bfloat16)          # channels-first, lane = HW
    masks = make_tap_masks(H, W)
    wqkv, dww, dwb, ws, wc = pack_params(params, C)

    Bt = next(d for d in (8, 4, 2, 1) if B % d == 0)                # batch block per grid step
    kernel = _make_kernel(W, HW, Bt, C)

    out_flat = pl.pallas_call(
        kernel,
        out_shape=jax.ShapeDtypeStruct((B, C, HW), jnp.float32),
        grid_spec=pltpu.PrefetchScalarGridSpec(
            num_scalar_prefetch=0,
            grid=(B // Bt,),
            in_specs=[
                pl.BlockSpec((Bt, C, HW), lambda g: (g, 0, 0)),     # x (bf16)
                pl.BlockSpec((9, 1, HW), lambda g: (0, 0, 0)),      # dw-conv boundary masks
                pl.BlockSpec((3 * C, C), lambda g: (0, 0)),         # fused qkv weights (bf16)
                pl.BlockSpec((36, C, 1), lambda g: (0, 0, 0)),      # depthwise weights (BN folded)
                pl.BlockSpec((4, C, 1), lambda g: (0, 0, 0)),       # depthwise biases (BN folded)
                pl.BlockSpec((2, C, 1), lambda g: (0, 0, 0)),       # spatial-op 1x1 (C -> 1) weights
                pl.BlockSpec((2, C, C), lambda g: (0, 0, 0)),       # channel-op 1x1 (C -> C) weights
            ],
            out_specs=pl.BlockSpec((Bt, C, HW), lambda g: (g, 0, 0)),
        ),
        compiler_params=pltpu.CompilerParams(
            dimension_semantics=("parallel",),
            vmem_limit_bytes=16 * 1024 * 1024,
        ),
    )(x_flat, masks, wqkv, dww, dwb, ws, wc)

    return out_flat.reshape(B, C, H, W)


# ---------------------------------------------------------------------------
# Pure-JAX reference (NCHW, real convs) to validate semantics.
# ---------------------------------------------------------------------------
def _conv1x1(x, w):  # w: (Cout, Cin)
    return jax.lax.conv_general_dilated(
        x, w[:, :, None, None], (1, 1), 'VALID',
        dimension_numbers=('NCHW', 'OIHW', 'NCHW'))


def _dwconv3x3(x, w, b):  # w: (C,1,3,3), b: (C,)
    y = jax.lax.conv_general_dilated(
        x, w, (1, 1), ((1, 1), (1, 1)),
        dimension_numbers=('NCHW', 'OIHW', 'NCHW'),
        feature_group_count=x.shape[1])
    return y + b[None, :, None, None]


def ref_forward(x, p):
    C = x.shape[1]
    eps = 1e-5
    qkv = _conv1x1(x, p['wqkv'])
    q, k, v = qkv[:, :C], qkv[:, C:2 * C], qkv[:, 2 * C:]

    def spatial(z, pref):
        h = _dwconv3x3(z, p[pref + '_dw_w'], p[pref + '_dw_b'])
        h = ((h - p[pref + '_bn_mean'][None, :, None, None])
             / jnp.sqrt(p[pref + '_bn_var'][None, :, None, None] + eps)
             * p[pref + '_bn_gamma'][None, :, None, None]
             + p[pref + '_bn_beta'][None, :, None, None])
        h = jnp.maximum(h, 0.0)
        s = _conv1x1(h, p[pref + '_ws'])
        return z * jax.nn.sigmoid(s)

    def channel(z, pref):
        pooled = jnp.mean(z, axis=(2, 3), keepdims=True)
        g = _conv1x1(pooled, p[pref + '_wc'])
        return z * jax.nn.sigmoid(g)

    q = channel(spatial(q, 'q'), 'q')
    k = channel(spatial(k, 'k'), 'k')
    return _dwconv3x3(_dwconv3x3(q + k, p['dwc_w'], p['dwc_b']) * v,
                      p['proj_w'], p['proj_b'])


if __name__ == "__main__":
    B, dim, H, W = 2, 8, 16, 16          # HW = 256 -> lane-dense tiles
    key = jax.random.PRNGKey(0)
    kx, kp = jax.random.split(key)
    x = jax.random.normal(kx, (B, dim, H, W), jnp.float32)
    params = init_params(kp, dim)

    out = jax.block_until_ready(casatt_forward(x, params))
    ref = jax.block_until_ready(ref_forward(x, params))

    assert out.shape == (B, dim, H, W)
    np.testing.assert_allclose(np.asarray(out), np.asarray(ref), rtol=2e-2, atol=2e-2)

    print("KERNEL_OK")
</pallas_src>

<mosaic_0001>
module attributes {stable_mosaic.version = 11 : i64} {
  func.func @kernel(%arg0: i32, %arg1: memref<2x8x256xbf16, #tpu.memory_space<vmem>>, %arg2: memref<9x1x256xf32, #tpu.memory_space<vmem>>, %arg3: memref<24x8xbf16, #tpu.memory_space<vmem>>, %arg4: memref<36x8x1xf32, #tpu.memory_space<vmem>>, %arg5: memref<4x8x1xf32, #tpu.memory_space<vmem>>, %arg6: memref<2x8x1xf32, #tpu.memory_space<vmem>>, %arg7: memref<2x8x8xf32, #tpu.memory_space<vmem>>, %arg8: memref<2x8x256xf32, #tpu.memory_space<vmem>>) attributes {dimension_semantics = [#tpu.dimension_semantics<parallel>], iteration_bounds = array<i64: 1>, scalar_prefetch = 0 : i64, scratch_operands = 0 : i64, tpu.core_type = #tpu.core_type<tc>, window_params = [{transform_indices = @transform_0, window_bounds = array<i64: 2, 8, 256>}, {pipeline_mode = #tpu.pipeline_mode<synchronous>, transform_indices = @transform_1, window_bounds = array<i64: 9, 1, 256>}, {pipeline_mode = #tpu.pipeline_mode<synchronous>, transform_indices = @transform_2, window_bounds = array<i64: 24, 8>}, {pipeline_mode = #tpu.pipeline_mode<synchronous>, transform_indices = @transform_3, window_bounds = array<i64: 36, 8, 1>}, {pipeline_mode = #tpu.pipeline_mode<synchronous>, transform_indices = @transform_4, window_bounds = array<i64: 4, 8, 1>}, {pipeline_mode = #tpu.pipeline_mode<synchronous>, transform_indices = @transform_5, window_bounds = array<i64: 2, 8, 1>}, {pipeline_mode = #tpu.pipeline_mode<synchronous>, transform_indices = @transform_6, window_bounds = array<i64: 2, 8, 8>}, {transform_indices = @transform_7, window_bounds = array<i64: 2, 8, 256>}]} {
    %c0 = arith.constant 0 : index
    %c0_0 = arith.constant 0 : index
    %0 = vector.load %arg3[%c0, %c0_0] : memref<24x8xbf16, #tpu.memory_space<vmem>>, vector<24x8xbf16>
    %c0_1 = arith.constant 0 : index
    %c0_2 = arith.constant 0 : index
    %c0_3 = arith.constant 0 : index
    %1 = vector.load %arg1[%c0_1, %c0_2, %c0_3] : memref<2x8x256xbf16, #tpu.memory_space<vmem>>, vector<1x8x256xbf16>
    %2 = vector.shape_cast %1 : vector<1x8x256xbf16> to vector<8x256xbf16>
    %cst = arith.constant dense<0.000000e+00> : vector<24x256xf32>
    %3 = tpu.matmul %0, %2, %cst {dimension_numbers = #tpu.dot_dimension_numbers<[1], [0], [0], [1], [0, 0, 1, 1], [], []>} : vector<24x8xbf16>, vector<8x256xbf16>, vector<24x256xf32> -> vector<24x256xf32>
    %4 = vector.extract_strided_slice %3 {offsets = [0, 0], sizes = [8, 256], strides = [1, 1]} : vector<24x256xf32> to vector<8x256xf32>
    %5 = vector.extract_strided_slice %3 {offsets = [8, 0], sizes = [8, 256], strides = [1, 1]} : vector<24x256xf32> to vector<8x256xf32>
    %6 = vector.extract_strided_slice %3 {offsets = [16, 0], sizes = [8, 256], strides = [1, 1]} : vector<24x256xf32> to vector<8x256xf32>
    %c0_4 = arith.constant 0 : index
    %c0_5 = arith.constant 0 : index
    %c0_6 = arith.constant 0 : index
    %7 = vector.load %arg4[%c0_4, %c0_5, %c0_6] : memref<36x8x1xf32, #tpu.memory_space<vmem>>, vector<1x8x1xf32>
    %8 = vector.shape_cast %7 : vector<1x8x1xf32> to vector<8x1xf32>
    %c17_i32 = arith.constant 17 : i32
    %9 = tpu.dynamic_rotate %4 by %c17_i32 dim 1 : vector<8x256xf32>, i32 -> vector<8x256xf32>
    %c0_7 = arith.constant 0 : index
    %c0_8 = arith.constant 0 : index
    %c0_9 = arith.constant 0 : index
    %10 = vector.load %arg2[%c0_7, %c0_8, %c0_9] : memref<9x1x256xf32, #tpu.memory_space<vmem>>, vector<1x1x256xf32>
    %11 = vector.shape_cast %10 : vector<1x1x256xf32> to vector<1x256xf32>
    %12 = vector.broadcast %11 : vector<1x256xf32> to vector<8x256xf32>
    %13 = arith.mulf %9, %12 : vector<8x256xf32>
    %14 = vector.broadcast %8 : vector<8x1xf32> to vector<8x256xf32>
    %15 = arith.mulf %13, %14 : vector<8x256xf32>
    %c1 = arith.constant 1 : index
    %c0_10 = arith.constant 0 : index
    %c0_11 = arith.constant 0 : index
    %16 = vector.load %arg4[%c1, %c0_10, %c0_11] : memref<36x8x1xf32, #tpu.memory_space<vmem>>, vector<1x8x1xf32>
    %17 = vector.shape_cast %16 : vector<1x8x1xf32> to vector<8x1xf32>
    %c16_i32 = arith.constant 16 : i32
    %18 = tpu.dynamic_rotate %4 by %c16_i32 dim 1 : vector<8x256xf32>, i32 -> vector<8x256xf32>
    %c1_12 = arith.constant 1 : index
    %c0_13 = arith.constant 0 : index
    %c0_14 = arith.constant 0 : index
    %19 = vector.load %arg2[%c1_12, %c0_13, %c0_14] : memref<9x1x256xf32, #tpu.memory_space<vmem>>, vector<1x1x256xf32>
    %20 = vector.shape_cast %19 : vector<1x1x256xf32> to vector<1x256xf32>
    %21 = vector.broadcast %20 : vector<1x256xf32> to vector<8x256xf32>
    %22 = arith.mulf %18, %21 : vector<8x256xf32>
    %23 = vector.broadcast %17 : vector<8x1xf32> to vector<8x256xf32>
    %24 = arith.mulf %22, %23 : vector<8x256xf32>
    %25 = arith.addf %15, %24 : vector<8x256xf32>
    %c2 = arith.constant 2 : index
    %c0_15 = arith.constant 0 : index
    %c0_16 = arith.constant 0 : index
    %26 = vector.load %arg4[%c2, %c0_15, %c0_16] : memref<36x8x1xf32, #tpu.memory_space<vmem>>, vector<1x8x1xf32>
    %27 = vector.shape_cast %26 : vector<1x8x1xf32> to vector<8x1xf32>
    %c15_i32 = arith.constant 15 : i32
    %28 = tpu.dynamic_rotate %4 by %c15_i32 dim 1 : vector<8x256xf32>, i32 -> vector<8x256xf32>
    %c2_17 = arith.constant 2 : index
    %c0_18 = arith.constant 0 : index
    %c0_19 = arith.constant 0 : index
    %29 = vector.load %arg2[%c2_17, %c0_18, %c0_19] : memref<9x1x256xf32, #tpu.memory_space<vmem>>, vector<1x1x256xf32>
    %30 = vector.shape_cast %29 : vector<1x1x256xf32> to vector<1x256xf32>
    %31 = vector.broadcast %30 : vector<1x256xf32> to vector<8x256xf32>
    %32 = arith.mulf %28, %31 : vector<8x256xf32>
    %33 = vector.broadcast %27 : vector<8x1xf32> to vector<8x256xf32>
    %34 = arith.mulf %32, %33 : vector<8x256xf32>
    %35 = arith.addf %25, %34 : vector<8x256xf32>
    %c3 = arith.constant 3 : index
    %c0_20 = arith.constant 0 : index
    %c0_21 = arith.constant 0 : index
    %36 = vector.load %arg4[%c3, %c0_20, %c0_21] : memref<36x8x1xf32, #tpu.memory_space<vmem>>, vector<1x8x1xf32>
    %37 = vector.shape_cast %36 : vector<1x8x1xf32> to vector<8x1xf32>
    %c1_i32 = arith.constant 1 : i32
    %38 = tpu.dynamic_rotate %4 by %c1_i32 dim 1 : vector<8x256xf32>, i32 -> vector<8x256xf32>
    %c3_22 = arith.constant 3 : index
    %c0_23 = arith.constant 0 : index
    %c0_24 = arith.constant 0 : index
    %39 = vector.load %arg2[%c3_22, %c0_23, %c0_24] : memref<9x1x256xf32, #tpu.memory_space<vmem>>, vector<1x1x256xf32>
    %40 = vector.shape_cast %39 : vector<1x1x256xf32> to vector<1x256xf32>
    %41 = vector.broadcast %40 : vector<1x256xf32> to vector<8x256xf32>
    %42 = arith.mulf %38, %41 : vector<8x256xf32>
    %43 = vector.broadcast %37 : vector<8x1xf32> to vector<8x256xf32>
    %44 = arith.mulf %42, %43 : vector<8x256xf32>
    %45 = arith.addf %35, %44 : vector<8x256xf32>
    %c4 = arith.constant 4 : index
    %c0_25 = arith.constant 0 : index
    %c0_26 = arith.constant 0 : index
    %46 = vector.load %arg4[%c4, %c0_25, %c0_26] : memref<36x8x1xf32, #tpu.memory_space<vmem>>, vector<1x8x1xf32>
    %47 = vector.shape_cast %46 : vector<1x8x1xf32> to vector<8x1xf32>
    %48 = vector.broadcast %47 : vector<8x1xf32> to vector<8x256xf32>
    %49 = arith.mulf %4, %48 : vector<8x256xf32>
    %50 = arith.addf %45, %49 : vector<8x256xf32>
    %c5 = arith.constant 5 : index
    %c0_27 = arith.constant 0 : index
    %c0_28 = arith.constant 0 : index
    %51 = vector.load %arg4[%c5, %c0_27, %c0_28] : memref<36x8x1xf32, #tpu.memory_space<vmem>>, vector<1x8x1xf32>
    %52 = vector.shape_cast %51 : vector<1x8x1xf32> to vector<8x1xf32>
    %c255_i32 = arith.constant 255 : i32
    %53 = tpu.dynamic_rotate %4 by %c255_i32 dim 1 : vector<8x256xf32>, i32 -> vector<8x256xf32>
    %c5_29 = arith.constant 5 : index
    %c0_30 = arith.constant 0 : index
    %c0_31 = arith.constant 0 : index
    %54 = vector.load %arg2[%c5_29, %c0_30, %c0_31] : memref<9x1x256xf32, #tpu.memory_space<vmem>>, vector<1x1x256xf32>
    %55 = vector.shape_cast %54 : vector<1x1x256xf32> to vector<1x256xf32>
    %56 = vector.broadcast %55 : vector<1x256xf32> to vector<8x256xf32>
    %57 = arith.mulf %53, %56 : vector<8x256xf32>
    %58 = vector.broadcast %52 : vector<8x1xf32> to vector<8x256xf32>
    %59 = arith.mulf %57, %58 : vector<8x256xf32>
    %60 = arith.addf %50, %59 : vector<8x256xf32>
    %c6 = arith.constant 6 : index
    %c0_32 = arith.constant 0 : index
    %c0_33 = arith.constant 0 : index
    %61 = vector.load %arg4[%c6, %c0_32, %c0_33] : memref<36x8x1xf32, #tpu.memory_space<vmem>>, vector<1x8x1xf32>
    %62 = vector.shape_cast %61 : vector<1x8x1xf32> to vector<8x1xf32>
    %c241_i32 = arith.constant 241 : i32
    %63 = tpu.dynamic_rotate %4 by %c241_i32 dim 1 : vector<8x256xf32>, i32 -> vector<8x256xf32>
    %c6_34 = arith.constant 6 : index
    %c0_35 = arith.constant 0 : index
    %c0_36 = arith.constant 0 : index
    %64 = vector.load %arg2[%c6_34, %c0_35, %c0_36] : memref<9x1x256xf32, #tpu.memory_space<vmem>>, vector<1x1x256xf32>
    %65 = vector.shape_cast %64 : vector<1x1x256xf32> to vector<1x256xf32>
    %66 = vector.broadcast %65 : vector<1x256xf32> to vector<8x256xf32>
    %67 = arith.mulf %63, %66 : vector<8x256xf32>
    %68 = vector.broadcast %62 : vector<8x1xf32> to vector<8x256xf32>
    %69 = arith.mulf %67, %68 : vector<8x256xf32>
    %70 = arith.addf %60, %69 : vector<8x256xf32>
    %c7 = arith.constant 7 : index
    %c0_37 = arith.constant 0 : index
    %c0_38 = arith.constant 0 : index
    %71 = vector.load %arg4[%c7, %c0_37, %c0_38] : memref<36x8x1xf32, #tpu.memory_space<vmem>>, vector<1x8x1xf32>
    %72 = vector.shape_cast %71 : vector<1x8x1xf32> to vector<8x1xf32>
    %c240_i32 = arith.constant 240 : i32
    %73 = tpu.dynamic_rotate %4 by %c240_i32 dim 1 : vector<8x256xf32>, i32 -> vector<8x256xf32>
    %c7_39 = arith.constant 7 : index
    %c0_40 = arith.constant 0 : index
    %c0_41 = arith.constant 0 : index
    %74 = vector.load %arg2[%c7_39, %c0_40, %c0_41] : memref<9x1x256xf32, #tpu.memory_space<vmem>>, vector<1x1x256xf32>
    %75 = vector.shape_cast %74 : vector<1x1x256xf32> to vector<1x256xf32>
    %76 = vector.broadcast %75 : vector<1x256xf32> to vector<8x256xf32>
    %77 = arith.mulf %73, %76 : vector<8x256xf32>
    %78 = vector.broadcast %72 : vector<8x1xf32> to vector<8x256xf32>
    %79 = arith.mulf %77, %78 : vector<8x256xf32>
    %80 = arith.addf %70, %79 : vector<8x256xf32>
    %c8 = arith.constant 8 : index
    %c0_42 = arith.constant 0 : index
    %c0_43 = arith.constant 0 : index
    %81 = vector.load %arg4[%c8, %c0_42, %c0_43] : memref<36x8x1xf32, #tpu.memory_space<vmem>>, vector<1x8x1xf32>
    %82 = vector.shape_cast %81 : vector<1x8x1xf32> to vector<8x1xf32>
    %c239_i32 = arith.constant 239 : i32
    %83 = tpu.dynamic_rotate %4 by %c239_i32 dim 1 : vector<8x256xf32>, i32 -> vector<8x256xf32>
    %c8_44 = arith.constant 8 : index
    %c0_45 = arith.constant 0 : index
    %c0_46 = arith.constant 0 : index
    %84 = vector.load %arg2[%c8_44, %c0_45, %c0_46] : memref<9x1x256xf32, #tpu.memory_space<vmem>>, vector<1x1x256xf32>
    %85 = vector.shape_cast %84 : vector<1x1x256xf32> to vector<1x256xf32>
    %86 = vector.broadcast %85 : vector<1x256xf32> to vector<8x256xf32>
    %87 = arith.mulf %83, %86 : vector<8x256xf32>
    %88 = vector.broadcast %82 : vector<8x1xf32> to vector<8x256xf32>
    %89 = arith.mulf %87, %88 : vector<8x256xf32>
    %90 = arith.addf %80, %89 : vector<8x256xf32>
    %c0_47 = arith.constant 0 : index
    %c0_48 = arith.constant 0 : index
    %c0_49 = arith.constant 0 : index
    %91 = vector.load %arg5[%c0_47, %c0_48, %c0_49] : memref<4x8x1xf32, #tpu.memory_space<vmem>>, vector<1x8x1xf32>
    %92 = vector.shape_cast %91 : vector<1x8x1xf32> to vector<8x1xf32>
    %93 = vector.broadcast %92 : vector<8x1xf32> to vector<8x256xf32>
    %94 = arith.addf %90, %93 : vector<8x256xf32>
    %cst_50 = arith.constant 0.000000e+00 : f32
    %95 = vector.broadcast %cst_50 : f32 to vector<8x256xf32>
    %96 = arith.maximumf %94, %95 : vector<8x256xf32>
    %c0_51 = arith.constant 0 : index
    %c0_52 = arith.constant 0 : index
    %c0_53 = arith.constant 0 : index
    %97 = vector.load %arg6[%c0_51, %c0_52, %c0_53] : memref<2x8x1xf32, #tpu.memory_space<vmem>>, vector<1x8x1xf32>
    %98 = vector.shape_cast %97 : vector<1x8x1xf32> to vector<8x1xf32>
    %99 = vector.broadcast %98 : vector<8x1xf32> to vector<8x256xf32>
    %100 = arith.mulf %96, %99 : vector<8x256xf32>
    %cst_54 = arith.constant dense<0.000000e+00> : vector<256xf32>
    %101 = vector.multi_reduction <add>, %100, %cst_54 [0] : vector<8x256xf32> to vector<256xf32>
    %102 = vector.shape_cast %101 : vector<256xf32> to vector<1x256xf32>
    %cst_55 = arith.constant 0.000000e+00 : f32
    %103 = vector.broadcast %cst_55 : f32 to vector<1x256xf32>
    %104 = arith.subf %103, %102 : vector<1x256xf32>
    %105 = math.exp %104 : vector<1x256xf32>
    %cst_56 = arith.constant 1.000000e+00 : f32
    %106 = vector.broadcast %cst_56 : f32 to vector<1x256xf32>
    %107 = arith.addf %106, %105 : vector<1x256xf32>
    %108 = tpu.reciprocal %107 {approx = true} : vector<1x256xf32> -> vector<1x256xf32>
    %109 = vector.broadcast %108 : vector<1x256xf32> to vector<8x256xf32>
    %110 = arith.mulf %4, %109 : vector<8x256xf32>
    %cst_57 = arith.constant dense<0.000000e+00> : vector<8xf32>
    %111 = vector.multi_reduction <add>, %110, %cst_57 [1] : vector<8x256xf32> to vector<8xf32>
    %112 = vector.shape_cast %111 : vector<8xf32> to vector<8x1xf32>
    %cst_58 = arith.constant 3.906250e-03 : f32
    %113 = vector.broadcast %cst_58 : f32 to vector<8x1xf32>
    %114 = arith.mulf %112, %113 : vector<8x1xf32>
    %c0_59 = arith.constant 0 : index
    %c0_60 = arith.constant 0 : index
    %c0_61 = arith.constant 0 : index
    %115 = vector.load %arg7[%c0_59, %c0_60, %c0_61] : memref<2x8x8xf32, #tpu.memory_space<vmem>>, vector<1x8x8xf32>
    %116 = vector.shape_cast %115 : vector<1x8x8xf32> to vector<8x8xf32>
    %cst_62 = arith.constant dense<0.000000e+00> : vector<8x1xf32>
    %117 = tpu.matmul %116, %114, %cst_62 {dimension_numbers = #tpu.dot_dimension_numbers<[1], [0], [0], [1], [0, 0, 1, 1], [], []>} : vector<8x8xf32>, vector<8x1xf32>, vector<8x1xf32> -> vector<8x1xf32>
    %cst_63 = arith.constant 0.000000e+00 : f32
    %118 = vector.broadcast %cst_63 : f32 to vector<8x1xf32>
    %119 = arith.subf %118, %117 : vector<8x1xf32>
    %120 = math.exp %119 : vector<8x1xf32>
    %cst_64 = arith.constant 1.000000e+00 : f32
    %121 = vector.broadcast %cst_64 : f32 to vector<8x1xf32>
    %122 = arith.addf %121, %120 : vector<8x1xf32>
    %123 = tpu.reciprocal %122 {approx = true} : vector<8x1xf32> -> vector<8x1xf32>
    %124 = vector.broadcast %123 : vector<8x1xf32> to vector<8x256xf32>
    %125 = arith.mulf %110, %124 : vector<8x256xf32>
    %c9 = arith.constant 9 : index
    %c0_65 = arith.constant 0 : index
    %c0_66 = arith.constant 0 : index
    %126 = vector.load %arg4[%c9, %c0_65, %c0_66] : memref<36x8x1xf32, #tpu.memory_space<vmem>>, vector<1x8x1xf32>
    %127 = vector.shape_cast %126 : vector<1x8x1xf32> to vector<8x1xf32>
    %c17_i32_67 = arith.constant 17 : i32
    %128 = tpu.dynamic_rotate %5 by %c17_i32_67 dim 1 : vector<8x256xf32>, i32 -> vector<8x256xf32>
    %c0_68 = arith.constant 0 : index
    %c0_69 = arith.constant 0 : index
    %c0_70 = arith.constant 0 : index
    %129 = vector.load %arg2[%c0_68, %c0_69, %c0_70] : memref<9x1x256xf32, #tpu.memory_space<vmem>>, vector<1x1x256xf32>
    %130 = vector.shape_cast %129 : vector<1x1x256xf32> to vector<1x256xf32>
    %131 = vector.broadcast %130 : vector<1x256xf32> to vector<8x256xf32>
    %132 = arith.mulf %128, %131 : vector<8x256xf32>
    %133 = vector.broadcast %127 : vector<8x1xf32> to vector<8x256xf32>
    %134 = arith.mulf %132, %133 : vector<8x256xf32>
    %c10 = arith.constant 10 : index
    %c0_71 = arith.constant 0 : index
    %c0_72 = arith.constant 0 : index
    %135 = vector.load %arg4[%c10, %c0_71, %c0_72] : memref<36x8x1xf32, #tpu.memory_space<vmem>>, vector<1x8x1xf32>
    %136 = vector.shape_cast %135 : vector<1x8x1xf32> to vector<8x1xf32>
    %c16_i32_73 = arith.constant 16 : i32
    %137 = tpu.dynamic_rotate %5 by %c16_i32_73 dim 1 : vector<8x256xf32>, i32 -> vector<8x256xf32>
    %c1_74 = arith.constant 1 : index
    %c0_75 = arith.constant 0 : index
    %c0_76 = arith.constant 0 : index
    %138 = vector.load %arg2[%c1_74, %c0_75, %c0_76] : memref<9x1x256xf32, #tpu.memory_space<vmem>>, vector<1x1x256xf32>
    %139 = vector.shape_cast %138 : vector<1x1x256xf32> to vector<1x256xf32>
    %140 = vector.broadcast %139 : vector<1x256xf32> to vector<8x256xf32>
    %141 = arith.mulf %137, %140 : vector<8x256xf32>
    %142 = vector.broadcast %136 : vector<8x1xf32> to vector<8x256xf32>
    %143 = arith.mulf %141, %142 : vector<8x256xf32>
    %144 = arith.addf %134, %143 : vector<8x256xf32>
    %c11 = arith.constant 11 : index
    %c0_77 = arith.constant 0 : index
    %c0_78 = arith.constant 0 : index
    %145 = vector.load %arg4[%c11, %c0_77, %c0_78] : memref<36x8x1xf32, #tpu.memory_space<vmem>>, vector<1x8x1xf32>
    %146 = vector.shape_cast %145 : vector<1x8x1xf32> to vector<8x1xf32>
    %c15_i32_79 = arith.constant 15 : i32
    %147 = tpu.dynamic_rotate %5 by %c15_i32_79 dim 1 : vector<8x256xf32>, i32 -> vector<8x256xf32>
    %c2_80 = arith.constant 2 : index
    %c0_81 = arith.constant 0 : index
    %c0_82 = arith.constant 0 : index
    %148 = vector.load %arg2[%c2_80, %c0_81, %c0_82] : memref<9x1x256xf32, #tpu.memory_space<vmem>>, vector<1x1x256xf32>
    %149 = vector.shape_cast %148 : vector<1x1x256xf32> to vector<1x256xf32>
    %150 = vector.broadcast %149 : vector<1x256xf32> to vector<8x256xf32>
    %151 = arith.mulf %147, %150 : vector<8x256xf32>
    %152 = vector.broadcast %146 : vector<8x1xf32> to vector<8x256xf32>
    %153 = arith.mulf %151, %152 : vector<8x256xf32>
    %154 = arith.addf %144, %153 : vector<8x256xf32>
    %c12 = arith.constant 12 : index
    %c0_83 = arith.constant 0 : index
    %c0_84 = arith.constant 0 : index
    %155 = vector.load %arg4[%c12, %c0_83, %c0_84] : memref<36x8x1xf32, #tpu.memory_space<vmem>>, vector<1x8x1xf32>
    %156 = vector.shape_cast %155 : vector<1x8x1xf32> to vector<8x1xf32>
    %c1_i32_85 = arith.constant 1 : i32
    %157 = tpu.dynamic_rotate %5 by %c1_i32_85 dim 1 : vector<8x256xf32>, i32 -> vector<8x256xf32>
    %c3_86 = arith.constant 3 : index
    %c0_87 = arith.constant 0 : index
    %c0_88 = arith.constant 0 : index
    %158 = vector.load %arg2[%c3_86, %c0_87, %c0_88] : memref<9x1x256xf32, #tpu.memory_space<vmem>>, vector<1x1x256xf32>
    %159 = vector.shape_cast %158 : vector<1x1x256xf32> to vector<1x256xf32>
    %160 = vector.broadcast %159 : vector<1x256xf32> to vector<8x256xf32>
    %161 = arith.mulf %157, %160 : vector<8x256xf32>
    %162 = vector.broadcast %156 : vector<8x1xf32> to vector<8x256xf32>
    %163 = arith.mulf %161, %162 : vector<8x256xf32>
    %164 = arith.addf %154, %163 : vector<8x256xf32>
    %c13 = arith.constant 13 : index
    %c0_89 = arith.constant 0 : index
    %c0_90 = arith.constant 0 : index
    %165 = vector.load %arg4[%c13, %c0_89, %c0_90] : memref<36x8x1xf32, #tpu.memory_space<vmem>>, vector<1x8x1xf32>
    %166 = vector.shape_cast %165 : vector<1x8x1xf32> to vector<8x1xf32>
    %167 = vector.broadcast %166 : vector<8x1xf32> to vector<8x256xf32>
    %168 = arith.mulf %5, %167 : vector<8x256xf32>
    %169 = arith.addf %164, %168 : vector<8x256xf32>
    %c14 = arith.constant 14 : index
    %c0_91 = arith.constant 0 : index
    %c0_92 = arith.constant 0 : index
    %170 = vector.load %arg4[%c14, %c0_91, %c0_92] : memref<36x8x1xf32, #tpu.memory_space<vmem>>, vector<1x8x1xf32>
    %171 = vector.shape_cast %170 : vector<1x8x1xf32> to vector<8x1xf32>
    %c255_i32_93 = arith.constant 255 : i32
    %172 = tpu.dynamic_rotate %5 by %c255_i32_93 dim 1 : vector<8x256xf32>, i32 -> vector<8x256xf32>
    %c5_94 = arith.constant 5 : index
    %c0_95 = arith.constant 0 : index
    %c0_96 = arith.constant 0 : index
    %173 = vector.load %arg2[%c5_94, %c0_95, %c0_96] : memref<9x1x256xf32, #tpu.memory_space<vmem>>, vector<1x1x256xf32>
    %174 = vector.shape_cast %173 : vector<1x1x256xf32> to vector<1x256xf32>
    %175 = vector.broadcast %174 : vector<1x256xf32> to vector<8x256xf32>
    %176 = arith.mulf %172, %175 : vector<8x256xf32>
    %177 = vector.broadcast %171 : vector<8x1xf32> to vector<8x256xf32>
    %178 = arith.mulf %176, %177 : vector<8x256xf32>
    %179 = arith.addf %169, %178 : vector<8x256xf32>
    %c15 = arith.constant 15 : index
    %c0_97 = arith.constant 0 : index
    %c0_98 = arith.constant 0 : index
    %180 = vector.load %arg4[%c15, %c0_97, %c0_98] : memref<36x8x1xf32, #tpu.memory_space<vmem>>, vector<1x8x1xf32>
    %181 = vector.shape_cast %180 : vector<1x8x1xf32> to vector<8x1xf32>
    %c241_i32_99 = arith.constant 241 : i32
    %182 = tpu.dynamic_rotate %5 by %c241_i32_99 dim 1 : vector<8x256xf32>, i32 -> vector<8x256xf32>
    %c6_100 = arith.constant 6 : index
    %c0_101 = arith.constant 0 : index
    %c0_102 = arith.constant 0 : index
    %183 = vector.load %arg2[%c6_100, %c0_101, %c0_102] : memref<9x1x256xf32, #tpu.memory_space<vmem>>, vector<1x1x256xf32>
    %184 = vector.shape_cast %183 : vector<1x1x256xf32> to vector<1x256xf32>
    %185 = vector.broadcast %184 : vector<1x256xf32> to vector<8x256xf32>
    %186 = arith.mulf %182, %185 : vector<8x256xf32>
    %187 = vector.broadcast %181 : vector<8x1xf32> to vector<8x256xf32>
    %188 = arith.mulf %186, %187 : vector<8x256xf32>
    %189 = arith.addf %179, %188 : vector<8x256xf32>
    %c16 = arith.constant 16 : index
    %c0_103 = arith.constant 0 : index
    %c0_104 = arith.constant 0 : index
    %190 = vector.load %arg4[%c16, %c0_103, %c0_104] : memref<36x8x1xf32, #tpu.memory_space<vmem>>, vector<1x8x1xf32>
    %191 = vector.shape_cast %190 : vector<1x8x1xf32> to vector<8x1xf32>
    %c240_i32_105 = arith.constant 240 : i32
    %192 = tpu.dynamic_rotate %5 by %c240_i32_105 dim 1 : vector<8x256xf32>, i32 -> vector<8x256xf32>
    %c7_106 = arith.constant 7 : index
    %c0_107 = arith.constant 0 : index
    %c0_108 = arith.constant 0 : index
    %193 = vector.load %arg2[%c7_106, %c0_107, %c0_108] : memref<9x1x256xf32, #tpu.memory_space<vmem>>, vector<1x1x256xf32>
    %194 = vector.shape_cast %193 : vector<1x1x256xf32> to vector<1x256xf32>
    %195 = vector.broadcast %194 : vector<1x256xf32> to vector<8x256xf32>
    %196 = arith.mulf %192, %195 : vector<8x256xf32>
    %197 = vector.broadcast %191 : vector<8x1xf32> to vector<8x256xf32>
    %198 = arith.mulf %196, %197 : vector<8x256xf32>
    %199 = arith.addf %189, %198 : vector<8x256xf32>
    %c17 = arith.constant 17 : index
    %c0_109 = arith.constant 0 : index
    %c0_110 = arith.constant 0 : index
    %200 = vector.load %arg4[%c17, %c0_109, %c0_110] : memref<36x8x1xf32, #tpu.memory_space<vmem>>, vector<1x8x1xf32>
    %201 = vector.shape_cast %200 : vector<1x8x1xf32> to vector<8x1xf32>
    %c239_i32_111 = arith.constant 239 : i32
    %202 = tpu.dynamic_rotate %5 by %c239_i32_111 dim 1 : vector<8x256xf32>, i32 -> vector<8x256xf32>
    %c8_112 = arith.constant 8 : index
    %c0_113 = arith.constant 0 : index
    %c0_114 = arith.constant 0 : index
    %203 = vector.load %arg2[%c8_112, %c0_113, %c0_114] : memref<9x1x256xf32, #tpu.memory_space<vmem>>, vector<1x1x256xf32>
    %204 = vector.shape_cast %203 : vector<1x1x256xf32> to vector<1x256xf32>
    %205 = vector.broadcast %204 : vector<1x256xf32> to vector<8x256xf32>
    %206 = arith.mulf %202, %205 : vector<8x256xf32>
    %207 = vector.broadcast %201 : vector<8x1xf32> to vector<8x256xf32>
    %208 = arith.mulf %206, %207 : vector<8x256xf32>
    %209 = arith.addf %199, %208 : vector<8x256xf32>
    %c1_115 = arith.constant 1 : index
    %c0_116 = arith.constant 0 : index
    %c0_117 = arith.constant 0 : index
    %210 = vector.load %arg5[%c1_115, %c0_116, %c0_117] : memref<4x8x1xf32, #tpu.memory_space<vmem>>, vector<1x8x1xf32>
    %211 = vector.shape_cast %210 : vector<1x8x1xf32> to vector<8x1xf32>
    %212 = vector.broadcast %211 : vector<8x1xf32> to vector<8x256xf32>
    %213 = arith.addf %209, %212 : vector<8x256xf32>
    %cst_118 = arith.constant 0.000000e+00 : f32
    %214 = vector.broadcast %cst_118 : f32 to vector<8x256xf32>
    %215 = arith.maximumf %213, %214 : vector<8x256xf32>
    %c1_119 = arith.constant 1 : index
    %c0_120 = arith.constant 0 : index
    %c0_121 = arith.constant 0 : index
    %216 = vector.load %arg6[%c1_119, %c0_120, %c0_121] : memref<2x8x1xf32, #tpu.memory_space<vmem>>, vector<1x8x1xf32>
    %217 = vector.shape_cast %216 : vector<1x8x1xf32> to vector<8x1xf32>
    %218 = vector.broadcast %217 : vector<8x1xf32> to vector<8x256xf32>
    %219 = arith.mulf %215, %218 : vector<8x256xf32>
    %cst_122 = arith.constant dense<0.000000e+00> : vector<256xf32>
    %220 = vector.multi_reduction <add>, %219, %cst_122 [0] : vector<8x256xf32> to vector<256xf32>
    %221 = vector.shape_cast %220 : vector<256xf32> to vector<1x256xf32>
    %cst_123 = arith.constant 0.000000e+00 : f32
    %222 = vector.broadcast %cst_123 : f32 to vector<1x256xf32>
    %223 = arith.subf %222, %221 : vector<1x256xf32>
    %224 = math.exp %223 : vector<1x256xf32>
    %cst_124 = arith.constant 1.000000e+00 : f32
    %225 = vector.broadcast %cst_124 : f32 to vector<1x256xf32>
    %226 = arith.addf %225, %224 : vector<1x256xf32>
    %227 = tpu.reciprocal %226 {approx = true} : vector<1x256xf32> -> vector<1x256xf32>
    %228 = vector.broadcast %227 : vector<1x256xf32> to vector<8x256xf32>
    %229 = arith.mulf %5, %228 : vector<8x256xf32>
    %cst_125 = arith.constant dense<0.000000e+00> : vector<8xf32>
    %230 = vector.multi_reduction <add>, %229, %cst_125 [1] : vector<8x256xf32> to vector<8xf32>
    %231 = vector.shape_cast %230 : vector<8xf32> to vector<8x1xf32>
    %cst_126 = arith.constant 3.906250e-03 : f32
    %232 = vector.broadcast %cst_126 : f32 to vector<8x1xf32>
    %233 = arith.mulf %231, %232 : vector<8x1xf32>
    %c1_127 = arith.constant 1 : index
    %c0_128 = arith.constant 0 : index
    %c0_129 = arith.constant 0 : index
    %234 = vector.load %arg7[%c1_127, %c0_128, %c0_129] : memref<2x8x8xf32, #tpu.memory_space<vmem>>, vector<1x8x8xf32>
    %235 = vector.shape_cast %234 : vector<1x8x8xf32> to vector<8x8xf32>
    %cst_130 = arith.constant dense<0.000000e+00> : vector<8x1xf32>
    %236 = tpu.matmul %235, %233, %cst_130 {dimension_numbers = #tpu.dot_dimension_numbers<[1], [0], [0], [1], [0, 0, 1, 1], [], []>} : vector<8x8xf32>, vector<8x1xf32>, vector<8x1xf32> -> vector<8x1xf32>
    %cst_131 = arith.constant 0.000000e+00 : f32
    %237 = vector.broadcast %cst_131 : f32 to vector<8x1xf32>
    %238 = arith.subf %237, %236 : vector<8x1xf32>
    %239 = math.exp %238 : vector<8x1xf32>
    %cst_132 = arith.constant 1.000000e+00 : f32
    %240 = vector.broadcast %cst_132 : f32 to vector<8x1xf32>
    %241 = arith.addf %240, %239 : vector<8x1xf32>
    %242 = tpu.reciprocal %241 {approx = true} : vector<8x1xf32> -> vector<8x1xf32>
    %243 = vector.broadcast %242 : vector<8x1xf32> to vector<8x256xf32>
    %244 = arith.mulf %229, %243 : vector<8x256xf32>
    %245 = arith.addf %125, %244 : vector<8x256xf32>
    %c18 = arith.constant 18 : index
    %c0_133 = arith.constant 0 : index
    %c0_134 = arith.constant 0 : index
    %246 = vector.load %arg4[%c18, %c0_133, %c0_134] : memref<36x8x1xf32, #tpu.memory_space<vmem>>, vector<1x8x1xf32>
    %247 = vector.shape_cast %246 : vector<1x8x1xf32> to vector<8x1xf32>
    %c17_i32_135 = arith.constant 17 : i32
    %248 = tpu.dynamic_rotate %245 by %c17_i32_135 dim 1 : vector<8x256xf32>, i32 -> vector<8x256xf32>
    %c0_136 = arith.constant 0 : index
    %c0_137 = arith.constant 0 : index
    %c0_138 = arith.constant 0 : index
    %249 = vector.load %arg2[%c0_136, %c0_137, %c0_138] : memref<9x1x256xf32, #tpu.memory_space<vmem>>, vector<1x1x256xf32>
    %250 = vector.shape_cast %249 : vector<1x1x256xf32> to vector<1x256xf32>
    %251 = vector.broadcast %250 : vector<1x256xf32> to vector<8x256xf32>
    %252 = arith.mulf %248, %251 : vector<8x256xf32>
    %253 = vector.broadcast %247 : vector<8x1xf32> to vector<8x256xf32>
    %254 = arith.mulf %252, %253 : vector<8x256xf32>
    %c19 = arith.constant 19 : index
    %c0_139 = arith.constant 0 : index
    %c0_140 = arith.constant 0 : index
    %255 = vector.load %arg4[%c19, %c0_139, %c0_140] : memref<36x8x1xf32, #tpu.memory_space<vmem>>, vector<1x8x1xf32>
    %256 = vector.shape_cast %255 : vector<1x8x1xf32> to vector<8x1xf32>
    %c16_i32_141 = arith.constant 16 : i32
    %257 = tpu.dynamic_rotate %245 by %c16_i32_141 dim 1 : vector<8x256xf32>, i32 -> vector<8x256xf32>
    %c1_142 = arith.constant 1 : index
    %c0_143 = arith.constant 0 : index
    %c0_144 = arith.constant 0 : index
    %258 = vector.load %arg2[%c1_142, %c0_143, %c0_144] : memref<9x1x256xf32, #tpu.memory_space<vmem>>, vector<1x1x256xf32>
    %259 = vector.shape_cast %258 : vector<1x1x256xf32> to vector<1x256xf32>
    %260 = vector.broadcast %259 : vector<1x256xf32> to vector<8x256xf32>
    %261 = arith.mulf %257, %260 : vector<8x256xf32>
    %262 = vector.broadcast %256 : vector<8x1xf32> to vector<8x256xf32>
    %263 = arith.mulf %261, %262 : vector<8x256xf32>
    %264 = arith.addf %254, %263 : vector<8x256xf32>
    %c20 = arith.constant 20 : index
    %c0_145 = arith.constant 0 : index
    %c0_146 = arith.constant 0 : index
    %265 = vector.load %arg4[%c20, %c0_145, %c0_146] : memref<36x8x1xf32, #tpu.memory_space<vmem>>, vector<1x8x1xf32>
    %266 = vector.shape_cast %265 : vector<1x8x1xf32> to vector<8x1xf32>
    %c15_i32_147 = arith.constant 15 : i32
    %267 = tpu.dynamic_rotate %245 by %c15_i32_147 dim 1 : vector<8x256xf32>, i32 -> vector<8x256xf32>
    %c2_148 = arith.constant 2 : index
    %c0_149 = arith.constant 0 : index
    %c0_150 = arith.constant 0 : index
    %268 = vector.load %arg2[%c2_148, %c0_149, %c0_150] : memref<9x1x256xf32, #tpu.memory_space<vmem>>, vector<1x1x256xf32>
    %269 = vector.shape_cast %268 : vector<1x1x256xf32> to vector<1x256xf32>
    %270 = vector.broadcast %269 : vector<1x256xf32> to vector<8x256xf32>
    %271 = arith.mulf %267, %270 : vector<8x256xf32>
    %272 = vector.broadcast %266 : vector<8x1xf32> to vector<8x256xf32>
    %273 = arith.mulf %271, %272 : vector<8x256xf32>
    %274 = arith.addf %264, %273 : vector<8x256xf32>
    %c21 = arith.constant 21 : index
    %c0_151 = arith.constant 0 : index
    %c0_152 = arith.constant 0 : index
    %275 = vector.load %arg4[%c21, %c0_151, %c0_152] : memref<36x8x1xf32, #tpu.memory_space<vmem>>, vector<1x8x1xf32>
    %276 = vector.shape_cast %275 : vector<1x8x1xf32> to vector<8x1xf32>
    %c1_i32_153 = arith.constant 1 : i32
    %277 = tpu.dynamic_rotate %245 by %c1_i32_153 dim 1 : vector<8x256xf32>, i32 -> vector<8x256xf32>
    %c3_154 = arith.constant 3 : index
    %c0_155 = arith.constant 0 : index
    %c0_156 = arith.constant 0 : index
    %278 = vector.load %arg2[%c3_154, %c0_155, %c0_156] : memref<9x1x256xf32, #tpu.memory_space<vmem>>, vector<1x1x256xf32>
    %279 = vector.shape_cast %278 : vector<1x1x256xf32> to vector<1x256xf32>
    %280 = vector.broadcast %279 : vector<1x256xf32> to vector<8x256xf32>
    %281 = arith.mulf %277, %280 : vector<8x256xf32>
    %282 = vector.broadcast %276 : vector<8x1xf32> to vector<8x256xf32>
    %283 = arith.mulf %281, %282 : vector<8x256xf32>
    %284 = arith.addf %274, %283 : vector<8x256xf32>
    %c22 = arith.constant 22 : index
    %c0_157 = arith.constant 0 : index
    %c0_158 = arith.constant 0 : index
    %285 = vector.load %arg4[%c22, %c0_157, %c0_158] : memref<36x8x1xf32, #tpu.memory_space<vmem>>, vector<1x8x1xf32>
    %286 = vector.shape_cast %285 : vector<1x8x1xf32> to vector<8x1xf32>
    %287 = vector.broadcast %286 : vector<8x1xf32> to vector<8x256xf32>
    %288 = arith.mulf %245, %287 : vector<8x256xf32>
    %289 = arith.addf %284, %288 : vector<8x256xf32>
    %c23 = arith.constant 23 : index
    %c0_159 = arith.constant 0 : index
    %c0_160 = arith.constant 0 : index
    %290 = vector.load %arg4[%c23, %c0_159, %c0_160] : memref<36x8x1xf32, #tpu.memory_space<vmem>>, vector<1x8x1xf32>
    %291 = vector.shape_cast %290 : vector<1x8x1xf32> to vector<8x1xf32>
    %c255_i32_161 = arith.constant 255 : i32
    %292 = tpu.dynamic_rotate %245 by %c255_i32_161 dim 1 : vector<8x256xf32>, i32 -> vector<8x256xf32>
    %c5_162 = arith.constant 5 : index
    %c0_163 = arith.constant 0 : index
    %c0_164 = arith.constant 0 : index
    %293 = vector.load %arg2[%c5_162, %c0_163, %c0_164] : memref<9x1x256xf32, #tpu.memory_space<vmem>>, vector<1x1x256xf32>
    %294 = vector.shape_cast %293 : vector<1x1x256xf32> to vector<1x256xf32>
    %295 = vector.broadcast %294 : vector<1x256xf32> to vector<8x256xf32>
    %296 = arith.mulf %292, %295 : vector<8x256xf32>
    %297 = vector.broadcast %291 : vector<8x1xf32> to vector<8x256xf32>
    %298 = arith.mulf %296, %297 : vector<8x256xf32>
    %299 = arith.addf %289, %298 : vector<8x256xf32>
    %c24 = arith.constant 24 : index
    %c0_165 = arith.constant 0 : index
    %c0_166 = arith.constant 0 : index
    %300 = vector.load %arg4[%c24, %c0_165, %c0_166] : memref<36x8x1xf32, #tpu.memory_space<vmem>>, vector<1x8x1xf32>
    %301 = vector.shape_cast %300 : vector<1x8x1xf32> to vector<8x1xf32>
    %c241_i32_167 = arith.constant 241 : i32
    %302 = tpu.dynamic_rotate %245 by %c241_i32_167 dim 1 : vector<8x256xf32>, i32 -> vector<8x256xf32>
    %c6_168 = arith.constant 6 : index
    %c0_169 = arith.constant 0 : index
    %c0_170 = arith.constant 0 : index
    %303 = vector.load %arg2[%c6_168, %c0_169, %c0_170] : memref<9x1x256xf32, #tpu.memory_space<vmem>>, vector<1x1x256xf32>
    %304 = vector.shape_cast %303 : vector<1x1x256xf32> to vector<1x256xf32>
    %305 = vector.broadcast %304 : vector<1x256xf32> to vector<8x256xf32>
    %306 = arith.mulf %302, %305 : vector<8x256xf32>
    %307 = vector.broadcast %301 : vector<8x1xf32> to vector<8x256xf32>
    %308 = arith.mulf %306, %307 : vector<8x256xf32>
    %309 = arith.addf %299, %308 : vector<8x256xf32>
    %c25 = arith.constant 25 : index
    %c0_171 = arith.constant 0 : index
    %c0_172 = arith.constant 0 : index
    %310 = vector.load %arg4[%c25, %c0_171, %c0_172] : memref<36x8x1xf32, #tpu.memory_space<vmem>>, vector<1x8x1xf32>
    %311 = vector.shape_cast %310 : vector<1x8x1xf32> to vector<8x1xf32>
    %c240_i32_173 = arith.constant 240 : i32
    %312 = tpu.dynamic_rotate %245 by %c240_i32_173 dim 1 : vector<8x256xf32>, i32 -> vector<8x256xf32>
    %c7_174 = arith.constant 7 : index
    %c0_175 = arith.constant 0 : index
    %c0_176 = arith.constant 0 : index
    %313 = vector.load %arg2[%c7_174, %c0_175, %c0_176] : memref<9x1x256xf32, #tpu.memory_space<vmem>>, vector<1x1x256xf32>
    %314 = vector.shape_cast %313 : vector<1x1x256xf32> to vector<1x256xf32>
    %315 = vector.broadcast %314 : vector<1x256xf32> to vector<8x256xf32>
    %316 = arith.mulf %312, %315 : vector<8x256xf32>
    %317 = vector.broadcast %311 : vector<8x1xf32> to vector<8x256xf32>
    %318 = arith.mulf %316, %317 : vector<8x256xf32>
    %319 = arith.addf %309, %318 : vector<8x256xf32>
    %c26 = arith.constant 26 : index
    %c0_177 = arith.constant 0 : index
    %c0_178 = arith.constant 0 : index
    %320 = vector.load %arg4[%c26, %c0_177, %c0_178] : memref<36x8x1xf32, #tpu.memory_space<vmem>>, vector<1x8x1xf32>
    %321 = vector.shape_cast %320 : vector<1x8x1xf32> to vector<8x1xf32>
    %c239_i32_179 = arith.constant 239 : i32
    %322 = tpu.dynamic_rotate %245 by %c239_i32_179 dim 1 : vector<8x256xf32>, i32 -> vector<8x256xf32>
    %c8_180 = arith.constant 8 : index
    %c0_181 = arith.constant 0 : index
    %c0_182 = arith.constant 0 : index
    %323 = vector.load %arg2[%c8_180, %c0_181, %c0_182] : memref<9x1x256xf32, #tpu.memory_space<vmem>>, vector<1x1x256xf32>
    %324 = vector.shape_cast %323 : vector<1x1x256xf32> to vector<1x256xf32>
    %325 = vector.broadcast %324 : vector<1x256xf32> to vector<8x256xf32>
    %326 = arith.mulf %322, %325 : vector<8x256xf32>
    %327 = vector.broadcast %321 : vector<8x1xf32> to vector<8x256xf32>
    %328 = arith.mulf %326, %327 : vector<8x256xf32>
    %329 = arith.addf %319, %328 : vector<8x256xf32>
    %c2_183 = arith.constant 2 : index
    %c0_184 = arith.constant 0 : index
    %c0_185 = arith.constant 0 : index
    %330 = vector.load %arg5[%c2_183, %c0_184, %c0_185] : memref<4x8x1xf32, #tpu.memory_space<vmem>>, vector<1x8x1xf32>
    %331 = vector.shape_cast %330 : vector<1x8x1xf32> to vector<8x1xf32>
    %332 = vector.broadcast %331 : vector<8x1xf32> to vector<8x256xf32>
    %333 = arith.addf %329, %332 : vector<8x256xf32>
    %334 = arith.mulf %333, %6 : vector<8x256xf32>
    %c27 = arith.constant 27 : index
    %c0_186 = arith.constant 0 : index
    %c0_187 = arith.constant 0 : index
    %335 = vector.load %arg4[%c27, %c0_186, %c0_187] : memref<36x8x1xf32, #tpu.memory_space<vmem>>, vector<1x8x1xf32>
    %336 = vector.shape_cast %335 : vector<1x8x1xf32> to vector<8x1xf32>
    %c17_i32_188 = arith.constant 17 : i32
    %337 = tpu.dynamic_rotate %334 by %c17_i32_188 dim 1 : vector<8x256xf32>, i32 -> vector<8x256xf32>
    %c0_189 = arith.constant 0 : index
    %c0_190 = arith.constant 0 : index
    %c0_191 = arith.constant 0 : index
    %338 = vector.load %arg2[%c0_189, %c0_190, %c0_191] : memref<9x1x256xf32, #tpu.memory_space<vmem>>, vector<1x1x256xf32>
    %339 = vector.shape_cast %338 : vector<1x1x256xf32> to vector<1x256xf32>
    %340 = vector.broadcast %339 : vector<1x256xf32> to vector<8x256xf32>
    %341 = arith.mulf %337, %340 : vector<8x256xf32>
    %342 = vector.broadcast %336 : vector<8x1xf32> to vector<8x256xf32>
    %343 = arith.mulf %341, %342 : vector<8x256xf32>
    %c28 = arith.constant 28 : index
    %c0_192 = arith.constant 0 : index
    %c0_193 = arith.constant 0 : index
    %344 = vector.load %arg4[%c28, %c0_192, %c0_193] : memref<36x8x1xf32, #tpu.memory_space<vmem>>, vector<1x8x1xf32>
    %345 = vector.shape_cast %344 : vector<1x8x1xf32> to vector<8x1xf32>
    %c16_i32_194 = arith.constant 16 : i32
    %346 = tpu.dynamic_rotate %334 by %c16_i32_194 dim 1 : vector<8x256xf32>, i32 -> vector<8x256xf32>
    %c1_195 = arith.constant 1 : index
    %c0_196 = arith.constant 0 : index
    %c0_197 = arith.constant 0 : index
    %347 = vector.load %arg2[%c1_195, %c0_196, %c0_197] : memref<9x1x256xf32, #tpu.memory_space<vmem>>, vector<1x1x256xf32>
    %348 = vector.shape_cast %347 : vector<1x1x256xf32> to vector<1x256xf32>
    %349 = vector.broadcast %348 : vector<1x256xf32> to vector<8x256xf32>
    %350 = arith.mulf %346, %349 : vector<8x256xf32>
    %351 = vector.broadcast %345 : vector<8x1xf32> to vector<8x256xf32>
    %352 = arith.mulf %350, %351 : vector<8x256xf32>
    %353 = arith.addf %343, %352 : vector<8x256xf32>
    %c29 = arith.constant 29 : index
    %c0_198 = arith.constant 0 : index
    %c0_199 = arith.constant 0 : index
    %354 = vector.load %arg4[%c29, %c0_198, %c0_199] : memref<36x8x1xf32, #tpu.memory_space<vmem>>, vector<1x8x1xf32>
    %355 = vector.shape_cast %354 : vector<1x8x1xf32> to vector<8x1xf32>
    %c15_i32_200 = arith.constant 15 : i32
    %356 = tpu.dynamic_rotate %334 by %c15_i32_200 dim 1 : vector<8x256xf32>, i32 -> vector<8x256xf32>
    %c2_201 = arith.constant 2 : index
    %c0_202 = arith.constant 0 : index
    %c0_203 = arith.constant 0 : index
    %357 = vector.load %arg2[%c2_201, %c0_202, %c0_203] : memref<9x1x256xf32, #tpu.memory_space<vmem>>, vector<1x1x256xf32>
    %358 = vector.shape_cast %357 : vector<1x1x256xf32> to vector<1x256xf32>
    %359 = vector.broadcast %358 : vector<1x256xf32> to vector<8x256xf32>
    %360 = arith.mulf %356, %359 : vector<8x256xf32>
    %361 = vector.broadcast %355 : vector<8x1xf32> to vector<8x256xf32>
    %362 = arith.mulf %360, %361 : vector<8x256xf32>
    %363 = arith.addf %353, %362 : vector<8x256xf32>
    %c30 = arith.constant 30 : index
    %c0_204 = arith.constant 0 : index
    %c0_205 = arith.constant 0 : index
    %364 = vector.load %arg4[%c30, %c0_204, %c0_205] : memref<36x8x1xf32, #tpu.memory_space<vmem>>, vector<1x8x1xf32>
    %365 = vector.shape_cast %364 : vector<1x8x1xf32> to vector<8x1xf32>
    %c1_i32_206 = arith.constant 1 : i32
    %366 = tpu.dynamic_rotate %334 by %c1_i32_206 dim 1 : vector<8x256xf32>, i32 -> vector<8x256xf32>
    %c3_207 = arith.constant 3 : index
    %c0_208 = arith.constant 0 : index
    %c0_209 = arith.constant 0 : index
    %367 = vector.load %arg2[%c3_207, %c0_208, %c0_209] : memref<9x1x256xf32, #tpu.memory_space<vmem>>, vector<1x1x256xf32>
    %368 = vector.shape_cast %367 : vector<1x1x256xf32> to vector<1x256xf32>
    %369 = vector.broadcast %368 : vector<1x256xf32> to vector<8x256xf32>
    %370 = arith.mulf %366, %369 : vector<8x256xf32>
    %371 = vector.broadcast %365 : vector<8x1xf32> to vector<8x256xf32>
    %372 = arith.mulf %370, %371 : vector<8x256xf32>
    %373 = arith.addf %363, %372 : vector<8x256xf32>
    %c31 = arith.constant 31 : index
    %c0_210 = arith.constant 0 : index
    %c0_211 = arith.constant 0 : index
    %374 = vector.load %arg4[%c31, %c0_210, %c0_211] : memref<36x8x1xf32, #tpu.memory_space<vmem>>, vector<1x8x1xf32>
    %375 = vector.shape_cast %374 : vector<1x8x1xf32> to vector<8x1xf32>
    %376 = vector.broadcast %375 : vector<8x1xf32> to vector<8x256xf32>
    %377 = arith.mulf %334, %376 : vector<8x256xf32>
    %378 = arith.addf %373, %377 : vector<8x256xf32>
    %c32 = arith.constant 32 : index
    %c0_212 = arith.constant 0 : index
    %c0_213 = arith.constant 0 : index
    %379 = vector.load %arg4[%c32, %c0_212, %c0_213] : memref<36x8x1xf32, #tpu.memory_space<vmem>>, vector<1x8x1xf32>
    %380 = vector.shape_cast %379 : vector<1x8x1xf32> to vector<8x1xf32>
    %c255_i32_214 = arith.constant 255 : i32
    %381 = tpu.dynamic_rotate %334 by %c255_i32_214 dim 1 : vector<8x256xf32>, i32 -> vector<8x256xf32>
    %c5_215 = arith.constant 5 : index
    %c0_216 = arith.constant 0 : index
    %c0_217 = arith.constant 0 : index
    %382 = vector.load %arg2[%c5_215, %c0_216, %c0_217] : memref<9x1x256xf32, #tpu.memory_space<vmem>>, vector<1x1x256xf32>
    %383 = vector.shape_cast %382 : vector<1x1x256xf32> to vector<1x256xf32>
    %384 = vector.broadcast %383 : vector<1x256xf32> to vector<8x256xf32>
    %385 = arith.mulf %381, %384 : vector<8x256xf32>
    %386 = vector.broadcast %380 : vector<8x1xf32> to vector<8x256xf32>
    %387 = arith.mulf %385, %386 : vector<8x256xf32>
    %388 = arith.addf %378, %387 : vector<8x256xf32>
    %c33 = arith.constant 33 : index
    %c0_218 = arith.constant 0 : index
    %c0_219 = arith.constant 0 : index
    %389 = vector.load %arg4[%c33, %c0_218, %c0_219] : memref<36x8x1xf32, #tpu.memory_space<vmem>>, vector<1x8x1xf32>
    %390 = vector.shape_cast %389 : vector<1x8x1xf32> to vector<8x1xf32>
    %c241_i32_220 = arith.constant 241 : i32
    %391 = tpu.dynamic_rotate %334 by %c241_i32_220 dim 1 : vector<8x256xf32>, i32 -> vector<8x256xf32>
    %c6_221 = arith.constant 6 : index
    %c0_222 = arith.constant 0 : index
    %c0_223 = arith.constant 0 : index
    %392 = vector.load %arg2[%c6_221, %c0_222, %c0_223] : memref<9x1x256xf32, #tpu.memory_space<vmem>>, vector<1x1x256xf32>
    %393 = vector.shape_cast %392 : vector<1x1x256xf32> to vector<1x256xf32>
    %394 = vector.broadcast %393 : vector<1x256xf32> to vector<8x256xf32>
    %395 = arith.mulf %391, %394 : vector<8x256xf32>
    %396 = vector.broadcast %390 : vector<8x1xf32> to vector<8x256xf32>
    %397 = arith.mulf %395, %396 : vector<8x256xf32>
    %398 = arith.addf %388, %397 : vector<8x256xf32>
    %c34 = arith.constant 34 : index
    %c0_224 = arith.constant 0 : index
    %c0_225 = arith.constant 0 : index
    %399 = vector.load %arg4[%c34, %c0_224, %c0_225] : memref<36x8x1xf32, #tpu.memory_space<vmem>>, vector<1x8x1xf32>
    %400 = vector.shape_cast %399 : vector<1x8x1xf32> to vector<8x1xf32>
    %c240_i32_226 = arith.constant 240 : i32
    %401 = tpu.dynamic_rotate %334 by %c240_i32_226 dim 1 : vector<8x256xf32>, i32 -> vector<8x256xf32>
    %c7_227 = arith.constant 7 : index
    %c0_228 = arith.constant 0 : index
    %c0_229 = arith.constant 0 : index
    %402 = vector.load %arg2[%c7_227, %c0_228, %c0_229] : memref<9x1x256xf32, #tpu.memory_space<vmem>>, vector<1x1x256xf32>
    %403 = vector.shape_cast %402 : vector<1x1x256xf32> to vector<1x256xf32>
    %404 = vector.broadcast %403 : vector<1x256xf32> to vector<8x256xf32>
    %405 = arith.mulf %401, %404 : vector<8x256xf32>
    %406 = vector.broadcast %400 : vector<8x1xf32> to vector<8x256xf32>
    %407 = arith.mulf %405, %406 : vector<8x256xf32>
    %408 = arith.addf %398, %407 : vector<8x256xf32>
    %c35 = arith.constant 35 : index
    %c0_230 = arith.constant 0 : index
    %c0_231 = arith.constant 0 : index
    %409 = vector.load %arg4[%c35, %c0_230, %c0_231] : memref<36x8x1xf32, #tpu.memory_space<vmem>>, vector<1x8x1xf32>
    %410 = vector.shape_cast %409 : vector<1x8x1xf32> to vector<8x1xf32>
    %c239_i32_232 = arith.constant 239 : i32
    %411 = tpu.dynamic_rotate %334 by %c239_i32_232 dim 1 : vector<8x256xf32>, i32 -> vector<8x256xf32>
    %c8_233 = arith.constant 8 : index
    %c0_234 = arith.constant 0 : index
    %c0_235 = arith.constant 0 : index
    %412 = vector.load %arg2[%c8_233, %c0_234, %c0_235] : memref<9x1x256xf32, #tpu.memory_space<vmem>>, vector<1x1x256xf32>
    %413 = vector.shape_cast %412 : vector<1x1x256xf32> to vector<1x256xf32>
    %414 = vector.broadcast %413 : vector<1x256xf32> to vector<8x256xf32>
    %415 = arith.mulf %411, %414 : vector<8x256xf32>
    %416 = vector.broadcast %410 : vector<8x1xf32> to vector<8x256xf32>
    %417 = arith.mulf %415, %416 : vector<8x256xf32>
    %418 = arith.addf %408, %417 : vector<8x256xf32>
    %c3_236 = arith.constant 3 : index
    %c0_237 = arith.constant 0 : index
    %c0_238 = arith.constant 0 : index
    %419 = vector.load %arg5[%c3_236, %c0_237, %c0_238] : memref<4x8x1xf32, #tpu.memory_space<vmem>>, vector<1x8x1xf32>
    %420 = vector.shape_cast %419 : vector<1x8x1xf32> to vector<8x1xf32>
    %421 = vector.broadcast %420 : vector<8x1xf32> to vector<8x256xf32>
    %422 = arith.addf %418, %421 : vector<8x256xf32>
    %c0_239 = arith.constant 0 : index
    %c0_240 = arith.constant 0 : index
    %c0_241 = arith.constant 0 : index
    %423 = vector.load %arg8[%c0_239, %c0_240, %c0_241] : memref<2x8x256xf32, #tpu.memory_space<vmem>>, vector<1x8x256xf32>
    %424 = vector.shape_cast %423 : vector<1x8x256xf32> to vector<8x256xf32>
    %425 = vector.shape_cast %422 : vector<8x256xf32> to vector<1x8x256xf32>
    tpu.vector_store %arg8[%c0_239, %c0_240, %c0_241], %425 {strides = array<i32>} : memref<2x8x256xf32, #tpu.memory_space<vmem>>, vector<1x8x256xf32>,
    %c1_242 = arith.constant 1 : index
    %c0_243 = arith.constant 0 : index
    %c0_244 = arith.constant 0 : index
    %426 = vector.load %arg1[%c1_242, %c0_243, %c0_244] : memref<2x8x256xbf16, #tpu.memory_space<vmem>>, vector<1x8x256xbf16>
    %427 = vector.shape_cast %426 : vector<1x8x256xbf16> to vector<8x256xbf16>
    %cst_245 = arith.constant dense<0.000000e+00> : vector<24x256xf32>
    %428 = tpu.matmul %0, %427, %cst_245 {dimension_numbers = #tpu.dot_dimension_numbers<[1], [0], [0], [1], [0, 0, 1, 1], [], []>} : vector<24x8xbf16>, vector<8x256xbf16>, vector<24x256xf32> -> vector<24x256xf32>
    %429 = vector.extract_strided_slice %428 {offsets = [0, 0], sizes = [8, 256], strides = [1, 1]} : vector<24x256xf32> to vector<8x256xf32>
    %430 = vector.extract_strided_slice %428 {offsets = [8, 0], sizes = [8, 256], strides = [1, 1]} : vector<24x256xf32> to vector<8x256xf32>
    %431 = vector.extract_strided_slice %428 {offsets = [16, 0], sizes = [8, 256], strides = [1, 1]} : vector<24x256xf32> to vector<8x256xf32>
    %c0_246 = arith.constant 0 : index
    %c0_247 = arith.constant 0 : index
    %c0_248 = arith.constant 0 : index
    %432 = vector.load %arg4[%c0_246, %c0_247, %c0_248] : memref<36x8x1xf32, #tpu.memory_space<vmem>>, vector<1x8x1xf32>
    %433 = vector.shape_cast %432 : vector<1x8x1xf32> to vector<8x1xf32>
    %c17_i32_249 = arith.constant 17 : i32
    %434 = tpu.dynamic_rotate %429 by %c17_i32_249 dim 1 : vector<8x256xf32>, i32 -> vector<8x256xf32>
    %c0_250 = arith.constant 0 : index
    %c0_251 = arith.constant 0 : index
    %c0_252 = arith.constant 0 : index
    %435 = vector.load %arg2[%c0_250, %c0_251, %c0_252] : memref<9x1x256xf32, #tpu.memory_space<vmem>>, vector<1x1x256xf32>
    %436 = vector.shape_cast %435 : vector<1x1x256xf32> to vector<1x256xf32>
    %437 = vector.broadcast %436 : vector<1x256xf32> to vector<8x256xf32>
    %438 = arith.mulf %434, %437 : vector<8x256xf32>
    %439 = vector.broadcast %433 : vector<8x1xf32> to vector<8x256xf32>
    %440 = arith.mulf %438, %439 : vector<8x256xf32>
    %c1_253 = arith.constant 1 : index
    %c0_254 = arith.constant 0 : index
    %c0_255 = arith.constant 0 : index
    %441 = vector.load %arg4[%c1_253, %c0_254, %c0_255] : memref<36x8x1xf32, #tpu.memory_space<vmem>>, vector<1x8x1xf32>
    %442 = vector.shape_cast %441 : vector<1x8x1xf32> to vector<8x1xf32>
    %c16_i32_256 = arith.constant 16 : i32
    %443 = tpu.dynamic_rotate %429 by %c16_i32_256 dim 1 : vector<8x256xf32>, i32 -> vector<8x256xf32>
    %c1_257 = arith.constant 1 : index
    %c0_258 = arith.constant 0 : index
    %c0_259 = arith.constant 0 : index
    %444 = vector.load %arg2[%c1_257, %c0_258, %c0_259] : memref<9x1x256xf32, #tpu.memory_space<vmem>>, vector<1x1x256xf32>
    %445 = vector.shape_cast %444 : vector<1x1x256xf32> to vector<1x256xf32>
    %446 = vector.broadcast %445 : vector<1x256xf32> to vector<8x256xf32>
    %447 = arith.mulf %443, %446 : vector<8x256xf32>
    %448 = vector.broadcast %442 : vector<8x1xf32> to vector<8x256xf32>
    %449 = arith.mulf %447, %448 : vector<8x256xf32>
    %450 = arith.addf %440, %449 : vector<8x256xf32>
    %c2_260 = arith.constant 2 : index
    %c0_261 = arith.constant 0 : index
    %c0_262 = arith.constant 0 : index
    %451 = vector.load %arg4[%c2_260, %c0_261, %c0_262] : memref<36x8x1xf32, #tpu.memory_space<vmem>>, vector<1x8x1xf32>
    %452 = vector.shape_cast %451 : vector<1x8x1xf32> to vector<8x1xf32>
    %c15_i32_263 = arith.constant 15 : i32
    %453 = tpu.dynamic_rotate %429 by %c15_i32_263 dim 1 : vector<8x256xf32>, i32 -> vector<8x256xf32>
    %c2_264 = arith.constant 2 : index
    %c0_265 = arith.constant 0 : index
    %c0_266 = arith.constant 0 : index
    %454 = vector.load %arg2[%c2_264, %c0_265, %c0_266] : memref<9x1x256xf32, #tpu.memory_space<vmem>>, vector<1x1x256xf32>
    %455 = vector.shape_cast %454 : vector<1x1x256xf32> to vector<1x256xf32>
    %456 = vector.broadcast %455 : vector<1x256xf32> to vector<8x256xf32>
    %457 = arith.mulf %453, %456 : vector<8x256xf32>
    %458 = vector.broadcast %452 : vector<8x1xf32> to vector<8x256xf32>
    %459 = arith.mulf %457, %458 : vector<8x256xf32>
    %460 = arith.addf %450, %459 : vector<8x256xf32>
    %c3_267 = arith.constant 3 : index
    %c0_268 = arith.constant 0 : index
    %c0_269 = arith.constant 0 : index
    %461 = vector.load %arg4[%c3_267, %c0_268, %c0_269] : memref<36x8x1xf32, #tpu.memory_space<vmem>>, vector<1x8x1xf32>
    %462 = vector.shape_cast %461 : vector<1x8x1xf32> to vector<8x1xf32>
    %c1_i32_270 = arith.constant 1 : i32
    %463 = tpu.dynamic_rotate %429 by %c1_i32_270 dim 1 : vector<8x256xf32>, i32 -> vector<8x256xf32>
    %c3_271 = arith.constant 3 : index
    %c0_272 = arith.constant 0 : index
    %c0_273 = arith.constant 0 : index
    %464 = vector.load %arg2[%c3_271, %c0_272, %c0_273] : memref<9x1x256xf32, #tpu.memory_space<vmem>>, vector<1x1x256xf32>
    %465 = vector.shape_cast %464 : vector<1x1x256xf32> to vector<1x256xf32>
    %466 = vector.broadcast %465 : vector<1x256xf32> to vector<8x256xf32>
    %467 = arith.mulf %463, %466 : vector<8x256xf32>
    %468 = vector.broadcast %462 : vector<8x1xf32> to vector<8x256xf32>
    %469 = arith.mulf %467, %468 : vector<8x256xf32>
    %470 = arith.addf %460, %469 : vector<8x256xf32>
    %c4_274 = arith.constant 4 : index
    %c0_275 = arith.constant 0 : index
    %c0_276 = arith.constant 0 : index
    %471 = vector.load %arg4[%c4_274, %c0_275, %c0_276] : memref<36x8x1xf32, #tpu.memory_space<vmem>>, vector<1x8x1xf32>
    %472 = vector.shape_cast %471 : vector<1x8x1xf32> to vector<8x1xf32>
    %473 = vector.broadcast %472 : vector<8x1xf32> to vector<8x256xf32>
    %474 = arith.mulf %429, %473 : vector<8x256xf32>
    %475 = arith.addf %470, %474 : vector<8x256xf32>
    %c5_277 = arith.constant 5 : index
    %c0_278 = arith.constant 0 : index
    %c0_279 = arith.constant 0 : index
    %476 = vector.load %arg4[%c5_277, %c0_278, %c0_279] : memref<36x8x1xf32, #tpu.memory_space<vmem>>, vector<1x8x1xf32>
    %477 = vector.shape_cast %476 : vector<1x8x1xf32> to vector<8x1xf32>
    %c255_i32_280 = arith.constant 255 : i32
    %478 = tpu.dynamic_rotate %429 by %c255_i32_280 dim 1 : vector<8x256xf32>, i32 -> vector<8x256xf32>
    %c5_281 = arith.constant 5 : index
    %c0_282 = arith.constant 0 : index
    %c0_283 = arith.constant 0 : index
    %479 = vector.load %arg2[%c5_281, %c0_282, %c0_283] : memref<9x1x256xf32, #tpu.memory_space<vmem>>, vector<1x1x256xf32>
    %480 = vector.shape_cast %479 : vector<1x1x256xf32> to vector<1x256xf32>
    %481 = vector.broadcast %480 : vector<1x256xf32> to vector<8x256xf32>
    %482 = arith.mulf %478, %481 : vector<8x256xf32>
    %483 = vector.broadcast %477 : vector<8x1xf32> to vector<8x256xf32>
    %484 = arith.mulf %482, %483 : vector<8x256xf32>
    %485 = arith.addf %475, %484 : vector<8x256xf32>
    %c6_284 = arith.constant 6 : index
    %c0_285 = arith.constant 0 : index
    %c0_286 = arith.constant 0 : index
    %486 = vector.load %arg4[%c6_284, %c0_285, %c0_286] : memref<36x8x1xf32, #tpu.memory_space<vmem>>, vector<1x8x1xf32>
    %487 = vector.shape_cast %486 : vector<1x8x1xf32> to vector<8x1xf32>
    %c241_i32_287 = arith.constant 241 : i32
    %488 = tpu.dynamic_rotate %429 by %c241_i32_287 dim 1 : vector<8x256xf32>, i32 -> vector<8x256xf32>
    %c6_288 = arith.constant 6 : index
    %c0_289 = arith.constant 0 : index
    %c0_290 = arith.constant 0 : index
    %489 = vector.load %arg2[%c6_288, %c0_289, %c0_290] : memref<9x1x256xf32, #tpu.memory_space<vmem>>, vector<1x1x256xf32>
    %490 = vector.shape_cast %489 : vector<1x1x256xf32> to vector<1x256xf32>
    %491 = vector.broadcast %490 : vector<1x256xf32> to vector<8x256xf32>
    %492 = arith.mulf %488, %491 : vector<8x256xf32>
    %493 = vector.broadcast %487 : vector<8x1xf32> to vector<8x256xf32>
    %494 = arith.mulf %492, %493 : vector<8x256xf32>
    %495 = arith.addf %485, %494 : vector<8x256xf32>
    %c7_291 = arith.constant 7 : index
    %c0_292 = arith.constant 0 : index
    %c0_293 = arith.constant 0 : index
    %496 = vector.load %arg4[%c7_291, %c0_292, %c0_293] : memref<36x8x1xf32, #tpu.memory_space<vmem>>, vector<1x8x1xf32>
    %497 = vector.shape_cast %496 : vector<1x8x1xf32> to vector<8x1xf32>
    %c240_i32_294 = arith.constant 240 : i32
    %498 = tpu.dynamic_rotate %429 by %c240_i32_294 dim 1 : vector<8x256xf32>, i32 -> vector<8x256xf32>
    %c7_295 = arith.constant 7 : index
    %c0_296 = arith.constant 0 : index
    %c0_297 = arith.constant 0 : index
    %499 = vector.load %arg2[%c7_295, %c0_296, %c0_297] : memref<9x1x256xf32, #tpu.memory_space<vmem>>, vector<1x1x256xf32>
    %500 = vector.shape_cast %499 : vector<1x1x256xf32> to vector<1x256xf32>
    %501 = vector.broadcast %500 : vector<1x256xf32> to vector<8x256xf32>
    %502 = arith.mulf %498, %501 : vector<8x256xf32>
    %503 = vector.broadcast %497 : vector<8x1xf32> to vector<8x256xf32>
    %504 = arith.mulf %502, %503 : vector<8x256xf32>
    %505 = arith.addf %495, %504 : vector<8x256xf32>
    %c8_298 = arith.constant 8 : index
    %c0_299 = arith.constant 0 : index
    %c0_300 = arith.constant 0 : index
    %506 = vector.load %arg4[%c8_298, %c0_299, %c0_300] : memref<36x8x1xf32, #tpu.memory_space<vmem>>, vector<1x8x1xf32>
    %507 = vector.shape_cast %506 : vector<1x8x1xf32> to vector<8x1xf32>
    %c239_i32_301 = arith.constant 239 : i32
    %508 = tpu.dynamic_rotate %429 by %c239_i32_301 dim 1 : vector<8x256xf32>, i32 -> vector<8x256xf32>
    %c8_302 = arith.constant 8 : index
    %c0_303 = arith.constant 0 : index
    %c0_304 = arith.constant 0 : index
    %509 = vector.load %arg2[%c8_302, %c0_303, %c0_304] : memref<9x1x256xf32, #tpu.memory_space<vmem>>, vector<1x1x256xf32>
    %510 = vector.shape_cast %509 : vector<1x1x256xf32> to vector<1x256xf32>
    %511 = vector.broadcast %510 : vector<1x256xf32> to vector<8x256xf32>
    %512 = arith.mulf %508, %511 : vector<8x256xf32>
    %513 = vector.broadcast %507 : vector<8x1xf32> to vector<8x256xf32>
    %514 = arith.mulf %512, %513 : vector<8x256xf32>
    %515 = arith.addf %505, %514 : vector<8x256xf32>
    %c0_305 = arith.constant 0 : index
    %c0_306 = arith.constant 0 : index
    %c0_307 = arith.constant 0 : index
    %516 = vector.load %arg5[%c0_305, %c0_306, %c0_307] : memref<4x8x1xf32, #tpu.memory_space<vmem>>, vector<1x8x1xf32>
    %517 = vector.shape_cast %516 : vector<1x8x1xf32> to vector<8x1xf32>
    %518 = vector.broadcast %517 : vector<8x1xf32> to vector<8x256xf32>
    %519 = arith.addf %515, %518 : vector<8x256xf32>
    %cst_308 = arith.constant 0.000000e+00 : f32
    %520 = vector.broadcast %cst_308 : f32 to vector<8x256xf32>
    %521 = arith.maximumf %519, %520 : vector<8x256xf32>
    %c0_309 = arith.constant 0 : index
    %c0_310 = arith.constant 0 : index
    %c0_311 = arith.constant 0 : index
    %522 = vector.load %arg6[%c0_309, %c0_310, %c0_311] : memref<2x8x1xf32, #tpu.memory_space<vmem>>, vector<1x8x1xf32>
    %523 = vector.shape_cast %522 : vector<1x8x1xf32> to vector<8x1xf32>
    %524 = vector.broadcast %523 : vector<8x1xf32> to vector<8x256xf32>
    %525 = arith.mulf %521, %524 : vector<8x256xf32>
    %cst_312 = arith.constant dense<0.000000e+00> : vector<256xf32>
    %526 = vector.multi_reduction <add>, %525, %cst_312 [0] : vector<8x256xf32> to vector<256xf32>
    %527 = vector.shape_cast %526 : vector<256xf32> to vector<1x256xf32>
    %cst_313 = arith.constant 0.000000e+00 : f32
    %528 = vector.broadcast %cst_313 : f32 to vector<1x256xf32>
    %529 = arith.subf %528, %527 : vector<1x256xf32>
    %530 = math.exp %529 : vector<1x256xf32>
    %cst_314 = arith.constant 1.000000e+00 : f32
    %531 = vector.broadcast %cst_314 : f32 to vector<1x256xf32>
    %532 = arith.addf %531, %530 : vector<1x256xf32>
    %533 = tpu.reciprocal %532 {approx = true} : vector<1x256xf32> -> vector<1x256xf32>
    %534 = vector.broadcast %533 : vector<1x256xf32> to vector<8x256xf32>
    %535 = arith.mulf %429, %534 : vector<8x256xf32>
    %cst_315 = arith.constant dense<0.000000e+00> : vector<8xf32>
    %536 = vector.multi_reduction <add>, %535, %cst_315 [1] : vector<8x256xf32> to vector<8xf32>
    %537 = vector.shape_cast %536 : vector<8xf32> to vector<8x1xf32>
    %cst_316 = arith.constant 3.906250e-03 : f32
    %538 = vector.broadcast %cst_316 : f32 to vector<8x1xf32>
    %539 = arith.mulf %537, %538 : vector<8x1xf32>
    %c0_317 = arith.constant 0 : index
    %c0_318 = arith.constant 0 : index
    %c0_319 = arith.constant 0 : index
    %540 = vector.load %arg7[%c0_317, %c0_318, %c0_319] : memref<2x8x8xf32, #tpu.memory_space<vmem>>, vector<1x8x8xf32>
    %541 = vector.shape_cast %540 : vector<1x8x8xf32> to vector<8x8xf32>
    %cst_320 = arith.constant dense<0.000000e+00> : vector<8x1xf32>
    %542 = tpu.matmul %541, %539, %cst_320 {dimension_numbers = #tpu.dot_dimension_numbers<[1], [0], [0], [1], [0, 0, 1, 1], [], []>} : vector<8x8xf32>, vector<8x1xf32>, vector<8x1xf32> -> vector<8x1xf32>
    %cst_321 = arith.constant 0.000000e+00 : f32
    %543 = vector.broadcast %cst_321 : f32 to vector<8x1xf32>
    %544 = arith.subf %543, %542 : vector<8x1xf32>
    %545 = math.exp %544 : vector<8x1xf32>
    %cst_322 = arith.constant 1.000000e+00 : f32
    %546 = vector.broadcast %cst_322 : f32 to vector<8x1xf32>
    %547 = arith.addf %546, %545 : vector<8x1xf32>
    %548 = tpu.reciprocal %547 {approx = true} : vector<8x1xf32> -> vector<8x1xf32>
    %549 = vector.broadcast %548 : vector<8x1xf32> to vector<8x256xf32>
    %550 = arith.mulf %535, %549 : vector<8x256xf32>
    %c9_323 = arith.constant 9 : index
    %c0_324 = arith.constant 0 : index
    %c0_325 = arith.constant 0 : index
    %551 = vector.load %arg4[%c9_323, %c0_324, %c0_325] : memref<36x8x1xf32, #tpu.memory_space<vmem>>, vector<1x8x1xf32>
    %552 = vector.shape_cast %551 : vector<1x8x1xf32> to vector<8x1xf32>
    %c17_i32_326 = arith.constant 17 : i32
    %553 = tpu.dynamic_rotate %430 by %c17_i32_326 dim 1 : vector<8x256xf32>, i32 -> vector<8x256xf32>
    %c0_327 = arith.constant 0 : index
    %c0_328 = arith.constant 0 : index
    %c0_329 = arith.constant 0 : index
    %554 = vector.load %arg2[%c0_327, %c0_328, %c0_329] : memref<9x1x256xf32, #tpu.memory_space<vmem>>, vector<1x1x256xf32>
    %555 = vector.shape_cast %554 : vector<1x1x256xf32> to vector<1x256xf32>
    %556 = vector.broadcast %555 : vector<1x256xf32> to vector<8x256xf32>
    %557 = arith.mulf %553, %556 : vector<8x256xf32>
    %558 = vector.broadcast %552 : vector<8x1xf32> to vector<8x256xf32>
    %559 = arith.mulf %557, %558 : vector<8x256xf32>
    %c10_330 = arith.constant 10 : index
    %c0_331 = arith.constant 0 : index
    %c0_332 = arith.constant 0 : index
    %560 = vector.load %arg4[%c10_330, %c0_331, %c0_332] : memref<36x8x1xf32, #tpu.memory_space<vmem>>, vector<1x8x1xf32>
    %561 = vector.shape_cast %560 : vector<1x8x1xf32> to vector<8x1xf32>
    %c16_i32_333 = arith.constant 16 : i32
    %562 = tpu.dynamic_rotate %430 by %c16_i32_333 dim 1 : vector<8x256xf32>, i32 -> vector<8x256xf32>
    %c1_334 = arith.constant 1 : index
    %c0_335 = arith.constant 0 : index
    %c0_336 = arith.constant 0 : index
    %563 = vector.load %arg2[%c1_334, %c0_335, %c0_336] : memref<9x1x256xf32, #tpu.memory_space<vmem>>, vector<1x1x256xf32>
    %564 = vector.shape_cast %563 : vector<1x1x256xf32> to vector<1x256xf32>
    %565 = vector.broadcast %564 : vector<1x256xf32> to vector<8x256xf32>
    %566 = arith.mulf %562, %565 : vector<8x256xf32>
    %567 = vector.broadcast %561 : vector<8x1xf32> to vector<8x256xf32>
    %568 = arith.mulf %566, %567 : vector<8x256xf32>
    %569 = arith.addf %559, %568 : vector<8x256xf32>
    %c11_337 = arith.constant 11 : index
    %c0_338 = arith.constant 0 : index
    %c0_339 = arith.constant 0 : index
    %570 = vector.load %arg4[%c11_337, %c0_338, %c0_339] : memref<36x8x1xf32, #tpu.memory_space<vmem>>, vector<1x8x1xf32>
    %571 = vector.shape_cast %570 : vector<1x8x1xf32> to vector<8x1xf32>
    %c15_i32_340 = arith.constant 15 : i32
    %572 = tpu.dynamic_rotate %430 by %c15_i32_340 dim 1 : vector<8x256xf32>, i32 -> vector<8x256xf32>
    %c2_341 = arith.constant 2 : index
    %c0_342 = arith.constant 0 : index
    %c0_343 = arith.constant 0 : index
    %573 = vector.load %arg2[%c2_341, %c0_342, %c0_343] : memref<9x1x256xf32, #tpu.memory_space<vmem>>, vector<1x1x256xf32>
    %574 = vector.shape_cast %573 : vector<1x1x256xf32> to vector<1x256xf32>
    %575 = vector.broadcast %574 : vector<1x256xf32> to vector<8x256xf32>
    %576 = arith.mulf %572, %575 : vector<8x256xf32>
    %577 = vector.broadcast %571 : vector<8x1xf32> to vector<8x256xf32>
    %578 = arith.mulf %576, %577 : vector<8x256xf32>
    %579 = arith.addf %569, %578 : vector<8x256xf32>
    %c12_344 = arith.constant 12 : index
    %c0_345 = arith.constant 0 : index
    %c0_346 = arith.constant 0 : index
    %580 = vector.load %arg4[%c12_344, %c0_345, %c0_346] : memref<36x8x1xf32, #tpu.memory_space<vmem>>, vector<1x8x1xf32>
    %581 = vector.shape_cast %580 : vector<1x8x1xf32> to vector<8x1xf32>
    %c1_i32_347 = arith.constant 1 : i32
    %582 = tpu.dynamic_rotate %430 by %c1_i32_347 dim 1 : vector<8x256xf32>, i32 -> vector<8x256xf32>
    %c3_348 = arith.constant 3 : index
    %c0_349 = arith.constant 0 : index
    %c0_350 = arith.constant 0 : index
    %583 = vector.load %arg2[%c3_348, %c0_349, %c0_350] : memref<9x1x256xf32, #tpu.memory_space<vmem>>, vector<1x1x256xf32>
    %584 = vector.shape_cast %583 : vector<1x1x256xf32> to vector<1x256xf32>
    %585 = vector.broadcast %584 : vector<1x256xf32> to vector<8x256xf32>
    %586 = arith.mulf %582, %585 : vector<8x256xf32>
    %587 = vector.broadcast %581 : vector<8x1xf32> to vector<8x256xf32>
    %588 = arith.mulf %586, %587 : vector<8x256xf32>
    %589 = arith.addf %579, %588 : vector<8x256xf32>
    %c13_351 = arith.constant 13 : index
    %c0_352 = arith.constant 0 : index
    %c0_353 = arith.constant 0 : index
    %590 = vector.load %arg4[%c13_351, %c0_352, %c0_353] : memref<36x8x1xf32, #tpu.memory_space<vmem>>, vector<1x8x1xf32>
    %591 = vector.shape_cast %590 : vector<1x8x1xf32> to vector<8x1xf32>
    %592 = vector.broadcast %591 : vector<8x1xf32> to vector<8x256xf32>
    %593 = arith.mulf %430, %592 : vector<8x256xf32>
    %594 = arith.addf %589, %593 : vector<8x256xf32>
    %c14_354 = arith.constant 14 : index
    %c0_355 = arith.constant 0 : index
    %c0_356 = arith.constant 0 : index
    %595 = vector.load %arg4[%c14_354, %c0_355, %c0_356] : memref<36x8x1xf32, #tpu.memory_space<vmem>>, vector<1x8x1xf32>
    %596 = vector.shape_cast %595 : vector<1x8x1xf32> to vector<8x1xf32>
    %c255_i32_357 = arith.constant 255 : i32
    %597 = tpu.dynamic_rotate %430 by %c255_i32_357 dim 1 : vector<8x256xf32>, i32 -> vector<8x256xf32>
    %c5_358 = arith.constant 5 : index
    %c0_359 = arith.constant 0 : index
    %c0_360 = arith.constant 0 : index
    %598 = vector.load %arg2[%c5_358, %c0_359, %c0_360] : memref<9x1x256xf32, #tpu.memory_space<vmem>>, vector<1x1x256xf32>
    %599 = vector.shape_cast %598 : vector<1x1x256xf32> to vector<1x256xf32>
    %600 = vector.broadcast %599 : vector<1x256xf32> to vector<8x256xf32>
    %601 = arith.mulf %597, %600 : vector<8x256xf32>
    %602 = vector.broadcast %596 : vector<8x1xf32> to vector<8x256xf32>
    %603 = arith.mulf %601, %602 : vector<8x256xf32>
    %604 = arith.addf %594, %603 : vector<8x256xf32>
    %c15_361 = arith.constant 15 : index
    %c0_362 = arith.constant 0 : index
    %c0_363 = arith.constant 0 : index
    %605 = vector.load %arg4[%c15_361, %c0_362, %c0_363] : memref<36x8x1xf32, #tpu.memory_space<vmem>>, vector<1x8x1xf32>
    %606 = vector.shape_cast %605 : vector<1x8x1xf32> to vector<8x1xf32>
    %c241_i32_364 = arith.constant 241 : i32
    %607 = tpu.dynamic_rotate %430 by %c241_i32_364 dim 1 : vector<8x256xf32>, i32 -> vector<8x256xf32>
    %c6_365 = arith.constant 6 : index
    %c0_366 = arith.constant 0 : index
    %c0_367 = arith.constant 0 : index
    %608 = vector.load %arg2[%c6_365, %c0_366, %c0_367] : memref<9x1x256xf32, #tpu.memory_space<vmem>>, vector<1x1x256xf32>
    %609 = vector.shape_cast %608 : vector<1x1x256xf32> to vector<1x256xf32>
    %610 = vector.broadcast %609 : vector<1x256xf32> to vector<8x256xf32>
    %611 = arith.mulf %607, %610 : vector<8x256xf32>
    %612 = vector.broadcast %606 : vector<8x1xf32> to vector<8x256xf32>
    %613 = arith.mulf %611, %612 : vector<8x256xf32>
    %614 = arith.addf %604, %613 : vector<8x256xf32>
    %c16_368 = arith.constant 16 : index
    %c0_369 = arith.constant 0 : index
    %c0_370 = arith.constant 0 : index
    %615 = vector.load %arg4[%c16_368, %c0_369, %c0_370] : memref<36x8x1xf32, #tpu.memory_space<vmem>>, vector<1x8x1xf32>
    %616 = vector.shape_cast %615 : vector<1x8x1xf32> to vector<8x1xf32>
    %c240_i32_371 = arith.constant 240 : i32
    %617 = tpu.dynamic_rotate %430 by %c240_i32_371 dim 1 : vector<8x256xf32>, i32 -> vector<8x256xf32>
    %c7_372 = arith.constant 7 : index
    %c0_373 = arith.constant 0 : index
    %c0_374 = arith.constant 0 : index
    %618 = vector.load %arg2[%c7_372, %c0_373, %c0_374] : memref<9x1x256xf32, #tpu.memory_space<vmem>>, vector<1x1x256xf32>
    %619 = vector.shape_cast %618 : vector<1x1x256xf32> to vector<1x256xf32>
    %620 = vector.broadcast %619 : vector<1x256xf32> to vector<8x256xf32>
    %621 = arith.mulf %617, %620 : vector<8x256xf32>
    %622 = vector.broadcast %616 : vector<8x1xf32> to vector<8x256xf32>
    %623 = arith.mulf %621, %622 : vector<8x256xf32>
    %624 = arith.addf %614, %623 : vector<8x256xf32>
    %c17_375 = arith.constant 17 : index
    %c0_376 = arith.constant 0 : index
    %c0_377 = arith.constant 0 : index
    %625 = vector.load %arg4[%c17_375, %c0_376, %c0_377] : memref<36x8x1xf32, #tpu.memory_space<vmem>>, vector<1x8x1xf32>
    %626 = vector.shape_cast %625 : vector<1x8x1xf32> to vector<8x1xf32>
    %c239_i32_378 = arith.constant 239 : i32
    %627 = tpu.dynamic_rotate %430 by %c239_i32_378 dim 1 : vector<8x256xf32>, i32 -> vector<8x256xf32>
    %c8_379 = arith.constant 8 : index
    %c0_380 = arith.constant 0 : index
    %c0_381 = arith.constant 0 : index
    %628 = vector.load %arg2[%c8_379, %c0_380, %c0_381] : memref<9x1x256xf32, #tpu.memory_space<vmem>>, vector<1x1x256xf32>
    %629 = vector.shape_cast %628 : vector<1x1x256xf32> to vector<1x256xf32>
    %630 = vector.broadcast %629 : vector<1x256xf32> to vector<8x256xf32>
    %631 = arith.mulf %627, %630 : vector<8x256xf32>
    %632 = vector.broadcast %626 : vector<8x1xf32> to vector<8x256xf32>
    %633 = arith.mulf %631, %632 : vector<8x256xf32>
    %634 = arith.addf %624, %633 : vector<8x256xf32>
    %c1_382 = arith.constant 1 : index
    %c0_383 = arith.constant 0 : index
    %c0_384 = arith.constant 0 : index
    %635 = vector.load %arg5[%c1_382, %c0_383, %c0_384] : memref<4x8x1xf32, #tpu.memory_space<vmem>>, vector<1x8x1xf32>
    %636 = vector.shape_cast %635 : vector<1x8x1xf32> to vector<8x1xf32>
    %637 = vector.broadcast %636 : vector<8x1xf32> to vector<8x256xf32>
    %638 = arith.addf %634, %637 : vector<8x256xf32>
    %cst_385 = arith.constant 0.000000e+00 : f32
    %639 = vector.broadcast %cst_385 : f32 to vector<8x256xf32>
    %640 = arith.maximumf %638, %639 : vector<8x256xf32>
    %c1_386 = arith.constant 1 : index
    %c0_387 = arith.constant 0 : index
    %c0_388 = arith.constant 0 : index
    %641 = vector.load %arg6[%c1_386, %c0_387, %c0_388] : memref<2x8x1xf32, #tpu.memory_space<vmem>>, vector<1x8x1xf32>
    %642 = vector.shape_cast %641 : vector<1x8x1xf32> to vector<8x1xf32>
    %643 = vector.broadcast %642 : vector<8x1xf32> to vector<8x256xf32>
    %644 = arith.mulf %640, %643 : vector<8x256xf32>
    %cst_389 = arith.constant dense<0.000000e+00> : vector<256xf32>
    %645 = vector.multi_reduction <add>, %644, %cst_389 [0] : vector<8x256xf32> to vector<256xf32>
    %646 = vector.shape_cast %645 : vector<256xf32> to vector<1x256xf32>
    %cst_390 = arith.constant 0.000000e+00 : f32
    %647 = vector.broadcast %cst_390 : f32 to vector<1x256xf32>
    %648 = arith.subf %647, %646 : vector<1x256xf32>
    %649 = math.exp %648 : vector<1x256xf32>
    %cst_391 = arith.constant 1.000000e+00 : f32
    %650 = vector.broadcast %cst_391 : f32 to vector<1x256xf32>
    %651 = arith.addf %650, %649 : vector<1x256xf32>
    %652 = tpu.reciprocal %651 {approx = true} : vector<1x256xf32> -> vector<1x256xf32>
    %653 = vector.broadcast %652 : vector<1x256xf32> to vector<8x256xf32>
    %654 = arith.mulf %430, %653 : vector<8x256xf32>
    %cst_392 = arith.constant dense<0.000000e+00> : vector<8xf32>
    %655 = vector.multi_reduction <add>, %654, %cst_392 [1] : vector<8x256xf32> to vector<8xf32>
    %656 = vector.shape_cast %655 : vector<8xf32> to vector<8x1xf32>
    %cst_393 = arith.constant 3.906250e-03 : f32
    %657 = vector.broadcast %cst_393 : f32 to vector<8x1xf32>
    %658 = arith.mulf %656, %657 : vector<8x1xf32>
    %c1_394 = arith.constant 1 : index
    %c0_395 = arith.constant 0 : index
    %c0_396 = arith.constant 0 : index
    %659 = vector.load %arg7[%c1_394, %c0_395, %c0_396] : memref<2x8x8xf32, #tpu.memory_space<vmem>>, vector<1x8x8xf32>
    %660 = vector.shape_cast %659 : vector<1x8x8xf32> to vector<8x8xf32>
    %cst_397 = arith.constant dense<0.000000e+00> : vector<8x1xf32>
    %661 = tpu.matmul %660, %658, %cst_397 {dimension_numbers = #tpu.dot_dimension_numbers<[1], [0], [0], [1], [0, 0, 1, 1], [], []>} : vector<8x8xf32>, vector<8x1xf32>, vector<8x1xf32> -> vector<8x1xf32>
    %cst_398 = arith.constant 0.000000e+00 : f32
    %662 = vector.broadcast %cst_398 : f32 to vector<8x1xf32>
    %663 = arith.subf %662, %661 : vector<8x1xf32>
    %664 = math.exp %663 : vector<8x1xf32>
    %cst_399 = arith.constant 1.000000e+00 : f32
    %665 = vector.broadcast %cst_399 : f32 to vector<8x1xf32>
    %666 = arith.addf %665, %664 : vector<8x1xf32>
    %667 = tpu.reciprocal %666 {approx = true} : vector<8x1xf32> -> vector<8x1xf32>
    %668 = vector.broadcast %667 : vector<8x1xf32> to vector<8x256xf32>
    %669 = arith.mulf %654, %668 : vector<8x256xf32>
    %670 = arith.addf %550, %669 : vector<8x256xf32>
    %c18_400 = arith.constant 18 : index
    %c0_401 = arith.constant 0 : index
    %c0_402 = arith.constant 0 : index
    %671 = vector.load %arg4[%c18_400, %c0_401, %c0_402] : memref<36x8x1xf32, #tpu.memory_space<vmem>>, vector<1x8x1xf32>
    %672 = vector.shape_cast %671 : vector<1x8x1xf32> to vector<8x1xf32>
    %c17_i32_403 = arith.constant 17 : i32
    %673 = tpu.dynamic_rotate %670 by %c17_i32_403 dim 1 : vector<8x256xf32>, i32 -> vector<8x256xf32>
    %c0_404 = arith.constant 0 : index
    %c0_405 = arith.constant 0 : index
    %c0_406 = arith.constant 0 : index
    %674 = vector.load %arg2[%c0_404, %c0_405, %c0_406] : memref<9x1x256xf32, #tpu.memory_space<vmem>>, vector<1x1x256xf32>
    %675 = vector.shape_cast %674 : vector<1x1x256xf32> to vector<1x256xf32>
    %676 = vector.broadcast %675 : vector<1x256xf32> to vector<8x256xf32>
    %677 = arith.mulf %673, %676 : vector<8x256xf32>
    %678 = vector.broadcast %672 : vector<8x1xf32> to vector<8x256xf32>
    %679 = arith.mulf %677, %678 : vector<8x256xf32>
    %c19_407 = arith.constant 19 : index
    %c0_408 = arith.constant 0 : index
    %c0_409 = arith.constant 0 : index
    %680 = vector.load %arg4[%c19_407, %c0_408, %c0_409] : memref<36x8x1xf32, #tpu.memory_space<vmem>>, vector<1x8x1xf32>
    %681 = vector.shape_cast %680 : vector<1x8x1xf32> to vector<8x1xf32>
    %c16_i32_410 = arith.constant 16 : i32
    %682 = tpu.dynamic_rotate %670 by %c16_i32_410 dim 1 : vector<8x256xf32>, i32 -> vector<8x256xf32>
    %c1_411 = arith.constant 1 : index
    %c0_412 = arith.constant 0 : index
    %c0_413 = arith.constant 0 : index
    %683 = vector.load %arg2[%c1_411, %c0_412, %c0_413] : memref<9x1x256xf32, #tpu.memory_space<vmem>>, vector<1x1x256xf32>
    %684 = vector.shape_cast %683 : vector<1x1x256xf32> to vector<1x256xf32>
    %685 = vector.broadcast %684 : vector<1x256xf32> to vector<8x256xf32>
    %686 = arith.mulf %682, %685 : vector<8x256xf32>
    %687 = vector.broadcast %681 : vector<8x1xf32> to vector<8x256xf32>
    %688 = arith.mulf %686, %687 : vector<8x256xf32>
    %689 = arith.addf %679, %688 : vector<8x256xf32>
    %c20_414 = arith.constant 20 : index
    %c0_415 = arith.constant 0 : index
    %c0_416 = arith.constant 0 : index
    %690 = vector.load %arg4[%c20_414, %c0_415, %c0_416] : memref<36x8x1xf32, #tpu.memory_space<vmem>>, vector<1x8x1xf32>
    %691 = vector.shape_cast %690 : vector<1x8x1xf32> to vector<8x1xf32>
    %c15_i32_417 = arith.constant 15 : i32
    %692 = tpu.dynamic_rotate %670 by %c15_i32_417 dim 1 : vector<8x256xf32>, i32 -> vector<8x256xf32>
    %c2_418 = arith.constant 2 : index
    %c0_419 = arith.constant 0 : index
    %c0_420 = arith.constant 0 : index
    %693 = vector.load %arg2[%c2_418, %c0_419, %c0_420] : memref<9x1x256xf32, #tpu.memory_space<vmem>>, vector<1x1x256xf32>
    %694 = vector.shape_cast %693 : vector<1x1x256xf32> to vector<1x256xf32>
    %695 = vector.broadcast %694 : vector<1x256xf32> to vector<8x256xf32>
    %696 = arith.mulf %692, %695 : vector<8x256xf32>
    %697 = vector.broadcast %691 : vector<8x1xf32> to vector<8x256xf32>
    %698 = arith.mulf %696, %697 : vector<8x256xf32>
    %699 = arith.addf %689, %698 : vector<8x256xf32>
    %c21_421 = arith.constant 21 : index
    %c0_422 = arith.constant 0 : index
    %c0_423 = arith.constant 0 : index
    %700 = vector.load %arg4[%c21_421, %c0_422, %c0_423] : memref<36x8x1xf32, #tpu.memory_space<vmem>>, vector<1x8x1xf32>
    %701 = vector.shape_cast %700 : vector<1x8x1xf32> to vector<8x1xf32>
    %c1_i32_424 = arith.constant 1 : i32
    %702 = tpu.dynamic_rotate %670 by %c1_i32_424 dim 1 : vector<8x256xf32>, i32 -> vector<8x256xf32>
    %c3_425 = arith.constant 3 : index
    %c0_426 = arith.constant 0 : index
    %c0_427 = arith.constant 0 : index
    %703 = vector.load %arg2[%c3_425, %c0_426, %c0_427] : memref<9x1x256xf32, #tpu.memory_space<vmem>>, vector<1x1x256xf32>
    %704 = vector.shape_cast %703 : vector<1x1x256xf32> to vector<1x256xf32>
    %705 = vector.broadcast %704 : vector<1x256xf32> to vector<8x256xf32>
    %706 = arith.mulf %702, %705 : vector<8x256xf32>
    %707 = vector.broadcast %701 : vector<8x1xf32> to vector<8x256xf32>
    %708 = arith.mulf %706, %707 : vector<8x256xf32>
    %709 = arith.addf %699, %708 : vector<8x256xf32>
    %c22_428 = arith.constant 22 : index
    %c0_429 = arith.constant 0 : index
    %c0_430 = arith.constant 0 : index
    %710 = vector.load %arg4[%c22_428, %c0_429, %c0_430] : memref<36x8x1xf32, #tpu.memory_space<vmem>>, vector<1x8x1xf32>
    %711 = vector.shape_cast %710 : vector<1x8x1xf32> to vector<8x1xf32>
    %712 = vector.broadcast %711 : vector<8x1xf32> to vector<8x256xf32>
    %713 = arith.mulf %670, %712 : vector<8x256xf32>
    %714 = arith.addf %709, %713 : vector<8x256xf32>
    %c23_431 = arith.constant 23 : index
    %c0_432 = arith.constant 0 : index
    %c0_433 = arith.constant 0 : index
    %715 = vector.load %arg4[%c23_431, %c0_432, %c0_433] : memref<36x8x1xf32, #tpu.memory_space<vmem>>, vector<1x8x1xf32>
    %716 = vector.shape_cast %715 : vector<1x8x1xf32> to vector<8x1xf32>
    %c255_i32_434 = arith.constant 255 : i32
    %717 = tpu.dynamic_rotate %670 by %c255_i32_434 dim 1 : vector<8x256xf32>, i32 -> vector<8x256xf32>
    %c5_435 = arith.constant 5 : index
    %c0_436 = arith.constant 0 : index
    %c0_437 = arith.constant 0 : index
    %718 = vector.load %arg2[%c5_435, %c0_436, %c0_437] : memref<9x1x256xf32, #tpu.memory_space<vmem>>, vector<1x1x256xf32>
    %719 = vector.shape_cast %718 : vector<1x1x256xf32> to vector<1x256xf32>
    %720 = vector.broadcast %719 : vector<1x256xf32> to vector<8x256xf32>
    %721 = arith.mulf %717, %720 : vector<8x256xf32>
    %722 = vector.broadcast %716 : vector<8x1xf32> to vector<8x256xf32>
    %723 = arith.mulf %721, %722 : vector<8x256xf32>
    %724 = arith.addf %714, %723 : vector<8x256xf32>
    %c24_438 = arith.constant 24 : index
    %c0_439 = arith.constant 0 : index
    %c0_440 = arith.constant 0 : index
    %725 = vector.load %arg4[%c24_438, %c0_439, %c0_440] : memref<36x8x1xf32, #tpu.memory_space<vmem>>, vector<1x8x1xf32>
    %726 = vector.shape_cast %725 : vector<1x8x1xf32> to vector<8x1xf32>
    %c241_i32_441 = arith.constant 241 : i32
    %727 = tpu.dynamic_rotate %670 by %c241_i32_441 dim 1 : vector<8x256xf32>, i32 -> vector<8x256xf32>
    %c6_442 = arith.constant 6 : index
    %c0_443 = arith.constant 0 : index
    %c0_444 = arith.constant 0 : index
    %728 = vector.load %arg2[%c6_442, %c0_443, %c0_444] : memref<9x1x256xf32, #tpu.memory_space<vmem>>, vector<1x1x256xf32>
    %729 = vector.shape_cast %728 : vector<1x1x256xf32> to vector<1x256xf32>
    %730 = vector.broadcast %729 : vector<1x256xf32> to vector<8x256xf32>
    %731 = arith.mulf %727, %730 : vector<8x256xf32>
    %732 = vector.broadcast %726 : vector<8x1xf32> to vector<8x256xf32>
    %733 = arith.mulf %731, %732 : vector<8x256xf32>
    %734 = arith.addf %724, %733 : vector<8x256xf32>
    %c25_445 = arith.constant 25 : index
    %c0_446 = arith.constant 0 : index
    %c0_447 = arith.constant 0 : index
    %735 = vector.load %arg4[%c25_445, %c0_446, %c0_447] : memref<36x8x1xf32, #tpu.memory_space<vmem>>, vector<1x8x1xf32>
    %736 = vector.shape_cast %735 : vector<1x8x1xf32> to vector<8x1xf32>
    %c240_i32_448 = arith.constant 240 : i32
    %737 = tpu.dynamic_rotate %670 by %c240_i32_448 dim 1 : vector<8x256xf32>, i32 -> vector<8x256xf32>
    %c7_449 = arith.constant 7 : index
    %c0_450 = arith.constant 0 : index
    %c0_451 = arith.constant 0 : index
    %738 = vector.load %arg2[%c7_449, %c0_450, %c0_451] : memref<9x1x256xf32, #tpu.memory_space<vmem>>, vector<1x1x256xf32>
    %739 = vector.shape_cast %738 : vector<1x1x256xf32> to vector<1x256xf32>
    %740 = vector.broadcast %739 : vector<1x256xf32> to vector<8x256xf32>
    %741 = arith.mulf %737, %740 : vector<8x256xf32>
    %742 = vector.broadcast %736 : vector<8x1xf32> to vector<8x256xf32>
    %743 = arith.mulf %741, %742 : vector<8x256xf32>
    %744 = arith.addf %734, %743 : vector<8x256xf32>
    %c26_452 = arith.constant 26 : index
    %c0_453 = arith.constant 0 : index
    %c0_454 = arith.constant 0 : index
    %745 = vector.load %arg4[%c26_452, %c0_453, %c0_454] : memref<36x8x1xf32, #tpu.memory_space<vmem>>, vector<1x8x1xf32>
    %746 = vector.shape_cast %745 : vector<1x8x1xf32> to vector<8x1xf32>
    %c239_i32_455 = arith.constant 239 : i32
    %747 = tpu.dynamic_rotate %670 by %c239_i32_455 dim 1 : vector<8x256xf32>, i32 -> vector<8x256xf32>
    %c8_456 = arith.constant 8 : index
    %c0_457 = arith.constant 0 : index
    %c0_458 = arith.constant 0 : index
    %748 = vector.load %arg2[%c8_456, %c0_457, %c0_458] : memref<9x1x256xf32, #tpu.memory_space<vmem>>, vector<1x1x256xf32>
    %749 = vector.shape_cast %748 : vector<1x1x256xf32> to vector<1x256xf32>
    %750 = vector.broadcast %749 : vector<1x256xf32> to vector<8x256xf32>
    %751 = arith.mulf %747, %750 : vector<8x256xf32>
    %752 = vector.broadcast %746 : vector<8x1xf32> to vector<8x256xf32>
    %753 = arith.mulf %751, %752 : vector<8x256xf32>
    %754 = arith.addf %744, %753 : vector<8x256xf32>
    %c2_459 = arith.constant 2 : index
    %c0_460 = arith.constant 0 : index
    %c0_461 = arith.constant 0 : index
    %755 = vector.load %arg5[%c2_459, %c0_460, %c0_461] : memref<4x8x1xf32, #tpu.memory_space<vmem>>, vector<1x8x1xf32>
    %756 = vector.shape_cast %755 : vector<1x8x1xf32> to vector<8x1xf32>
    %757 = vector.broadcast %756 : vector<8x1xf32> to vector<8x256xf32>
    %758 = arith.addf %754, %757 : vector<8x256xf32>
    %759 = arith.mulf %758, %431 : vector<8x256xf32>
    %c27_462 = arith.constant 27 : index
    %c0_463 = arith.constant 0 : index
    %c0_464 = arith.constant 0 : index
    %760 = vector.load %arg4[%c27_462, %c0_463, %c0_464] : memref<36x8x1xf32, #tpu.memory_space<vmem>>, vector<1x8x1xf32>
    %761 = vector.shape_cast %760 : vector<1x8x1xf32> to vector<8x1xf32>
    %c17_i32_465 = arith.constant 17 : i32
    %762 = tpu.dynamic_rotate %759 by %c17_i32_465 dim 1 : vector<8x256xf32>, i32 -> vector<8x256xf32>
    %c0_466 = arith.constant 0 : index
    %c0_467 = arith.constant 0 : index
    %c0_468 = arith.constant 0 : index
    %763 = vector.load %arg2[%c0_466, %c0_467, %c0_468] : memref<9x1x256xf32, #tpu.memory_space<vmem>>, vector<1x1x256xf32>
    %764 = vector.shape_cast %763 : vector<1x1x256xf32> to vector<1x256xf32>
    %765 = vector.broadcast %764 : vector<1x256xf32> to vector<8x256xf32>
    %766 = arith.mulf %762, %765 : vector<8x256xf32>
    %767 = vector.broadcast %761 : vector<8x1xf32> to vector<8x256xf32>
    %768 = arith.mulf %766, %767 : vector<8x256xf32>
    %c28_469 = arith.constant 28 : index
    %c0_470 = arith.constant 0 : index
    %c0_471 = arith.constant 0 : index
    %769 = vector.load %arg4[%c28_469, %c0_470, %c0_471] : memref<36x8x1xf32, #tpu.memory_space<vmem>>, vector<1x8x1xf32>
    %770 = vector.shape_cast %769 : vector<1x8x1xf32> to vector<8x1xf32>
    %c16_i32_472 = arith.constant 16 : i32
    %771 = tpu.dynamic_rotate %759 by %c16_i32_472 dim 1 : vector<8x256xf32>, i32 -> vector<8x256xf32>
    %c1_473 = arith.constant 1 : index
    %c0_474 = arith.constant 0 : index
    %c0_475 = arith.constant 0 : index
    %772 = vector.load %arg2[%c1_473, %c0_474, %c0_475] : memref<9x1x256xf32, #tpu.memory_space<vmem>>, vector<1x1x256xf32>
    %773 = vector.shape_cast %772 : vector<1x1x256xf32> to vector<1x256xf32>
    %774 = vector.broadcast %773 : vector<1x256xf32> to vector<8x256xf32>
    %775 = arith.mulf %771, %774 : vector<8x256xf32>
    %776 = vector.broadcast %770 : vector<8x1xf32> to vector<8x256xf32>
    %777 = arith.mulf %775, %776 : vector<8x256xf32>
    %778 = arith.addf %768, %777 : vector<8x256xf32>
    %c29_476 = arith.constant 29 : index
    %c0_477 = arith.constant 0 : index
    %c0_478 = arith.constant 0 : index
    %779 = vector.load %arg4[%c29_476, %c0_477, %c0_478] : memref<36x8x1xf32, #tpu.memory_space<vmem>>, vector<1x8x1xf32>
    %780 = vector.shape_cast %779 : vector<1x8x1xf32> to vector<8x1xf32>
    %c15_i32_479 = arith.constant 15 : i32
    %781 = tpu.dynamic_rotate %759 by %c15_i32_479 dim 1 : vector<8x256xf32>, i32 -> vector<8x256xf32>
    %c2_480 = arith.constant 2 : index
    %c0_481 = arith.constant 0 : index
    %c0_482 = arith.constant 0 : index
    %782 = vector.load %arg2[%c2_480, %c0_481, %c0_482] : memref<9x1x256xf32, #tpu.memory_space<vmem>>, vector<1x1x256xf32>
    %783 = vector.shape_cast %782 : vector<1x1x256xf32> to vector<1x256xf32>
    %784 = vector.broadcast %783 : vector<1x256xf32> to vector<8x256xf32>
    %785 = arith.mulf %781, %784 : vector<8x256xf32>
    %786 = vector.broadcast %780 : vector<8x1xf32> to vector<8x256xf32>
    %787 = arith.mulf %785, %786 : vector<8x256xf32>
    %788 = arith.addf %778, %787 : vector<8x256xf32>
    %c30_483 = arith.constant 30 : index
    %c0_484 = arith.constant 0 : index
    %c0_485 = arith.constant 0 : index
    %789 = vector.load %arg4[%c30_483, %c0_484, %c0_485] : memref<36x8x1xf32, #tpu.memory_space<vmem>>, vector<1x8x1xf32>
    %790 = vector.shape_cast %789 : vector<1x8x1xf32> to vector<8x1xf32>
    %c1_i32_486 = arith.constant 1 : i32
    %791 = tpu.dynamic_rotate %759 by %c1_i32_486 dim 1 : vector<8x256xf32>, i32 -> vector<8x256xf32>
    %c3_487 = arith.constant 3 : index
    %c0_488 = arith.constant 0 : index
    %c0_489 = arith.constant 0 : index
    %792 = vector.load %arg2[%c3_487, %c0_488, %c0_489] : memref<9x1x256xf32, #tpu.memory_space<vmem>>, vector<1x1x256xf32>
    %793 = vector.shape_cast %792 : vector<1x1x256xf32> to vector<1x256xf32>
    %794 = vector.broadcast %793 : vector<1x256xf32> to vector<8x256xf32>
    %795 = arith.mulf %791, %794 : vector<8x256xf32>
    %796 = vector.broadcast %790 : vector<8x1xf32> to vector<8x256xf32>
    %797 = arith.mulf %795, %796 : vector<8x256xf32>
    %798 = arith.addf %788, %797 : vector<8x256xf32>
    %c31_490 = arith.constant 31 : index
    %c0_491 = arith.constant 0 : index
    %c0_492 = arith.constant 0 : index
    %799 = vector.load %arg4[%c31_490, %c0_491, %c0_492] : memref<36x8x1xf32, #tpu.memory_space<vmem>>, vector<1x8x1xf32>
    %800 = vector.shape_cast %799 : vector<1x8x1xf32> to vector<8x1xf32>
    %801 = vector.broadcast %800 : vector<8x1xf32> to vector<8x256xf32>
    %802 = arith.mulf %759, %801 : vector<8x256xf32>
    %803 = arith.addf %798, %802 : vector<8x256xf32>
    %c32_493 = arith.constant 32 : index
    %c0_494 = arith.constant 0 : index
    %c0_495 = arith.constant 0 : index
    %804 = vector.load %arg4[%c32_493, %c0_494, %c0_495] : memref<36x8x1xf32, #tpu.memory_space<vmem>>, vector<1x8x1xf32>
    %805 = vector.shape_cast %804 : vector<1x8x1xf32> to vector<8x1xf32>
    %c255_i32_496 = arith.constant 255 : i32
    %806 = tpu.dynamic_rotate %759 by %c255_i32_496 dim 1 : vector<8x256xf32>, i32 -> vector<8x256xf32>
    %c5_497 = arith.constant 5 : index
    %c0_498 = arith.constant 0 : index
    %c0_499 = arith.constant 0 : index
    %807 = vector.load %arg2[%c5_497, %c0_498, %c0_499] : memref<9x1x256xf32, #tpu.memory_space<vmem>>, vector<1x1x256xf32>
    %808 = vector.shape_cast %807 : vector<1x1x256xf32> to vector<1x256xf32>
    %809 = vector.broadcast %808 : vector<1x256xf32> to vector<8x256xf32>
    %810 = arith.mulf %806, %809 : vector<8x256xf32>
    %811 = vector.broadcast %805 : vector<8x1xf32> to vector<8x256xf32>
    %812 = arith.mulf %810, %811 : vector<8x256xf32>
    %813 = arith.addf %803, %812 : vector<8x256xf32>
    %c33_500 = arith.constant 33 : index
    %c0_501 = arith.constant 0 : index
    %c0_502 = arith.constant 0 : index
    %814 = vector.load %arg4[%c33_500, %c0_501, %c0_502] : memref<36x8x1xf32, #tpu.memory_space<vmem>>, vector<1x8x1xf32>
    %815 = vector.shape_cast %814 : vector<1x8x1xf32> to vector<8x1xf32>
    %c241_i32_503 = arith.constant 241 : i32
    %816 = tpu.dynamic_rotate %759 by %c241_i32_503 dim 1 : vector<8x256xf32>, i32 -> vector<8x256xf32>
    %c6_504 = arith.constant 6 : index
    %c0_505 = arith.constant 0 : index
    %c0_506 = arith.constant 0 : index
    %817 = vector.load %arg2[%c6_504, %c0_505, %c0_506] : memref<9x1x256xf32, #tpu.memory_space<vmem>>, vector<1x1x256xf32>
    %818 = vector.shape_cast %817 : vector<1x1x256xf32> to vector<1x256xf32>
    %819 = vector.broadcast %818 : vector<1x256xf32> to vector<8x256xf32>
    %820 = arith.mulf %816, %819 : vector<8x256xf32>
    %821 = vector.broadcast %815 : vector<8x1xf32> to vector<8x256xf32>
    %822 = arith.mulf %820, %821 : vector<8x256xf32>
    %823 = arith.addf %813, %822 : vector<8x256xf32>
    %c34_507 = arith.constant 34 : index
    %c0_508 = arith.constant 0 : index
    %c0_509 = arith.constant 0 : index
    %824 = vector.load %arg4[%c34_507, %c0_508, %c0_509] : memref<36x8x1xf32, #tpu.memory_space<vmem>>, vector<1x8x1xf32>
    %825 = vector.shape_cast %824 : vector<1x8x1xf32> to vector<8x1xf32>
    %c240_i32_510 = arith.constant 240 : i32
    %826 = tpu.dynamic_rotate %759 by %c240_i32_510 dim 1 : vector<8x256xf32>, i32 -> vector<8x256xf32>
    %c7_511 = arith.constant 7 : index
    %c0_512 = arith.constant 0 : index
    %c0_513 = arith.constant 0 : index
    %827 = vector.load %arg2[%c7_511, %c0_512, %c0_513] : memref<9x1x256xf32, #tpu.memory_space<vmem>>, vector<1x1x256xf32>
    %828 = vector.shape_cast %827 : vector<1x1x256xf32> to vector<1x256xf32>
    %829 = vector.broadcast %828 : vector<1x256xf32> to vector<8x256xf32>
    %830 = arith.mulf %826, %829 : vector<8x256xf32>
    %831 = vector.broadcast %825 : vector<8x1xf32> to vector<8x256xf32>
    %832 = arith.mulf %830, %831 : vector<8x256xf32>
    %833 = arith.addf %823, %832 : vector<8x256xf32>
    %c35_514 = arith.constant 35 : index
    %c0_515 = arith.constant 0 : index
    %c0_516 = arith.constant 0 : index
    %834 = vector.load %arg4[%c35_514, %c0_515, %c0_516] : memref<36x8x1xf32, #tpu.memory_space<vmem>>, vector<1x8x1xf32>
    %835 = vector.shape_cast %834 : vector<1x8x1xf32> to vector<8x1xf32>
    %c239_i32_517 = arith.constant 239 : i32
    %836 = tpu.dynamic_rotate %759 by %c239_i32_517 dim 1 : vector<8x256xf32>, i32 -> vector<8x256xf32>
    %c8_518 = arith.constant 8 : index
    %c0_519 = arith.constant 0 : index
    %c0_520 = arith.constant 0 : index
    %837 = vector.load %arg2[%c8_518, %c0_519, %c0_520] : memref<9x1x256xf32, #tpu.memory_space<vmem>>, vector<1x1x256xf32>
    %838 = vector.shape_cast %837 : vector<1x1x256xf32> to vector<1x256xf32>
    %839 = vector.broadcast %838 : vector<1x256xf32> to vector<8x256xf32>
    %840 = arith.mulf %836, %839 : vector<8x256xf32>
    %841 = vector.broadcast %835 : vector<8x1xf32> to vector<8x256xf32>
    %842 = arith.mulf %840, %841 : vector<8x256xf32>
    %843 = arith.addf %833, %842 : vector<8x256xf32>
    %c3_521 = arith.constant 3 : index
    %c0_522 = arith.constant 0 : index
    %c0_523 = arith.constant 0 : index
    %844 = vector.load %arg5[%c3_521, %c0_522, %c0_523] : memref<4x8x1xf32, #tpu.memory_space<vmem>>, vector<1x8x1xf32>
    %845 = vector.shape_cast %844 : vector<1x8x1xf32> to vector<8x1xf32>
    %846 = vector.broadcast %845 : vector<8x1xf32> to vector<8x256xf32>
    %847 = arith.addf %843, %846 : vector<8x256xf32>
    %c1_524 = arith.constant 1 : index
    %c0_525 = arith.constant 0 : index
    %c0_526 = arith.constant 0 : index
    %848 = vector.load %arg8[%c1_524, %c0_525, %c0_526] : memref<2x8x256xf32, #tpu.memory_space<vmem>>, vector<1x8x256xf32>
    %849 = vector.shape_cast %848 : vector<1x8x256xf32> to vector<8x256xf32>
    %850 = vector.shape_cast %847 : vector<8x256xf32> to vector<1x8x256xf32>
    tpu.vector_store %arg8[%c1_524, %c0_525, %c0_526], %850 {strides = array<i32>} : memref<2x8x256xf32, #tpu.memory_space<vmem>>, vector<1x8x256xf32>,
    return
  }
  func.func @transform_0(%arg0: i32) -> (i32, i32, i32) {
    %c0_i32 = arith.constant 0 : i32
    %c0_i32_0 = arith.constant 0 : i32
    %c0_i32_1 = arith.constant 0 : i32
    return %arg0, %c0_i32, %c0_i32_0 : i32, i32, i32
  }
  func.func @transform_1(%arg0: i32) -> (i32, i32, i32) {
    %c0_i32 = arith.constant 0 : i32
    %c0_i32_0 = arith.constant 0 : i32
    %c0_i32_1 = arith.constant 0 : i32
    %c0_i32_2 = arith.constant 0 : i32
    return %c0_i32, %c0_i32_0, %c0_i32_1 : i32, i32, i32
  }
  func.func @transform_2(%arg0: i32) -> (i32, i32) {
    %c0_i32 = arith.constant 0 : i32
    %c0_i32_0 = arith.constant 0 : i32
    %c0_i32_1 = arith.constant 0 : i32
    return %c0_i32, %c0_i32_0 : i32, i32
  }
  func.func @transform_3(%arg0: i32) -> (i32, i32, i32) {
    %c0_i32 = arith.constant 0 : i32
    %c0_i32_0 = arith.constant 0 : i32
    %c0_i32_1 = arith.constant 0 : i32
    %c0_i32_2 = arith.constant 0 : i32
    return %c0_i32, %c0_i32_0, %c0_i32_1 : i32, i32, i32
  }
  func.func @transform_4(%arg0: i32) -> (i32, i32, i32) {
    %c0_i32 = arith.constant 0 : i32
    %c0_i32_0 = arith.constant 0 : i32
    %c0_i32_1 = arith.constant 0 : i32
    %c0_i32_2 = arith.constant 0 : i32
    return %c0_i32, %c0_i32_0, %c0_i32_1 : i32, i32, i32
  }
  func.func @transform_5(%arg0: i32) -> (i32, i32, i32) {
    %c0_i32 = arith.constant 0 : i32
    %c0_i32_0 = arith.constant 0 : i32
    %c0_i32_1 = arith.constant 0 : i32
    %c0_i32_2 = arith.constant 0 : i32
    return %c0_i32, %c0_i32_0, %c0_i32_1 : i32, i32, i32
  }
  func.func @transform_6(%arg0: i32) -> (i32, i32, i32) {
    %c0_i32 = arith.constant 0 : i32
    %c0_i32_0 = arith.constant 0 : i32
    %c0_i32_1 = arith.constant 0 : i32
    %c0_i32_2 = arith.constant 0 : i32
    return %c0_i32, %c0_i32_0, %c0_i32_1 : i32, i32, i32
  }
  func.func @transform_7(%arg0: i32) -> (i32, i32, i32) {
    %c0_i32 = arith.constant 0 : i32
    %c0_i32_0 = arith.constant 0 : i32
    %c0_i32_1 = arith.constant 0 : i32
    return %arg0, %c0_i32, %c0_i32_0 : i32, i32, i32
  }
}

</mosaic_0001>

<bundles_post_ra>
// kernel: tpu_custom_call.1
= control target key start
LH: loop header
LB: loop body
LE: loop exit
PB: predicated region body
PF: predicated region fallthrough
CT: control target
= control target key end

     0   :  { %v2107_v4 = vmov 0   ;;  %vm52_vm0 = vcmask 1043456   ;;  %s3664_s0 = inlined_call_operand.vmem [shape: bf16[2,8,256], index: 0, kind: input, shape index: {}]   ;;  %s3665_s1 = inlined_call_operand.vmem [shape: f32[9,1,256], index: 1, kind: input, shape index: {}]   ;;  %s3666_s2 = inlined_call_operand.vmem [shape: bf16[24,8], index: 2, kind: input, shape index: {}]   ;;  %s3667_s3 = inlined_call_operand.vmem [shape: f32[36,8,1], index: 3, kind: input, shape index: {}]   ;;  %s3668_s4 = inlined_call_operand.vmem [shape: f32[4,8,1], index: 4, kind: input, shape index: {}]   ;;  %s3669_s5 = inlined_call_operand.vmem [shape: f32[2,8,1], index: 5, kind: input, shape index: {}]   ;;  %s3670_s6 = inlined_call_operand.vmem [shape: f32[2,8,8], index: 6, kind: input, shape index: {}]   ;;  %s3671_s7 = inlined_call_operand.hbm [shape: f32[2,8,256], index: 7, kind: output, shape index: {}]  }
   0x1   :  { %v31_v0 = vld [vmem:[%s3664_s0] sm:$0xff]  ;;  %v2164_v1 = vld [vmem:[%s3667_s3 + $0x8] sm:$0xff]  ;;  %2028 = vset.pattern.permute.xlu2 %v2107_v4  ;;  %2029 = vset.pattern.permute.xlu0 %v2107_v4 }
   0x2   :  { %v41_v2 = vunpack.c.l.b16 %v31_v0  ;;  %v42_v3 = vunpack.c.h.b16 %v31_v0  ;;  %v2169_v5 = vld [vmem:[%s3667_s3 + $0x20] sm:$0xff]  ;;  %140 = vperm.xlu2 %2028, %v2164_v1   ;;  %2027 = vset.pattern.permute.xlu1 %v2107_v4 }
   0x3   :  { %205 = vperm.xlu0 %2029, %v2169_v5  }
   0x4   :  { %v43_v6 = vpack.c.b16 %v41_v2, %v41_v2  ;;  %v44_v7 = vpack.c.b16 %v42_v3, %v42_v3 }
   0x5   :  { %12 = vsyncpa [#allocation3], 0  ;;  %v2178_v10 = vld [vmem:[%s3666_s2] sm:$0xff]  ;;  %vm45_vm1 = vcmask 64512   ;;  %v2183_v11 = vld [vmem:[%s3667_s3 + $0x10] sm:$0xff]  ;;  %s2108_s16 = smov 16   ;;  %v100_v2 = vlaneseq }
   0x6   :  { %v54_v8 = vsel %vm52_vm0, %v43_v6, 0  ;;  %v57_v9 = vsel %vm52_vm0, %v44_v7, 0  ;;  %3746 = vst [vmem:[#allocation5_spill] sm:$0xff] %v2178_v10  ;;  %v330_v12 = vld [vmem:[%s3669_s5] sm:$0xff]  ;;  %v2202_v14 = vld [vmem:[%s3667_s3 + $0x18] sm:$0xff]  ;;  %v2207_v15 = vld [vmem:[%s3667_s3 + $0x48] sm:$0xff] }
   0x7   :  { %66 = vmatpush.bf16.msra.mxu0 %v54_v8  ;;  %84 = vmatpush.bf16.msra.mxu1 %v57_v9  ;;  %v2196_v13 = vld [vmem:[%s3667_s3] sm:$0xff]  ;;  %v2217_v17 = vld [vmem:[%s3667_s3 + $0x58] sm:$0xff]  ;;  %v2223_v18 = vld [vmem:[%s3667_s3 + $0x50] sm:$0xff]  ;;  %s2109_s17 = smov 17   ;;  %s2110_s18 = smov 127   ;;  %v2433_v8 = vand.u32 127, %v100_v2 }
   0x8   :  { %115 = vperm.xlu1 %2027, %v2196_v13   ;;  %v320_v16 = vld [vmem:[%s3668_s4] sm:$0xff]  ;;  %3747 = vst [vmem:[#allocation6_spill] sm:$0xff] %v2217_v17  ;;  %v2235_v20 = vld [vmem:[%s3667_s3 + $0x68] sm:$0xff]  ;;  %v2240_v21 = vld [vmem:[%s3667_s3 + $0x70] sm:$0xff]  ;;  %s2111_s19 = smov 15   ;;  %s2112_s20 = smov 113  }
   0x9   :  { %3748 = vst [vmem:[#allocation7_spill] sm:$0xff] %v2223_v18  ;;  %v2228_v19 = vld [vmem:[%s3667_s3 + $0x60] sm:$0xff]  ;;  %v2247_v22 = vld [vmem:[%s3667_s3 + $0x28] sm:$0xff]  ;;  %v2253_v23 = vld [vmem:[%s3667_s3 + $0x30] sm:$0xff]  ;;  %s2113_s21 = smov 1   ;;  %s2114_s22 = smov 112  }
   0xa   :  { %1908 = vmatmul.msk.bf16.vlgmr.msra.gmra.mxu0 %vm45_vm1, %v2178_v10  ;;  %1910 = vmatmul.msk.bf16.vlgmr.msra.gmra.mxu1 %vm45_vm1, %v2178_v10  ;;  %3749 = vst [vmem:[#allocation8_spill] sm:$0xff] %v2228_v19  ;;  %v2259_v24 = vld [vmem:[%s3667_s3 + $0x38] sm:$0xff]  ;;  %v2265_v25 = vld [vmem:[%s3667_s3 + $0x40] sm:$0xff]  ;;  %s2115_s23 = smov 111   ;;  %v2335_v34 = vld [vmem:[%s3669_s5 + $0x8] sm:$0xff]  ;;  %vm102_vm2 = vcmp.lt.s32.totalorder %v2433_v8, 17 }
   0xb   :  { %167 = vperm.xlu2 %2028, %v2183_v11   ;;  %333 = vperm.xlu0 %2029, %v330_v12   ;;  %3750 = vst [vmem:[#allocation9_spill] sm:$0xff] %v2235_v20  ;;  %v1941_v37 = vld [vmem:[%s3667_s3 + $0x90] sm:$0xff]  ;;  %v1943_v41 = vld [vmem:[%s3667_s3 + $0xa0] sm:$0xff]  ;;  %v1944_v44 = vld [vmem:[%s3667_s3 + $0xa8] sm:$0xff]  ;;  %vm126_vm3 = vcmp.lt.s32.totalorder %v2433_v8, 16  ;;  %vm153_vm4 = vcmp.lt.s32.totalorder %v2433_v8, 15 }
   0xc   :  { %3751 = vst [vmem:[#allocation10_spill] sm:$0xff] %v2240_v21  ;;  %v2376_v45 = vld [vmem:[%s3667_s3 + $0x78] sm:$0xff]  ;;  %v2388_v49 = vld [vmem:[%s3667_s3 + $0x80] sm:$0xff]  ;;  %v2400_v52 = vld [vmem:[%s3668_s4 + $0x8] sm:$0xff]  ;;  %vm180_vm5 = vcmp.lt.s32.totalorder %v2433_v8, 1  ;;  %vm218_vm6 = vcmp.lt.s32.totalorder %v2433_v8, 127 }
   0xd   :  { %3752 = vst [vmem:[#allocation11_spill] sm:$0xff] %v2265_v25  ;;  %v2407_v54 = vld [vmem:[%s3667_s3 + $0x88] sm:$0xff]  ;;  %v1942_v56 = vld [vmem:[%s3667_s3 + $0x98] sm:$0xff]  ;;  %v1945_v60 = vld [vmem:[%s3667_s3 + $0xb0] sm:$0xff]  ;;  %vm245_vm7 = vcmp.lt.s32.totalorder %v2433_v8, 113  ;;  %vm272_vm8 = vcmp.lt.s32.totalorder %v2433_v8, 112 }
   0xe   :  { %3753 = vst [vmem:[#allocation12_spill] sm:$0xff] %v2335_v34  ;;  %v1955_v0 = vld [vmem:[%s3667_s3 + $0xf8] sm:$0xff]  ;;  %v1956_v7 = vld [vmem:[%s3667_s3 + $0x100] sm:$0xff]  ;;  %vm299_vm9 = vcmp.lt.s32.totalorder %v2433_v8, 111 }
   0xf   :  { %3754 = vst [vmem:[#allocation13_spill] sm:$0xff] %v2376_v45  ;;  %v105_v9 = vld [vmem:[%s3665_s1] sm:$0x3]  ;;  %v1913_v12 = vld [vmem:[%s3665_s1 + $0x2] sm:$0x3] }
  0x10   :  { %232 = vperm.xlu1 %2027, %v2247_v22   ;;  %3755 = vst [vmem:[#allocation14_spill] sm:$0xff] %v2388_v49  ;;  %v1917_v2 = vld [vmem:[%s3665_s1 + $0x6] sm:$0x3] }
  0x11   :  { %3756 = vst [vmem:[#allocation15_spill] sm:$0xff] %v2400_v52 }
  0x12   :  { %3757 = vst [vmem:[#allocation16_spill] sm:$0xff] %v2407_v54 }
  0x13   :  { %194 = vperm.xlu2 %2028, %v2202_v14   ;;  %414 = vperm.xlu0 %2029, %v2207_v15  }
  0x18   :  { %259 = vperm.xlu1 %2027, %v2253_v23  }
  0x1b   :  { %323 = vperm.xlu2 %2028, %v320_v16   ;;  %450 = vperm.xlu0 %2029, %v2217_v17   ;;  %v1915_v16 = vld [vmem:[%s3665_s1 + $0x4] sm:$0x3]  ;;  %v2484_v17 = vperm.slane %v1917_v2, 1 }
  0x1d   :  { %3764 = vst [vmem:[#allocation23_spill] sm:$0xff] %v2484_v17 }
  0x20   :  { %286 = vperm.xlu1 %2027, %v2259_v24  }
  0x23   :  { %431 = vperm.xlu2 %2028, %v2223_v18   ;;  %469 = vperm.xlu0 %2029, %v2228_v19  }
  0x28   :  { %313 = vperm.xlu1 %2027, %v2265_v25  }
  0x2b   :  { %480 = vperm.xlu2 %2028, %v2235_v20   ;;  %499 = vperm.xlu0 %2029, %v2240_v21  }
  0x5c   :  { %v2304_v29 = vpop.permute.xlu2 %140 }
  0x65   :  { %v2312_v30 = vpop.permute.xlu2 %167 }
  0x6d   :  { %v2322_v32 = vpop.permute.xlu2 %194 }
  0x75   :  { %v2330_v33 = vpop.permute.xlu0 %205  ;;  %v2337_v35 = vpop.permute.xlu2 %323 }
  0x7a   :  { %v2349_v38 = vpop.permute.xlu1 %115 }
  0x7d   :  { %v2344_v36 = vpop.permute.xlu0 %333  ;;  %v2355_v39 = vpop.permute.xlu2 %431 }
  0x82   :  { %v2366_v42 = vpop.permute.xlu1 %232 }
  0x85   :  { %v2357_v40 = vpop.permute.xlu0 %414  ;;  %v2368_v43 = vpop.permute.xlu2 %480 }
  0x87   :  { %v2268_v26 = vpop.f32.mrf.mxu0  ;;  %v2270_v27 = vpop.f32.mrf.mxu1 }
  0x88   :  { %124 = vrot.lane.b32.xlu2 %v2270_v27, %s2108_s16  ;;  %122 = vrot.lane.b32.xlu1 %v2268_v26, %s2108_s16 }
  0x89   :  { %96 = vrot.lane.b32.xlu0 %v2268_v26, %s2109_s17 }
  0x8a   :  { %v2383_v47 = vpop.permute.xlu1 %259 }
  0x8d   :  { %v2378_v46 = vpop.permute.xlu0 %450 }
  0x8f   :  { %v2296_v28 = vpop.f32.mrf.mxu1  ;;  %v2314_v31 = vpop.f32.mrf.mxu0 }
  0x90   :  { %216 = vrot.lane.b32.xlu2 %v2270_v27, %s2110_s18  ;;  %151 = vrot.lane.b32.xlu1 %v2270_v27, %s2111_s19 }
  0x91   :  { %98 = vrot.lane.b32.xlu0 %v2270_v27, %s2109_s17 }
  0x92   :  { %v2395_v51 = vpop.permute.xlu1 %286 }
  0x95   :  { %v2392_v50 = vpop.permute.xlu0 %469 }
  0x98   :  { %241 = vrot.lane.b32.xlu2 %v2268_v26, %s2112_s20  ;;  %178 = vrot.lane.b32.xlu1 %v2270_v27, %s2113_s21 }
  0x99   :  { %149 = vrot.lane.b32.xlu0 %v2268_v26, %s2111_s19 }
  0x9a   :  { %v2416_v57 = vpop.permute.xlu1 %313 }
  0x9d   :  { %v2411_v55 = vpop.permute.xlu0 %499 }
  0xa0   :  { %268 = vrot.lane.b32.xlu2 %v2268_v26, %s2114_s22  ;;  %214 = vrot.lane.b32.xlu1 %v2268_v26, %s2110_s18 }
  0xa1   :  { %176 = vrot.lane.b32.xlu0 %v2268_v26, %s2113_s21 }
  0xa8   :  { %295 = vrot.lane.b32.xlu2 %v2268_v26, %s2115_s23  ;;  %461 = vrot.lane.b32.xlu1 %v2296_v28, %s2113_s21 }
  0xa9   :  { %243 = vrot.lane.b32.xlu0 %v2270_v27, %s2112_s20 }
  0xb0   :  { %406 = vrot.lane.b32.xlu2 %v2296_v28, %s2109_s17  ;;  %510 = vrot.lane.b32.xlu1 %v2296_v28, %s2112_s20 }
  0xb1   :  { %270 = vrot.lane.b32.xlu0 %v2270_v27, %s2114_s22 }
  0xb8   :  { %529 = vrot.lane.b32.xlu1 %v2296_v28, %s2114_s22  ;;  %421 = vrot.lane.b32.xlu2 %v2314_v31, %s2108_s16 }
  0xb9   :  { %297 = vrot.lane.b32.xlu0 %v2270_v27, %s2115_s23 }
  0xc0   :  { %548 = vrot.lane.b32.xlu1 %v2296_v28, %s2115_s23  ;;  %442 = vrot.lane.b32.xlu2 %v2296_v28, %s2111_s19 }
  0xc1   :  { %404 = vrot.lane.b32.xlu0 %v2314_v31, %s2109_s17 }
  0xc8   :  { %578 = vperm.xlu1 %2027, %v2335_v34   ;;  %459 = vrot.lane.b32.xlu2 %v2314_v31, %s2113_s21  ;;  %v1957_v34 = vld [vmem:[%s3667_s3 + $0x108] sm:$0xff] }
  0xc9   :  { %423 = vrot.lane.b32.xlu0 %v2296_v28, %s2108_s16 }
  0xd0   :  { %662 = vperm.xlu1 %2027, %v1941_v37   ;;  %491 = vrot.lane.b32.xlu2 %v2296_v28, %s2110_s18  ;;  %v2446_v37 = vperm.slane %v105_v9, 0 }
  0xd1   :  { %440 = vrot.lane.b32.xlu0 %v2314_v31, %s2111_s19 }
  0xd2   :  { %3758 = vst [vmem:[#allocation17_spill] sm:$0xff] %v2446_v37 }
  0xd8   :  { %698 = vperm.xlu1 %2027, %v1943_v41   ;;  %508 = vrot.lane.b32.xlu2 %v2314_v31, %s2112_s20  ;;  %v2448_v41 = vperm.slane %v105_v9, 1  ;;  %v2462_v9 = vperm.slane %v1915_v16, 0 }
  0xd9   :  { %489 = vrot.lane.b32.xlu0 %v2314_v31, %s2110_s18 }
  0xda   :  { %3759 = vst [vmem:[#allocation18_spill] sm:$0xff] %v2448_v41 }
  0xdb   :  { %3761 = vst [vmem:[#allocation20_spill] sm:$0xff] %v2462_v9 }
  0xe0   :  { %717 = vperm.xlu1 %2027, %v1944_v44   ;;  %527 = vrot.lane.b32.xlu2 %v2314_v31, %s2114_s22 }
  0xe1   :  { %518 = vperm.xlu0 %2029, %v2376_v45   ;;  %v2482_v45 = vperm.slane %v1917_v2, 0 }
  0xe2   :  { %v125_v48 = vpop.permute.xlu2 %124 }
  0xe3   :  { %3763 = vst [vmem:[#allocation22_spill] sm:$0xff] %v2482_v45 }
  0xe8   :  { %546 = vrot.lane.b32.xlu2 %v2314_v31, %s2115_s23 }
  0xe9   :  { %537 = vperm.xlu0 %2029, %v2388_v49  }
  0xea   :  { %v2402_v53 = vpop.permute.xlu2 %216 }
  0xf0   :  { %567 = vperm.xlu2 %2028, %v2400_v52   ;;  %v2464_v52 = vperm.slane %v1915_v16, 1 }
  0xf1   :  { %556 = vperm.xlu0 %2029, %v2407_v54  }
  0xf2   :  { %v2418_v58 = vpop.permute.xlu2 %241  ;;  %3762 = vst [vmem:[#allocation21_spill] sm:$0xff] %v2464_v52 }
  0xf8   :  { %679 = vperm.xlu2 %2028, %v1942_v56   ;;  %v2451_v56 = vperm.slane %v1913_v12, 0 }
  0xfa   :  { %v123_v61 = vpop.permute.xlu1 %122  ;;  %v2423_v62 = vpop.permute.xlu2 %268 }
  0xfb   :  { %v97_v59 = vpop.permute.xlu0 %96 }
 0x100   :  { %728 = vperm.xlu2 %2028, %v1945_v60  }
 0x102   :  { %v152_v3 = vpop.permute.xlu1 %151  ;;  %v2428_v6 = vpop.permute.xlu2 %295 }
 0x103   :  { %v99_v63 = vpop.permute.xlu0 %98 }
 0x104   :  { %v103_v60 = vsel %vm102_vm2, %v97_v59, %v99_v63 }
 0x105   :  { %v112_v10 = vmul.f32 %v2448_v41, %v103_v60 }
 0x108   :  { %900 = vperm.xlu2 %2028, %v1955_v0   ;;  %v104_v0 = vsel %vm102_vm2, %v99_v63, %v97_v59  ;;  %v127_v59 = vsel %vm126_vm3, %v123_v61, %v125_v48  ;;  %v128_v63 = vsel %vm126_vm3, %v125_v48, %v123_v61 }
 0x109   :  { %v111_v49 = vmul.f32 %v2446_v37, %v104_v0  ;;  %v136_v61 = vmul.f32 %v2451_v56, %v128_v63  ;;  %v119_v0 = vmul.f32 %v2349_v38, %v112_v10  ;;  %v1920_v63 = vld [vmem:[%s3665_s1 + $0xa] sm:$0x3]  ;;  %v1922_v10 = vld [vmem:[%s3665_s1 + $0xc] sm:$0x3] }
 0x10a   :  { %v179_v54 = vpop.permute.xlu1 %178  ;;  %v2474_v25 = vpop.permute.xlu2 %406 }
 0x10b   :  { %v150_v4 = vpop.permute.xlu0 %149  ;;  %v118_v60 = vmul.f32 %v2349_v38, %v111_v49 }
 0x10c   :  { %v155_v16 = vsel %vm153_vm4, %v152_v3, %v150_v4 }
 0x110   :  { %919 = vperm.xlu2 %2028, %v1956_v7   ;;  %v2460_v7 = vperm.slane %v1913_v12, 1  ;;  %v154_v12 = vsel %vm153_vm4, %v150_v4, %v152_v3  ;;  %v163_v3 = vmul.f32 %v2462_v9, %v155_v16  ;;  %v2517_v16 = vperm.slane %v1920_v63, 1 }
 0x111   :  { %v164_v4 = vmul.f32 %v2464_v52, %v154_v12  ;;  %v2515_v12 = vperm.slane %v1920_v63, 0 }
 0x112   :  { %3760 = vst [vmem:[#allocation19_spill] sm:$0xff] %v2460_v7  ;;  %v137_v20 = vmul.f32 %v2460_v7, %v127_v59  ;;  %v215_v38 = vpop.permute.xlu1 %214 }
 0x113   :  { %v177_v44 = vpop.permute.xlu0 %176  ;;  %v171_v59 = vmul.f32 %v2312_v30, %v164_v4  ;;  %3765 = vst [vmem:[#allocation24_spill] sm:$0xff] %v2515_v12 }
 0x114   :  { %v181_v21 = vsel %vm180_vm5, %v177_v44, %v179_v54  ;;  %v182_v48 = vsel %vm180_vm5, %v179_v54, %v177_v44  ;;  %v143_v54 = vmul.f32 %v2304_v29, %v136_v61  ;;  %v170_v44 = vmul.f32 %v2312_v30, %v163_v3  ;;  %3766 = vst [vmem:[#allocation25_spill] sm:$0xff] %v2517_v16  ;;  %v1924_v3 = vld [vmem:[%s3665_s1 + $0xe] sm:$0x3] }
 0x115   :  { %v190_v2 = vmul.f32 %v2482_v45, %v182_v48  ;;  %v191_v19 = vmul.f32 %v2484_v17, %v181_v21  ;;  %v1958_v21 = vld [vmem:[%s3667_s3 + $0x110] sm:$0xff]  ;;  %v2519_v48 = vpop.permute.xlu2 %421  ;;  %v2521_v61 = vperm.slane %v1922_v10, 0  ;;  %v2543_v63 = vperm.slane %v1924_v3, 1 }
 0x117   :  { %v197_v30 = vmul.f32 %v2322_v32, %v190_v2  ;;  %v198_v49 = vmul.f32 %v2322_v32, %v191_v19  ;;  %3767 = vst [vmem:[#allocation26_spill] sm:$0xff] %v2521_v61  ;;  %v219_v19 = vsel %vm218_vm6, %v215_v38, %v2402_v53  ;;  %v220_v32 = vsel %vm218_vm6, %v2402_v53, %v215_v38 }
 0x118   :  { %938 = vperm.xlu2 %2028, %v1957_v34   ;;  %v144_v34 = vmul.f32 %v2304_v29, %v137_v20  ;;  %v145_v20 = vadd.f32 %v143_v54, %v118_v60  ;;  %3770 = vst [vmem:[#allocation29_spill] sm:$0xff] %v2543_v63  ;;  %v208_v53 = vmul.f32 %v2330_v33, %v2268_v26 }
 0x11a   :  { %v146_v29 = vadd.f32 %v144_v34, %v119_v0  ;;  %v172_v4 = vadd.f32 %v170_v44, %v145_v20  ;;  %v2526_v0 = vperm.slane %v1922_v10, 1 }
 0x11b   :  { %v244_v18 = vpop.permute.xlu0 %243 }
 0x11c   :  { %v173_v60 = vadd.f32 %v171_v59, %v146_v29  ;;  %3768 = vst [vmem:[#allocation27_spill] sm:$0xff] %v2526_v0  ;;  %v246_v2 = vsel %vm245_vm7, %v2418_v58, %v244_v18  ;;  %v247_v54 = vsel %vm245_vm7, %v244_v18, %v2418_v58  ;;  %v199_v34 = vadd.f32 %v197_v30, %v172_v4 }
 0x11d   :  { %v2541_v59 = vperm.slane %v1924_v3, 0  ;;  %v228_v58 = vmul.f32 %v2515_v12, %v219_v19  ;;  %v229_v29 = vmul.f32 %v2517_v16, %v220_v32  ;;  %v255_v38 = vmul.f32 %v2521_v61, %v246_v2 }
 0x11e   :  { %v200_v44 = vadd.f32 %v198_v49, %v173_v60  ;;  %v256_v30 = vmul.f32 %v2526_v0, %v247_v54  ;;  %v1926_v49 = vld [vmem:[%s3665_s1 + $0x10] sm:$0x3]  ;;  %v210_v3 = vadd.f32 %v208_v53, %v199_v34 }
 0x11f   :  { %3769 = vst [vmem:[#allocation28_spill] sm:$0xff] %v2541_v59  ;;  %v2568_v19 = vperm.slane %v1926_v49, 0  ;;  %v2570_v32 = vperm.slane %v1926_v49, 1  ;;  %v235_v2 = vmul.f32 %v2366_v42, %v228_v58  ;;  %v236_v54 = vmul.f32 %v2366_v42, %v229_v29 }
 0x120   :  { %957 = vperm.xlu2 %2028, %v1958_v21   ;;  %v209_v21 = vmul.f32 %v2330_v33, %v2270_v27  ;;  %v1959_v33 = vld [vmem:[%s3667_s3 + $0x118] sm:$0xff]  ;;  %v263_v34 = vmul.f32 %v2383_v47, %v256_v30 }
 0x121   :  { %3771 = vst [vmem:[#allocation30_spill] sm:$0xff] %v2568_v19  ;;  %v237_v53 = vadd.f32 %v235_v2, %v210_v3 }
 0x122   :  { %v211_v4 = vadd.f32 %v209_v21, %v200_v44  ;;  %3772 = vst [vmem:[#allocation31_spill] sm:$0xff] %v2570_v32  ;;  %v443_v44 = vpop.permute.xlu2 %442 }
 0x123   :  { %v271_v10 = vpop.permute.xlu0 %270 }
 0x124   :  { %v273_v20 = vsel %vm272_vm8, %v2423_v62, %v271_v10  ;;  %v274_v18 = vsel %vm272_vm8, %v271_v10, %v2423_v62  ;;  %v262_v10 = vmul.f32 %v2383_v47, %v255_v38  ;;  %v238_v21 = vadd.f32 %v236_v54, %v211_v4 }
 0x125   :  { %v282_v62 = vmul.f32 %v2541_v59, %v273_v20  ;;  %v283_v60 = vmul.f32 %v2543_v63, %v274_v18 }
 0x126   :  { %v264_v58 = vadd.f32 %v262_v10, %v237_v53  ;;  %v265_v29 = vadd.f32 %v263_v34, %v238_v21 }
 0x127   :  { %v289_v20 = vmul.f32 %v2395_v51, %v282_v62  ;;  %v290_v18 = vmul.f32 %v2395_v51, %v283_v60 }
 0x128   :  { %976 = vperm.xlu2 %2028, %v1959_v33  }
 0x129   :  { %v291_v30 = vadd.f32 %v289_v20, %v264_v58  ;;  %v292_v3 = vadd.f32 %v290_v18, %v265_v29 }
 0x12a   :  { %v460_v10 = vpop.permute.xlu2 %459 }
 0x12b   :  { %v298_v33 = vpop.permute.xlu0 %297 }
 0x12c   :  { %v300_v49 = vsel %vm299_vm9, %v2428_v6, %v298_v33  ;;  %v301_v42 = vsel %vm299_vm9, %v298_v33, %v2428_v6 }
 0x12d   :  { %v309_v47 = vmul.f32 %v2568_v19, %v300_v49  ;;  %v310_v38 = vmul.f32 %v2570_v32, %v301_v42 }
 0x12f   :  { %v316_v4 = vmul.f32 %v2416_v57, %v309_v47  ;;  %v317_v51 = vmul.f32 %v2416_v57, %v310_v38  ;;  %v462_v38 = vpop.permute.xlu1 %461 }
 0x130   :  { %1336 = vperm.xlu2 %2028, %v2207_v15  }
 0x131   :  { %v318_v62 = vadd.f32 %v316_v4, %v291_v30  ;;  %v319_v60 = vadd.f32 %v317_v51, %v292_v3 }
 0x132   :  { %v492_v29 = vpop.permute.xlu2 %491 }
 0x133   :  { %v326_v2 = vadd.f32 %v2337_v35, %v318_v62  ;;  %v327_v6 = vadd.f32 %v2337_v35, %v319_v60  ;;  %v405_v54 = vpop.permute.xlu0 %404 }
 0x135   :  { %v328_v34 = vmax.f32 %v326_v2, 0.0  ;;  %v329_v21 = vmax.f32 %v327_v6, 0.0 }
 0x137   :  { %v336_v53 = vmul.f32 %v2344_v36, %v328_v34  ;;  %v337_v20 = vmul.f32 %v2344_v36, %v329_v21  ;;  %v511_v21 = vpop.permute.xlu1 %510 }
 0x138   :  { %1130 = vperm.xlu2 %2028, %v2202_v14  }
 0x139   :  { %v338_v18 = vrot.slane %v336_v53, 4  ;;  %v344_v57 = vrot.slane %v337_v20, 4 }
 0x13a   :  { %v509_v6 = vpop.permute.xlu2 %508 }
 0x13b   :  { %v339_v33 = vadd.f32 %v338_v18, %v336_v53  ;;  %v345_v15 = vadd.f32 %v344_v57, %v337_v20  ;;  %v424_v49 = vpop.permute.xlu0 %423  ;;  %v409_v53 = vsel %vm102_vm2, %v2474_v25, %v405_v54  ;;  %v408_v20 = vsel %vm102_vm2, %v405_v54, %v2474_v25 }
 0x13c   :  { %v425_v34 = vsel %vm126_vm3, %v2519_v48, %v424_v49 }
 0x13d   :  { %v340_v42 = vrot.slane %v339_v33, 2  ;;  %v346_v58 = vrot.slane %v345_v15, 2 }
 0x13f   :  { %v341_v47 = vadd.f32 %v340_v42, %v339_v33  ;;  %v347_v35 = vadd.f32 %v346_v58, %v345_v15  ;;  %v428_v33 = vmul.f32 %v425_v34, %v2460_v7  ;;  %v410_v15 = vmul.f32 %v409_v53, %v2446_v37  ;;  %v530_v34 = vpop.permute.xlu1 %529 }
 0x140   :  { %1140 = vperm.xlu2 %2028, %v2169_v5   ;;  %v426_v5 = vsel %vm126_vm3, %v424_v49, %v2519_v48  ;;  %v411_v49 = vmul.f32 %v408_v20, %v2448_v41 }
 0x141   :  { %v342_v30 = vrot.slane %v341_v47, 1  ;;  %v348_v3 = vrot.slane %v347_v35, 1  ;;  %v427_v48 = vmul.f32 %v426_v5, %v2451_v56 }
 0x143   :  { %v441_v4 = vpop.permute.xlu0 %440  ;;  %v343_v51 = vadd.f32 %v342_v30, %v341_v47  ;;  %v349_v36 = vadd.f32 %v348_v3, %v347_v35  ;;  %v464_v47 = vsel %vm180_vm5, %v462_v38, %v460_v10  ;;  %v435_v35 = vmul.f32 %v2355_v39, %v428_v33 }
 0x144   :  { %v445_v18 = vsel %vm153_vm4, %v443_v44, %v441_v4  ;;  %v463_v3 = vsel %vm180_vm5, %v460_v10, %v462_v38 }
 0x145   :  { %v350_v62 = vsub.f32 0.0, %v343_v51  ;;  %v351_v14 = vsub.f32 0.0, %v349_v36  ;;  %v446_v42 = vmul.f32 %v445_v18, %v2462_v9  ;;  %v418_v36 = vmul.f32 %v2357_v40, %v411_v49 }
 0x147   :  { %v352_v60 = vmul.f32 1.442695, %v350_v62  ;;  %v354_v2 = vmul.f32 1.442695, %v351_v14  ;;  %v528_v62 = vpop.permute.xlu2 %527  ;;  %v453_v14 = vmul.f32 %v2378_v46, %v446_v42  ;;  %v437_v10 = vadd.f32 %v435_v35, %v418_v36 }
 0x148   :  { %1164 = vperm.xlu2 %2028, %v2247_v22   ;;  %v444_v22 = vsel %vm153_vm4, %v441_v4, %v443_v44  ;;  %v434_v44 = vmul.f32 %v2355_v39, %v427_v48  ;;  %v417_v4 = vmul.f32 %v2357_v40, %v410_v15  ;;  %v512_v48 = vsel %vm245_vm7, %v509_v6, %v511_v21 }
 0x149   :  { %2030 = vpow2.f32 %v352_v60  ;;  %v447_v58 = vmul.f32 %v444_v22, %v2464_v52 }
 0x14a   :  { %2032 = vpow2.f32 %v354_v2  ;;  %v465_v2 = vmul.f32 %v464_v47, %v2482_v45  ;;  %v436_v5 = vadd.f32 %v434_v44, %v417_v4  ;;  %v484_v47 = vmul.f32 %v2368_v43, %v2296_v28 }
 0x14b   :  { %v490_v57 = vpop.permute.xlu0 %489  ;;  %v454_v60 = vmul.f32 %v2378_v46, %v447_v58 }
 0x14c   :  { %v493_v38 = vsel %vm218_vm6, %v490_v57, %v492_v29  ;;  %v494_v40 = vsel %vm218_vm6, %v492_v29, %v490_v57  ;;  %v455_v53 = vadd.f32 %v453_v14, %v436_v5  ;;  %v472_v46 = vmul.f32 %v2392_v50, %v465_v2 }
 0x14d   :  { %v456_v20 = vadd.f32 %v454_v60, %v437_v10  ;;  %v495_v33 = vmul.f32 %v493_v38, %v2515_v12  ;;  %v496_v15 = vmul.f32 %v494_v40, %v2517_v16  ;;  %v513_v29 = vsel %vm245_vm7, %v511_v21, %v509_v6 }
 0x14e   :  { %v531_v57 = vsel %vm272_vm8, %v528_v62, %v530_v34  ;;  %v474_v58 = vadd.f32 %v472_v46, %v455_v53  ;;  %v483_v6 = vmul.f32 %v2368_v43, %v2314_v31 }
 0x14f   :  { %v2031_v25 = vpop.eup %2030  ;;  %v547_v44 = vpop.permute.xlu2 %546  ;;  %v502_v35 = vmul.f32 %v2411_v55, %v495_v33 }
 0x150   :  { %v2033_v54 = vpop.eup %2032  ;;  %1188 = vperm.xlu2 %2028, %v2253_v23   ;;  %v356_v30 = vadd.f32 1.0, %v2031_v25  ;;  %v466_v23 = vmul.f32 %v463_v3, %v2484_v17  ;;  %v533_v3 = vmul.f32 %v531_v57, %v2541_v59 }
 0x151   :  { %v357_v51 = vadd.f32 1.0, %v2033_v54 }
 0x152   :  { %2034 = vrcp.f32 %v356_v30  ;;  %v473_v18 = vmul.f32 %v2392_v50, %v466_v23  ;;  %v532_v50 = vsel %vm272_vm8, %v530_v34, %v528_v62  ;;  %v503_v30 = vmul.f32 %v2411_v55, %v496_v15 }
 0x153   :  { %v519_v39 = vpop.permute.xlu0 %518  ;;  %2036 = vrcp.f32 %v357_v51  ;;  %v534_v4 = vmul.f32 %v532_v50, %v2543_v63  ;;  %v549_v51 = vpop.permute.xlu1 %548  ;;  %v485_v62 = vadd.f32 %v483_v6, %v474_v58 }
 0x154   :  { %v475_v25 = vadd.f32 %v473_v18, %v456_v20  ;;  %v550_v60 = vsel %vm299_vm9, %v547_v44, %v549_v51  ;;  %v551_v2 = vsel %vm299_vm9, %v549_v51, %v547_v44 }
 0x155   :  { %v504_v23 = vadd.f32 %v502_v35, %v485_v62  ;;  %v552_v10 = vmul.f32 %v550_v60, %v2568_v19  ;;  %v553_v38 = vmul.f32 %v551_v2, %v2570_v32  ;;  %v1947_v60 = vld [vmem:[%s3667_s3 + $0xc0] sm:$0xff] }
 0x156   :  { %v486_v36 = vadd.f32 %v484_v47, %v475_v25 }
 0x157   :  { %v568_v15 = vpop.permute.xlu2 %567 }
 0x158   :  { %v2035_v22 = vpop.eup %2034  ;;  %1212 = vperm.xlu2 %2028, %v2259_v24   ;;  %v514_v24 = vmul.f32 %v512_v48, %v2521_v61  ;;  %v505_v55 = vadd.f32 %v503_v30, %v486_v36 }
 0x159   :  { %v2037_v49 = vpop.eup %2036  ;;  %v2647_v42 = vmul.f32 %v2035_v22, %v2268_v26  ;;  %v515_v26 = vmul.f32 %v513_v29, %v2526_v0 }
 0x15a   :  { %v2652_v54 = vmul.f32 %v2037_v49, %v2270_v27  ;;  %v521_v14 = vmul.f32 %v519_v39, %v514_v24 }
 0x15b   :  { %v538_v21 = vpop.permute.xlu0 %537  ;;  %v522_v43 = vmul.f32 %v519_v39, %v515_v26  ;;  %v579_v58 = vpop.permute.xlu1 %578 }
 0x15c   :  { %v362_v27 = vadd.f32 %v2652_v54, %v2647_v42  ;;  %v540_v34 = vmul.f32 %v538_v21, %v533_v3  ;;  %v541_v5 = vmul.f32 %v538_v21, %v534_v4  ;;  %v523_v40 = vadd.f32 %v521_v14, %v504_v23  ;;  %v2675_v3 = vld [vmem:[%s3667_s3 + $0xb8] sm:$0xff] }
 0x15d   :  { %v524_v53 = vadd.f32 %v522_v43, %v505_v55  ;;  %3773 = vst [vmem:[#allocation32_spill] sm:$0xff] %v2675_v3 }
 0x15e   :  { %363 = vadd.xlane.f32.xlu1 %v362_v27  ;;  %v542_v46 = vadd.f32 %v540_v34, %v523_v40  ;;  %v1948_v34 = vld [vmem:[%s3667_s3 + $0xc8] sm:$0xff]  ;;  %v1949_v40 = vld [vmem:[%s3667_s3 + $0xd0] sm:$0xff] }
 0x15f   :  { %v543_v39 = vadd.f32 %v541_v5, %v524_v53 }
 0x163   :  { %v557_v20 = vpop.permute.xlu0 %556 }
 0x164   :  { %v559_v22 = vmul.f32 %v557_v20, %v552_v10  ;;  %v560_v18 = vmul.f32 %v557_v20, %v553_v38 }
 0x166   :  { %v561_v48 = vadd.f32 %v559_v22, %v542_v46  ;;  %v562_v33 = vadd.f32 %v560_v18, %v543_v39  ;;  %v1960_v18 = vld [vmem:[%s3668_s4 + $0x18] sm:$0xff] }
 0x168   :  { %v570_v49 = vadd.f32 %v568_v15, %v561_v48  ;;  %v571_v29 = vadd.f32 %v568_v15, %v562_v33  ;;  %v1952_v48 = vld [vmem:[%s3667_s3 + $0xe0] sm:$0xff]  ;;  %v2710_v33 = vpop.permute.xlu1 %662 }
 0x169   :  { %3774 = vst [vmem:[#allocation33_spill] sm:$0xff] %v2710_v33 }
 0x16a   :  { %v572_v57 = vmax.f32 %v570_v49, 0.0  ;;  %v573_v50 = vmax.f32 %v571_v29, 0.0  ;;  %v3777_v49 = vld [vmem:[#allocation8_spill] sm:$0xff]  ;;  %v3778_v29 = vld [vmem:[#allocation9_spill] sm:$0xff] }
 0x16c   :  { %v581_v25 = vmul.f32 %v579_v58, %v572_v57  ;;  %v582_v24 = vmul.f32 %v579_v58, %v573_v50  ;;  %v1961_v57 = vld [vmem:[%s3664_s0 + $0x8] sm:$0xff] }
 0x16d   :  { %v997_v58 = vunpack.c.l.b16 %v1961_v57 }
 0x16e   :  { %v583_v47 = vrot.slane %v581_v25, 4  ;;  %v589_v6 = vrot.slane %v582_v24, 4 }
 0x170   :  { %v584_v21 = vadd.f32 %v583_v47, %v581_v25  ;;  %v590_v26 = vadd.f32 %v589_v6, %v582_v24  ;;  %v2716_v15 = vpop.permute.xlu1 %698  ;;  %v3780_v25 = vld [vmem:[#allocation10_spill] sm:$0xff]  ;;  %v999_v47 = vpack.c.b16 %v997_v58, %v997_v58  ;;  %v1243_v58 = vld [vmem:[%s3668_s4] sm:$0xff] }
 0x171   :  { %v3781_v24 = vld [vmem:[#allocation6_spill] sm:$0xff] }
 0x172   :  { %v585_v44 = vrot.slane %v584_v21, 2  ;;  %v591_v35 = vrot.slane %v590_v26, 2 }
 0x174   :  { %v586_v30 = vadd.f32 %v585_v44, %v584_v21  ;;  %v592_v27 = vadd.f32 %v591_v35, %v590_v26  ;;  %v366_v26 = vld [vmem:[%s3670_s6] sm:$0xff]  ;;  %v1002_v44 = vsel %vm52_vm0, %v999_v47, 0  ;;  %v3801_v47 = vld [vmem:[#allocation11_spill] sm:$0xff] }
 0x175   :  { %v3782_v35 = vld [vmem:[#allocation13_spill] sm:$0xff] }
 0x176   :  { %v587_v4 = vrot.slane %v586_v30, 1  ;;  %v593_v51 = vrot.slane %v592_v27, 1 }
 0x177   :  { %747 = vperm.xlu1 %2027, %v2675_v3  }
 0x178   :  { %v588_v36 = vadd.f32 %v587_v4, %v586_v30  ;;  %v594_v62 = vadd.f32 %v593_v51, %v592_v27  ;;  %v2726_v50 = vpop.permute.xlu1 %717  ;;  %v3783_v30 = vld [vmem:[#allocation5_spill] sm:$0xff]  ;;  %v998_v27 = vunpack.c.h.b16 %v1961_v57 }
 0x179   :  { %3779 = vst [vmem:[#allocation8_spill] sm:$0xff] %v2726_v50 }
 0x17a   :  { %v595_v14 = vsub.f32 0.0, %v588_v36  ;;  %v596_v43 = vsub.f32 0.0, %v594_v62  ;;  %v1000_v4 = vpack.c.b16 %v998_v27, %v998_v27  ;;  %v1939_v62 = vld [vmem:[%s3670_s6 + $0x8] sm:$0xff] }
 0x17c   :  { %v597_v2 = vmul.f32 1.442695, %v595_v14  ;;  %v599_v55 = vmul.f32 1.442695, %v596_v43  ;;  %v1005_v14 = vsel %vm52_vm0, %v1000_v4, 0 }
 0x17e   :  { %2038 = vpow2.f32 %v597_v2 }
 0x17f   :  { %766 = vperm.xlu1 %2027, %v1947_v60   ;;  %2040 = vpow2.f32 %v599_v55  ;;  %v2755_v55 = vpop.permute.xlu2 %679 }
 0x180   :  { %3784 = vst [vmem:[#allocation9_spill] sm:$0xff] %v2755_v55 }
 0x184   :  { %v2039_v23 = vpop.eup %2038 }
 0x185   :  { %v2041_v5 = vpop.eup %2040  ;;  %v601_v10 = vadd.f32 1.0, %v2039_v23 }
 0x186   :  { %v602_v38 = vadd.f32 1.0, %v2041_v5 }
 0x187   :  { %785 = vperm.xlu1 %2027, %v1948_v34   ;;  %2042 = vrcp.f32 %v601_v10  ;;  %v2765_v23 = vpop.permute.xlu2 %728 }
 0x188   :  { %2044 = vrcp.f32 %v602_v38  ;;  %3785 = vst [vmem:[#allocation10_spill] sm:$0xff] %v2765_v23 }
 0x18d   :  { %v2043_v53 = vpop.eup %2042 }
 0x18e   :  { %v2045_v20 = vpop.eup %2044  ;;  %v2688_v46 = vmul.f32 %v2043_v53, %v2314_v31  ;;  %v1950_v31 = vld [vmem:[%s3668_s4 + $0x10] sm:$0xff] }
 0x18f   :  { %804 = vperm.xlu1 %2027, %v1949_v40   ;;  %v2691_v39 = vmul.f32 %v2045_v20, %v2296_v28  ;;  %v1951_v28 = vld [vmem:[%s3667_s3 + $0xd8] sm:$0xff]  ;;  %v2773_v5 = vpop.permute.xlu2 %900 }
 0x190   :  { %3787 = vst [vmem:[#allocation13_spill] sm:$0xff] %v2773_v5  ;;  %v3805_v5 = vld [vmem:[#allocation16_spill] sm:$0xff] }
 0x191   :  { %v607_v22 = vadd.f32 %v2691_v39, %v2688_v46 }
 0x193   :  { %608 = vadd.xlane.f32.xlu0 %v607_v22 }
 0x197   :  { %987 = vperm.xlu1 %2027, %v1960_v18   ;;  %v2783_v40 = vpop.permute.xlu2 %919 }
 0x198   :  { %3789 = vst [vmem:[#allocation34_spill] sm:$0xff] %v2783_v40 }
 0x19f   :  { %1060 = vperm.xlu1 %2027, %v2196_v13   ;;  %v3775_v13 = vld [vmem:[#allocation7_spill] sm:$0xff]  ;;  %v2793_v22 = vpop.permute.xlu2 %938 }
 0x1a0   :  { %3776 = vst [vmem:[#allocation7_spill] sm:$0xff] %v2716_v15 }
 0x1a1   :  { %3791 = vst [vmem:[#allocation36_spill] sm:$0xff] %v2793_v22 }
 0x1a7   :  { %1082 = vperm.xlu1 %2027, %v2164_v1   ;;  %815 = vperm.xlu0 %2029, %v1950_v31   ;;  %v1953_v1 = vld [vmem:[%s3667_s3 + $0xe8] sm:$0xff] }
 0x1af   :  { %1106 = vperm.xlu1 %2027, %v2183_v11   ;;  %834 = vperm.xlu0 %2029, %v1951_v28   ;;  %v1954_v11 = vld [vmem:[%s3667_s3 + $0xf0] sm:$0xff] }
 0x1b7   :  { %1352 = vperm.xlu1 %2027, %v3775_v13   ;;  %851 = vperm.xlu0 %2029, %v1952_v48   ;;  %v2809_v48 = vpop.permute.xlu2 %957 }
 0x1b8   :  { %3794 = vst [vmem:[#allocation39_spill] sm:$0xff] %v2809_v48 }
 0x1bf   :  { %1388 = vperm.xlu1 %2027, %v3777_v49   ;;  %870 = vperm.xlu0 %2029, %v1953_v1   ;;  %v2821_v49 = vpop.permute.xlu2 %976 }
 0x1c0   :  { %3797 = vst [vmem:[#allocation42_spill] sm:$0xff] %v2821_v49 }
 0x1c7   :  { %1398 = vperm.xlu1 %2027, %v3778_v29   ;;  %889 = vperm.xlu0 %2029, %v1954_v11   ;;  %v3799_v29 = vld [vmem:[#allocation14_spill] sm:$0xff] }
 0x1cf   :  { %1416 = vperm.xlu1 %2027, %v3780_v25   ;;  %1370 = vperm.xlu0 %2029, %v3781_v24   ;;  %v2835_v25 = vpop.permute.xlu2 %1336 }
 0x1d1   :  { %v364_v6 = vpop.xlane.xlu1 %363 }
 0x1d2   :  { %v365_v21 = vmul.f32 0.00390625, %v364_v6 }
 0x1d4   :  { %385 = vmatpush.msra.mxu2 %v365_v21  ;;  %v3802_v21 = vld [vmem:[#allocation12_spill] sm:$0xff] }
 0x1d5   :  { %1927 = vmatmul.msk.f32.vlgmr.msra.gmra.mxu2 %vm45_vm1, %v366_v26 }
 0x1d6   :  { %1014 = vmatpush.bf16.msrb.mxu2 %v1002_v44 }
 0x1d7   :  { %1434 = vperm.xlu1 %2027, %v3782_v35   ;;  %v2847_v26 = vpop.permute.xlu2 %1130 }
 0x1dd   :  { %1962 = vmatmul.msk.bf16.vlgmr.msrb.gmra.mxu2 %vm45_vm1, %v3783_v30 }
 0x1df   :  { %v2859_v4 = vpop.permute.xlu2 %1140 }
 0x1e9   :  { %v2767_v34 = vpop.permute.xlu1 %747 }
 0x1ea   :  { %3786 = vst [vmem:[#allocation6_spill] sm:$0xff] %v2767_v34 }
 0x1f1   :  { %v2775_v10 = vpop.permute.xlu1 %766 }
 0x1f2   :  { %3788 = vst [vmem:[#allocation5_spill] sm:$0xff] %v2775_v10 }
 0x1f9   :  { %v2787_v53 = vpop.permute.xlu1 %785 }
 0x1fa   :  { %3790 = vst [vmem:[#allocation35_spill] sm:$0xff] %v2787_v53 }
 0x201   :  { %v2799_v31 = vpop.permute.xlu1 %804 }
 0x202   :  { %3793 = vst [vmem:[#allocation38_spill] sm:$0xff] %v2799_v31 }
 0x206   :  { %v609_v51 = vpop.xlane.xlu0 %608 }
 0x207   :  { %v610_v36 = vmul.f32 0.00390625, %v609_v51 }
 0x209   :  { %631 = vmatpush.msra.mxu3 %v610_v36  ;;  %v2813_v1 = vpop.permute.xlu1 %987 }
 0x20a   :  { %1940 = vmatmul.msk.f32.vlgmr.msra.gmra.mxu3 %vm45_vm1, %v1939_v62  ;;  %3796 = vst [vmem:[#allocation41_spill] sm:$0xff] %v2813_v1 }
 0x20b   :  { %1032 = vmatpush.bf16.msrb.mxu3 %v1005_v14 }
 0x211   :  { %v2828_v57 = vpop.permute.xlu1 %1060 }
 0x212   :  { %1964 = vmatmul.msk.bf16.vlgmr.msrb.gmra.mxu3 %vm45_vm1, %v3783_v30 }
 0x219   :  { %v2795_v18 = vpop.permute.xlu0 %815  ;;  %v2842_v6 = vpop.permute.xlu1 %1082 }
 0x21a   :  { %3792 = vst [vmem:[#allocation37_spill] sm:$0xff] %v2795_v18 }
 0x221   :  { %v2811_v13 = vpop.permute.xlu0 %834  ;;  %v2853_v30 = vpop.permute.xlu1 %1106 }
 0x222   :  { %3795 = vst [vmem:[#allocation40_spill] sm:$0xff] %v2811_v13  ;;  %v1253_v13 = vld [vmem:[%s3669_s5] sm:$0xff] }
 0x229   :  { %v2823_v11 = vpop.permute.xlu0 %851  ;;  %v2863_v36 = vpop.permute.xlu1 %1352 }
 0x22a   :  { %3798 = vst [vmem:[#allocation43_spill] sm:$0xff] %v2823_v11 }
 0x231   :  { %v2839_v24 = vpop.permute.xlu0 %870 }
 0x232   :  { %3800 = vst [vmem:[#allocation14_spill] sm:$0xff] %v2839_v24 }
 0x239   :  { %v2849_v44 = vpop.permute.xlu0 %889 }
 0x23a   :  { %3803 = vst [vmem:[#allocation11_spill] sm:$0xff] %v2849_v44 }
 0x241   :  { %v2861_v51 = vpop.permute.xlu0 %1370 }
 0x258   :  { %v387_v43 = vpop.f32.mrf.mxu2 }
 0x259   :  { %v390_v35 = vsub.f32 0.0, %v387_v43 }
 0x25b   :  { %v391_v27 = vmul.f32 1.442695, %v390_v35 }
 0x25d   :  { %2046 = vpow2.f32 %v391_v27  ;;  %v3804_v27 = vld [vmem:[#allocation15_spill] sm:$0xff] }
 0x260   :  { %v2745_v60 = vpop.f32.mrf.mxu2 }
 0x261   :  { %1044 = vrot.lane.b32.xlu0 %v2745_v60, %s2109_s17 }
 0x263   :  { %v2047_v62 = vpop.eup %2046 }
 0x264   :  { %v393_v14 = vadd.f32 1.0, %v2047_v62 }
 0x266   :  { %2048 = vrcp.f32 %v393_v14 }
 0x268   :  { %v2749_v2 = vpop.f32.mrf.mxu2 }
 0x269   :  { %1066 = vrot.lane.b32.xlu0 %v2745_v60, %s2108_s16  ;;  %1360 = vrot.lane.b32.xlu1 %v2749_v2, %s2111_s19 }
 0x271   :  { %1090 = vrot.lane.b32.xlu0 %v2745_v60, %s2111_s19  ;;  %1406 = vrot.lane.b32.xlu1 %v2749_v2, %s2110_s18 }
 0x279   :  { %1114 = vrot.lane.b32.xlu0 %v2745_v60, %s2113_s21  ;;  %1424 = vrot.lane.b32.xlu1 %v2749_v2, %s2112_s20 }
 0x281   :  { %1148 = vrot.lane.b32.xlu0 %v2745_v60, %s2110_s18  ;;  %1442 = vrot.lane.b32.xlu1 %v2749_v2, %s2114_s22 }
 0x289   :  { %1172 = vrot.lane.b32.xlu0 %v2745_v60, %s2112_s20  ;;  %1460 = vrot.lane.b32.xlu1 %v2749_v2, %s2115_s23 }
 0x28d   :  { %v2781_v38 = vpop.f32.mrf.mxu3 }
 0x28e   :  { %v636_v1 = vsub.f32 0.0, %v2781_v38  ;;  %v1050_v38 = vld [vmem:[%s3665_s1] sm:$0x3] }
 0x28f   :  { %v2905_v11 = vperm.slane %v1050_v38, 0  ;;  %v2907_v18 = vperm.slane %v1050_v38, 1 }
 0x290   :  { %v637_v48 = vmul.f32 1.442695, %v636_v1 }
 0x291   :  { %1196 = vrot.lane.b32.xlu0 %v2745_v60, %s2114_s22 }
 0x292   :  { %2050 = vpow2.f32 %v637_v48 }
 0x295   :  { %v2789_v20 = vpop.f32.mrf.mxu3 }
 0x296   :  { %1046 = vrot.lane.b32.xlu2 %v2789_v20, %s2109_s17 }
 0x299   :  { %1220 = vrot.lane.b32.xlu0 %v2745_v60, %s2115_s23 }
 0x29d   :  { %v2801_v28 = vpop.f32.mrf.mxu3 }
 0x29e   :  { %1068 = vrot.lane.b32.xlu2 %v2789_v20, %s2108_s16  ;;  %1328 = vrot.lane.b32.xlu1 %v2801_v28, %s2109_s17 }
 0x2a1   :  { %1342 = vrot.lane.b32.xlu0 %v2749_v2, %s2108_s16 }
 0x2a6   :  { %1092 = vrot.lane.b32.xlu2 %v2789_v20, %s2111_s19  ;;  %1380 = vrot.lane.b32.xlu1 %v2801_v28, %s2113_s21 }
 0x2a9   :  { %1116 = vrot.lane.b32.xlu0 %v2789_v20, %s2113_s21 }
 0x2ae   :  { %1326 = vrot.lane.b32.xlu2 %v2749_v2, %s2109_s17  ;;  %1452 = vperm.xlu1 %2027, %v3799_v29   ;;  %v2869_v29 = vpop.permute.xlu2 %1164 }
 0x2b1   :  { %1362 = vrot.lane.b32.xlu0 %v2801_v28, %s2111_s19 }
 0x2b6   :  { %1378 = vrot.lane.b32.xlu2 %v2749_v2, %s2113_s21  ;;  %1246 = vperm.xlu1 %2027, %v1243_v58   ;;  %v2873_v58 = vpop.permute.xlu1 %1388  ;;  %v2877_v35 = vpop.permute.xlu2 %1188 }
 0x2b9   :  { %1236 = vperm.xlu0 %2029, %v3801_v47  }
 0x2be   :  { %1150 = vrot.lane.b32.xlu2 %v2789_v20, %s2110_s18  ;;  %1490 = vperm.xlu1 %2027, %v3802_v21   ;;  %v2049_v21 = vpop.eup %2048  ;;  %v2880_v62 = vpop.permute.xlu1 %1398 }
 0x2bf   :  { %v2885_v14 = vpop.permute.xlu2 %1212 }
 0x2c1   :  { %1408 = vrot.lane.b32.xlu0 %v2801_v28, %s2110_s18 }
 0x2c6   :  { %1174 = vrot.lane.b32.xlu2 %v2789_v20, %s2112_s20  ;;  %v2889_v40 = vpop.permute.xlu1 %1416 }
 0x2c9   :  { %1426 = vrot.lane.b32.xlu0 %v2801_v28, %s2112_s20 }
 0x2ce   :  { %1198 = vrot.lane.b32.xlu2 %v2789_v20, %s2114_s22  ;;  %v2909_v31 = vpop.permute.xlu1 %1434 }
 0x2d1   :  { %1444 = vrot.lane.b32.xlu0 %v2801_v28, %s2114_s22 }
 0x2d3   :  { %v1045_v43 = vpop.permute.xlu0 %1044 }
 0x2d6   :  { %1222 = vrot.lane.b32.xlu2 %v2789_v20, %s2115_s23 }
 0x2d9   :  { %1462 = vrot.lane.b32.xlu0 %v2801_v28, %s2115_s23 }
 0x2db   :  { %v1067_v47 = vpop.permute.xlu0 %1066  ;;  %v2930_v16 = vpop.permute.xlu1 %1360 }
 0x2de   :  { %397 = vperm.xlu2 %2028, %v2049_v21   ;;  %v2051_v21 = vpop.eup %2050 }
 0x2df   :  { %v639_v24 = vadd.f32 1.0, %v2051_v21 }
 0x2e1   :  { %1480 = vperm.xlu0 %2029, %v3804_v27   ;;  %2052 = vrcp.f32 %v639_v24  ;;  %v1969_v24 = vld [vmem:[%s3665_s1 + $0x4] sm:$0x3] }
 0x2e3   :  { %v1091_v49 = vpop.permute.xlu0 %1090 }
 0x2e6   :  { %1344 = vrot.lane.b32.xlu2 %v2801_v28, %s2108_s16 }
 0x2e7   :  { %v2053_v34 = vpop.eup %2052 }
 0x2eb   :  { %v2887_v22 = vpop.permute.xlu0 %1114 }
 0x2ee   :  { %1470 = vperm.xlu2 %2028, %v3805_v5   ;;  %v1967_v5 = vld [vmem:[%s3665_s1 + $0x2] sm:$0x3] }
 0x2ef   :  { %v2911_v32 = vperm.slane %v1967_v5, 0 }
 0x2f0   :  { %v1047_v27 = vpop.permute.xlu2 %1046 }
 0x2f1   :  { %v1048_v1 = vsel %vm102_vm2, %v1045_v43, %v1047_v27  ;;  %v1049_v44 = vsel %vm102_vm2, %v1047_v27, %v1045_v43  ;;  %v2913_v43 = vperm.slane %v1967_v5, 1 }
 0x2f2   :  { %v1056_v21 = vmul.f32 %v2905_v11, %v1049_v44  ;;  %v1057_v27 = vmul.f32 %v2907_v18, %v1048_v1 }
 0x2f3   :  { %v1149_v48 = vpop.permute.xlu0 %1148 }
 0x2f4   :  { %v1063_v44 = vmul.f32 %v2828_v57, %v1056_v21  ;;  %v1064_v1 = vmul.f32 %v2828_v57, %v1057_v27 }
 0x2f6   :  { %1256 = vperm.xlu2 %2028, %v1253_v13  }
 0x2f8   :  { %v1069_v19 = vpop.permute.xlu2 %1068 }
 0x2f9   :  { %v1070_v53 = vsel %vm126_vm3, %v1067_v47, %v1069_v19  ;;  %v1071_v38 = vsel %vm126_vm3, %v1069_v19, %v1067_v47 }
 0x2fa   :  { %v1078_v10 = vmul.f32 %v2911_v32, %v1071_v38  ;;  %v1079_v13 = vmul.f32 %v2913_v43, %v1070_v53  ;;  %v2932_v53 = vperm.slane %v1969_v24, 0  ;;  %v2934_v38 = vperm.slane %v1969_v24, 1  ;;  %v2944_v24 = vpop.permute.xlu1 %1406 }
 0x2fb   :  { %v1173_v63 = vpop.permute.xlu0 %1172 }
 0x2fc   :  { %v1085_v5 = vmul.f32 %v2842_v6, %v1078_v10  ;;  %v1086_v59 = vmul.f32 %v2842_v6, %v1079_v13 }
 0x2fe   :  { %v1087_v19 = vadd.f32 %v1085_v5, %v1063_v44  ;;  %v1088_v47 = vadd.f32 %v1086_v59, %v1064_v1  ;;  %643 = vperm.xlu2 %2028, %v2053_v34  }
 0x300   :  { %v1093_v12 = vpop.permute.xlu2 %1092 }
 0x301   :  { %v1094_v21 = vsel %vm153_vm4, %v1091_v49, %v1093_v12  ;;  %v1095_v57 = vsel %vm153_vm4, %v1093_v12, %v1091_v49 }
 0x302   :  { %v1102_v10 = vmul.f32 %v2932_v53, %v1095_v57  ;;  %v1103_v6 = vmul.f32 %v2934_v38, %v1094_v21  ;;  %v2952_v12 = vpop.permute.xlu1 %1424  ;;  %v1974_v21 = vld [vmem:[%s3665_s1 + $0xa] sm:$0x3] }
 0x303   :  { %v1197_v27 = vpop.permute.xlu0 %1196 }
 0x304   :  { %v1109_v13 = vmul.f32 %v2853_v30, %v1102_v10  ;;  %v1110_v59 = vmul.f32 %v2853_v30, %v1103_v6  ;;  %v1971_v30 = vld [vmem:[%s3665_s1 + $0x6] sm:$0x3]  ;;  %v1976_v6 = vld [vmem:[%s3665_s1 + $0xc] sm:$0x3] }
 0x305   :  { %v2975_v23 = vperm.slane %v1971_v30, 0  ;;  %v2977_v50 = vperm.slane %v1971_v30, 1  ;;  %v2987_v33 = vperm.slane %v1976_v6, 0  ;;  %v2989_v17 = vperm.slane %v1976_v6, 1 }
 0x306   :  { %v1111_v34 = vadd.f32 %v1109_v13, %v1087_v19  ;;  %v1112_v44 = vadd.f32 %v1110_v59, %v1088_v47  ;;  %v2962_v19 = vperm.slane %v1974_v21, 0  ;;  %v2964_v47 = vperm.slane %v1974_v21, 1 }
 0x308   :  { %v2946_v1 = vpop.permute.xlu2 %1326 }
 0x30a   :  { %v2969_v13 = vpop.permute.xlu1 %1442 }
 0x30b   :  { %v2948_v5 = vpop.permute.xlu0 %1220 }
 0x310   :  { %v2950_v0 = vpop.permute.xlu2 %1378 }
 0x313   :  { %v2954_v49 = vpop.permute.xlu0 %1342 }
 0x318   :  { %v1151_v57 = vpop.permute.xlu2 %1150 }
 0x319   :  { %v1152_v59 = vsel %vm218_vm6, %v1149_v48, %v1151_v57  ;;  %v1153_v61 = vsel %vm218_vm6, %v1151_v57, %v1149_v48 }
 0x31a   :  { %v1160_v48 = vmul.f32 %v2962_v19, %v1152_v59  ;;  %v1161_v57 = vmul.f32 %v2964_v47, %v1153_v61 }
 0x31b   :  { %v1117_v10 = vpop.permute.xlu0 %1116 }
 0x31c   :  { %v1118_v21 = vsel %vm180_vm5, %v2887_v22, %v1117_v10  ;;  %v1119_v15 = vsel %vm180_vm5, %v1117_v10, %v2887_v22  ;;  %v1143_v22 = vmul.f32 %v2859_v4, %v2745_v60 }
 0x31d   :  { %v1126_v52 = vmul.f32 %v2975_v23, %v1119_v15  ;;  %v1127_v9 = vmul.f32 %v2977_v50, %v1118_v21  ;;  %v1144_v15 = vmul.f32 %v2859_v4, %v2789_v20  ;;  %v1978_v4 = vld [vmem:[%s3665_s1 + $0xe] sm:$0x3] }
 0x31f   :  { %v1133_v30 = vmul.f32 %v2847_v26, %v1126_v52  ;;  %v1134_v45 = vmul.f32 %v2847_v26, %v1127_v9  ;;  %v1167_v9 = vmul.f32 %v2869_v29, %v1160_v48  ;;  %v1168_v26 = vmul.f32 %v2869_v29, %v1161_v57 }
 0x320   :  { %v1175_v55 = vpop.permute.xlu2 %1174  ;;  %v3016_v48 = vperm.slane %v1978_v4, 1 }
 0x321   :  { %v1176_v10 = vsel %vm245_vm7, %v1173_v63, %v1175_v55  ;;  %v1177_v6 = vsel %vm245_vm7, %v1175_v55, %v1173_v63  ;;  %v1135_v59 = vadd.f32 %v1133_v30, %v1111_v34  ;;  %v1136_v21 = vadd.f32 %v1134_v45, %v1112_v44  ;;  %v3012_v45 = vpop.permute.xlu1 %1460 }
 0x322   :  { %v1184_v61 = vmul.f32 %v2987_v33, %v1176_v10  ;;  %v1185_v52 = vmul.f32 %v2989_v17, %v1177_v6  ;;  %v3014_v44 = vperm.slane %v1978_v4, 0  ;;  %3807 = vst [vmem:[#allocation15_spill] sm:$0xff] %v3016_v48 }
 0x323   :  { %v1363_v3 = vpop.permute.xlu0 %1362  ;;  %v1145_v41 = vadd.f32 %v1143_v22, %v1135_v59  ;;  %v1146_v37 = vadd.f32 %v1144_v15, %v1136_v21 }
 0x324   :  { %v1191_v7 = vmul.f32 %v2877_v35, %v1184_v61  ;;  %v1192_v63 = vmul.f32 %v2877_v35, %v1185_v52  ;;  %3806 = vst [vmem:[#allocation12_spill] sm:$0xff] %v3014_v44 }
 0x325   :  { %v1169_v55 = vadd.f32 %v1167_v9, %v1145_v41  ;;  %v1170_v34 = vadd.f32 %v1168_v26, %v1146_v37 }
 0x327   :  { %v1193_v29 = vadd.f32 %v1191_v7, %v1169_v55  ;;  %v1194_v57 = vadd.f32 %v1192_v63, %v1170_v34  ;;  %v1364_v34 = vsel %vm153_vm4, %v2930_v16, %v1363_v3 }
 0x328   :  { %v1199_v30 = vpop.permute.xlu2 %1198 }
 0x329   :  { %v1200_v10 = vsel %vm272_vm8, %v1197_v27, %v1199_v30  ;;  %v1201_v22 = vsel %vm272_vm8, %v1199_v30, %v1197_v27  ;;  %v1329_v21 = vpop.permute.xlu1 %1328 }
 0x32a   :  { %v1208_v15 = vmul.f32 %v3014_v44, %v1200_v10  ;;  %v1209_v35 = vmul.f32 %v3016_v48, %v1201_v22  ;;  %v1330_v4 = vsel %vm102_vm2, %v2946_v1, %v1329_v21  ;;  %v1331_v63 = vsel %vm102_vm2, %v1329_v21, %v2946_v1 }
 0x32b   :  { %v3024_v6 = vpop.permute.xlu0 %1236  ;;  %v1333_v1 = vmul.f32 %v1330_v4, %v2907_v18 }
 0x32c   :  { %v1215_v37 = vmul.f32 %v2885_v14, %v1208_v15  ;;  %v1216_v41 = vmul.f32 %v2885_v14, %v1209_v35  ;;  %v1367_v35 = vmul.f32 %v1364_v34, %v2934_v38 }
 0x32e   :  { %v3028_v59 = vadd.f32 %v1215_v37, %v1193_v29  ;;  %v3030_v7 = vadd.f32 %v1216_v41, %v1194_v57  ;;  %v1365_v29 = vsel %vm153_vm4, %v1363_v3, %v2930_v16  ;;  %v1332_v57 = vmul.f32 %v1331_v63, %v2905_v11 }
 0x32f   :  { %v1366_v15 = vmul.f32 %v1365_v29, %v2932_v53 }
 0x330   :  { %v1223_v61 = vpop.permute.xlu2 %1222  ;;  %v1339_v21 = vmul.f32 %v2835_v25, %v1332_v57 }
 0x331   :  { %v1381_v27 = vpop.permute.xlu1 %1380 }
 0x332   :  { %v1382_v14 = vsel %vm180_vm5, %v2950_v0, %v1381_v27  ;;  %v1383_v55 = vsel %vm180_vm5, %v1381_v27, %v2950_v0  ;;  %v1980_v0 = vld [vmem:[%s3665_s1 + $0x10] sm:$0x3]  ;;  %v1340_v27 = vmul.f32 %v2835_v25, %v1333_v1  ;;  %v1373_v1 = vmul.f32 %v2861_v51, %v1366_v15 }
 0x333   :  { %v1409_v52 = vpop.permute.xlu0 %1408  ;;  %v1384_v30 = vmul.f32 %v1383_v55, %v2975_v23  ;;  %v1385_v10 = vmul.f32 %v1382_v14, %v2977_v50  ;;  %v3071_v4 = vperm.slane %v1980_v0, 0  ;;  %v3073_v63 = vperm.slane %v1980_v0, 1 }
 0x334   :  { %v1410_v55 = vsel %vm218_vm6, %v2944_v24, %v1409_v52  ;;  %v1374_v0 = vmul.f32 %v2861_v51, %v1367_v35 }
 0x335   :  { %3808 = vst [vmem:[#allocation16_spill] sm:$0xff] %v3071_v4  ;;  %v1391_v57 = vmul.f32 %v2873_v58, %v1384_v30  ;;  %v1392_v25 = vmul.f32 %v2873_v58, %v1385_v10  ;;  %v1225_v58 = vsel %vm299_vm9, %v1223_v61, %v2948_v5  ;;  %v1412_v51 = vmul.f32 %v1410_v55, %v2962_v19 }
 0x336   :  { %3809 = vst [vmem:[#allocation44_spill] sm:$0xff] %v3073_v63 }
 0x338   :  { %v3032_v9 = vpop.permute.xlu2 %397 }
 0x33b   :  { %v1427_v26 = vpop.permute.xlu0 %1426 }
 0x340   :  { %v1345_v22 = vpop.permute.xlu2 %1344 }
 0x341   :  { %v1346_v16 = vsel %vm126_vm3, %v2954_v49, %v1345_v22  ;;  %v1347_v3 = vsel %vm126_vm3, %v1345_v22, %v2954_v49  ;;  %v1411_v49 = vsel %vm218_vm6, %v1409_v52, %v2944_v24  ;;  %v1428_v22 = vsel %vm245_vm7, %v2952_v12, %v1427_v26 }
 0x342   :  { %v1348_v37 = vmul.f32 %v1347_v3, %v2911_v32  ;;  %v1349_v41 = vmul.f32 %v1346_v16, %v2913_v43  ;;  %v1429_v24 = vsel %vm245_vm7, %v1427_v26, %v2952_v12  ;;  %v1413_v30 = vmul.f32 %v1411_v49, %v2964_v47 }
 0x343   :  { %v1445_v14 = vpop.permute.xlu0 %1444  ;;  %v1430_v3 = vmul.f32 %v1428_v22, %v2987_v33  ;;  %v1419_v49 = vmul.f32 %v2889_v40, %v1412_v51 }
 0x344   :  { %v1355_v34 = vmul.f32 %v2863_v36, %v1348_v37  ;;  %v1356_v29 = vmul.f32 %v2863_v36, %v1349_v41  ;;  %v1224_v36 = vsel %vm299_vm9, %v2948_v5, %v1223_v61  ;;  %v1446_v12 = vsel %vm272_vm8, %v2969_v13, %v1445_v14 }
 0x345   :  { %v1447_v26 = vsel %vm272_vm8, %v1445_v14, %v2969_v13  ;;  %v1431_v37 = vmul.f32 %v1429_v24, %v2989_v17  ;;  %v1401_v5 = vmul.f32 %v2880_v62, %v2749_v2  ;;  %v1402_v61 = vmul.f32 %v2880_v62, %v2801_v28 }
 0x346   :  { %v1357_v52 = vadd.f32 %v1355_v34, %v1339_v21  ;;  %v1358_v16 = vadd.f32 %v1356_v29, %v1340_v27  ;;  %v1232_v41 = vmul.f32 %v3071_v4, %v1224_v36  ;;  %v1233_v21 = vmul.f32 %v3073_v63, %v1225_v58 }
 0x347   :  { %v1420_v13 = vmul.f32 %v2889_v40, %v1413_v30  ;;  %v1448_v14 = vmul.f32 %v1446_v12, %v3014_v44  ;;  %v1449_v34 = vmul.f32 %v1447_v26, %v3016_v48  ;;  %v1437_v22 = vmul.f32 %v2909_v31, %v1430_v3 }
 0x348   :  { %v1375_v10 = vadd.f32 %v1373_v1, %v1357_v52  ;;  %v1376_v15 = vadd.f32 %v1374_v0, %v1358_v16  ;;  %v1471_v35 = vpop.permute.xlu2 %1470  ;;  %v1438_v40 = vmul.f32 %v2909_v31, %v1431_v37  ;;  %v1239_v58 = vmul.f32 %v3024_v6, %v1232_v41  ;;  %v30_v41 = vld [vmem:[%s3666_s2 + $0x8] sm:$0xf] }
 0x349   :  { %v1240_v51 = vmul.f32 %v3024_v6, %v1233_v21  ;;  %v37_v21 = vunpack.c.l.b16 %v30_v41 }
 0x34a   :  { %v1393_v27 = vadd.f32 %v1391_v57, %v1375_v10  ;;  %v1394_v55 = vadd.f32 %v1392_v25, %v1376_v15  ;;  %v1453_v25 = vpop.permute.xlu1 %1452  ;;  %v1241_v31 = vadd.f32 %v1239_v58, %v3028_v59 }
 0x34b   :  { %v1463_v29 = vpop.permute.xlu0 %1462  ;;  %v1455_v30 = vmul.f32 %v1453_v25, %v1448_v14  ;;  %v1456_v10 = vmul.f32 %v1453_v25, %v1449_v34  ;;  %v1242_v37 = vadd.f32 %v1240_v51, %v3030_v7  ;;  %v401_v34 = vmul.f32 %v3032_v9, %v2652_v54 }
 0x34c   :  { %v1464_v1 = vsel %vm299_vm9, %v3012_v45, %v1463_v29  ;;  %v1465_v62 = vsel %vm299_vm9, %v1463_v29, %v3012_v45  ;;  %v1403_v0 = vadd.f32 %v1401_v5, %v1393_v27  ;;  %v1404_v57 = vadd.f32 %v1402_v61, %v1394_v55 }
 0x34d   :  { %v1466_v24 = vmul.f32 %v1464_v1, %v3071_v4  ;;  %v1467_v52 = vmul.f32 %v1465_v62, %v3073_v63  ;;  %v39_v29 = vpack.c.b16 %v37_v21, %v37_v21  ;;  %v1996_v21 = vld [vmem:[%s3667_s3 + $0x98] sm:$0xff] }
 0x34e   :  { %v1421_v16 = vadd.f32 %v1419_v49, %v1403_v0  ;;  %v1422_v36 = vadd.f32 %v1420_v13, %v1404_v57 }
 0x34f   :  { %v1473_v26 = vmul.f32 %v1471_v35, %v1466_v24  ;;  %v1474_v5 = vmul.f32 %v1471_v35, %v1467_v52  ;;  %v400_v35 = vmul.f32 %v3032_v9, %v2647_v42  ;;  %1909 = vmatmul.msk.bf16.gmra.mxu0 %vm45_vm1, %v39_v29  ;;  %1911 = vmatmul.msk.bf16.gmra.mxu1 %vm45_vm1, %v39_v29 }
 0x350   :  { %v1257_v45 = vpop.permute.xlu2 %1256  ;;  %v1439_v15 = vadd.f32 %v1437_v22, %v1421_v16  ;;  %v1440_v12 = vadd.f32 %v1438_v40, %v1422_v36  ;;  %1963 = vmatmul.msk.bf16.gmra.mxu2 %vm45_vm1, %v39_v29  ;;  %1965 = vmatmul.msk.bf16.gmra.mxu3 %vm45_vm1, %v39_v29 }
 0x352   :  { %v1457_v3 = vadd.f32 %v1455_v30, %v1439_v15  ;;  %v1458_v61 = vadd.f32 %v1456_v10, %v1440_v12  ;;  %v1247_v6 = vpop.permute.xlu1 %1246 }
 0x353   :  { %v1249_v49 = vadd.f32 %v1247_v6, %v1241_v31  ;;  %v1250_v13 = vadd.f32 %v1247_v6, %v1242_v37  ;;  %v1481_v58 = vpop.permute.xlu0 %1480 }
 0x354   :  { %v1475_v27 = vadd.f32 %v1473_v26, %v1457_v3  ;;  %v1476_v55 = vadd.f32 %v1474_v5, %v1458_v61  ;;  %v1995_v3 = vld [vmem:[%s3667_s3 + $0x90] sm:$0xff] }
 0x355   :  { %v1251_v0 = vmax.f32 %v1249_v49, 0.0  ;;  %v1252_v57 = vmax.f32 %v1250_v13, 0.0 }
 0x356   :  { %v1483_v51 = vadd.f32 %v1481_v58, %v1475_v27  ;;  %v1484_v10 = vadd.f32 %v1481_v58, %v1476_v55 }
 0x357   :  { %v1259_v42 = vmul.f32 %v1257_v45, %v1251_v0  ;;  %v1260_v54 = vmul.f32 %v1257_v45, %v1252_v57 }
 0x358   :  { %v644_v14 = vpop.permute.xlu2 %643  ;;  %v1485_v15 = vmax.f32 %v1483_v51, 0.0  ;;  %v1486_v26 = vmax.f32 %v1484_v10, 0.0 }
 0x359   :  { %v646_v59 = vmul.f32 %v644_v14, %v2688_v46  ;;  %v647_v7 = vmul.f32 %v644_v14, %v2691_v39  ;;  %v1261_v46 = vrot.slane %v1259_v42, 4  ;;  %v1267_v39 = vrot.slane %v1260_v54, 4 }
 0x35a   :  { %v1491_v61 = vpop.permute.xlu1 %1490 }
 0x35b   :  { %v3142_v1 = vadd.f32 %v646_v59, %v400_v35  ;;  %v3144_v62 = vadd.f32 %v647_v7, %v401_v34  ;;  %v1262_v9 = vadd.f32 %v1261_v46, %v1259_v42  ;;  %v1268_v25 = vadd.f32 %v1267_v39, %v1260_v54 }
 0x35c   :  { %v1493_v31 = vmul.f32 %v1491_v61, %v1485_v15  ;;  %v1494_v27 = vmul.f32 %v1491_v61, %v1486_v26  ;;  %v1998_v26 = vld [vmem:[%s3667_s3 + $0xa8] sm:$0xff] }
 0x35d   :  { %709 = vrot.lane.b32.xlu0 %v3144_v62, %s2113_s21  ;;  %654 = vrot.lane.b32.xlu2 %v3144_v62, %s2109_s17  ;;  %v1263_v22 = vrot.slane %v1262_v9, 2  ;;  %v1269_v40 = vrot.slane %v1268_v25, 2 }
 0x35e   :  { %652 = vrot.lane.b32.xlu1 %v3142_v1, %s2109_s17  ;;  %v1495_v41 = vrot.slane %v1493_v31, 4  ;;  %v1501_v6 = vrot.slane %v1494_v27, 4 }
 0x35f   :  { %v1264_v24 = vadd.f32 %v1263_v22, %v1262_v9  ;;  %v1270_v52 = vadd.f32 %v1269_v40, %v1268_v25 }
 0x360   :  { %v1496_v49 = vadd.f32 %v1495_v41, %v1493_v31  ;;  %v1502_v13 = vadd.f32 %v1501_v6, %v1494_v27  ;;  %v1999_v6 = vld [vmem:[%s3667_s3 + $0xb0] sm:$0xff] }
 0x361   :  { %v1265_v16 = vrot.slane %v1264_v24, 1  ;;  %v1271_v36 = vrot.slane %v1270_v52, 1 }
 0x362   :  { %v1497_v34 = vrot.slane %v1496_v49, 2  ;;  %v1503_v59 = vrot.slane %v1502_v13, 2 }
 0x363   :  { %v1266_v30 = vadd.f32 %v1265_v16, %v1264_v24  ;;  %v1272_v45 = vadd.f32 %v1271_v36, %v1270_v52 }
 0x364   :  { %v1498_v0 = vadd.f32 %v1497_v34, %v1496_v49  ;;  %v1504_v57 = vadd.f32 %v1503_v59, %v1502_v13 }
 0x365   :  { %756 = vrot.lane.b32.xlu0 %v3142_v1, %s2112_s20  ;;  %669 = vrot.lane.b32.xlu2 %v3142_v1, %s2108_s16  ;;  %v1273_v12 = vsub.f32 0.0, %v1266_v30  ;;  %v1274_v5 = vsub.f32 0.0, %v1272_v45 }
 0x366   :  { %671 = vrot.lane.b32.xlu1 %v3144_v62, %s2108_s16  ;;  %v1499_v42 = vrot.slane %v1498_v0, 1  ;;  %v1505_v54 = vrot.slane %v1504_v57, 1 }
 0x367   :  { %v1275_v37 = vmul.f32 1.442695, %v1273_v12  ;;  %v1277_v55 = vmul.f32 1.442695, %v1274_v5 }
 0x368   :  { %v1500_v39 = vadd.f32 %v1499_v42, %v1498_v0  ;;  %v1506_v25 = vadd.f32 %v1505_v54, %v1504_v57  ;;  %v3811_v57 = vld [vmem:[#allocation17_spill] sm:$0xff]  ;;  %v3812_v54 = vld [vmem:[#allocation18_spill] sm:$0xff] }
 0x369   :  { %2054 = vpow2.f32 %v1275_v37 }
 0x36a   :  { %2056 = vpow2.f32 %v1277_v55  ;;  %v1507_v22 = vsub.f32 0.0, %v1500_v39  ;;  %v1508_v52 = vsub.f32 0.0, %v1506_v25  ;;  %v3813_v25 = vld [vmem:[#allocation32_spill] sm:$0xff] }
 0x36c   :  { %v1509_v16 = vmul.f32 1.442695, %v1507_v22  ;;  %v1511_v58 = vmul.f32 1.442695, %v1508_v52  ;;  %v3814_v52 = vld [vmem:[#allocation9_spill] sm:$0xff] }
 0x36d   :  { %775 = vrot.lane.b32.xlu0 %v3142_v1, %s2114_s22  ;;  %690 = vrot.lane.b32.xlu2 %v3144_v62, %s2111_s19 }
 0x36e   :  { %688 = vrot.lane.b32.xlu1 %v3142_v1, %s2111_s19 }
 0x36f   :  { %v2055_v14 = vpop.eup %2054 }
 0x370   :  { %v2057_v35 = vpop.eup %2056  ;;  %v1279_v7 = vadd.f32 1.0, %v2055_v14 }
 0x371   :  { %v1280_v29 = vadd.f32 1.0, %v2057_v35 }
 0x372   :  { %2058 = vrcp.f32 %v1279_v7 }
 0x373   :  { %2060 = vrcp.f32 %v1280_v29  ;;  %v3810_v29 = vld [vmem:[#allocation19_spill] sm:$0xff] }
 0x374   :  { %2062 = vpow2.f32 %v1509_v16 }
 0x375   :  { %794 = vrot.lane.b32.xlu0 %v3142_v1, %s2115_s23  ;;  %707 = vrot.lane.b32.xlu2 %v3142_v1, %s2113_s21  ;;  %2064 = vpow2.f32 %v1511_v58 }
 0x376   :  { %737 = vrot.lane.b32.xlu1 %v3142_v1, %s2110_s18 }
 0x378   :  { %v2059_v46 = vpop.eup %2058 }
 0x379   :  { %v2061_v9 = vpop.eup %2060  ;;  %v3189_v40 = vmul.f32 %v2059_v46, %v2745_v60  ;;  %v1997_v60 = vld [vmem:[%s3667_s3 + $0xa0] sm:$0xff] }
 0x37a   :  { %v3192_v24 = vmul.f32 %v2061_v9, %v2789_v20  ;;  %v2063_v51 = vpop.eup %2062 }
 0x37b   :  { %v2065_v30 = vpop.eup %2064  ;;  %v1513_v10 = vadd.f32 1.0, %v2063_v51  ;;  %v3815_v51 = vld [vmem:[#allocation22_spill] sm:$0xff] }
 0x37c   :  { %v1285_v36 = vadd.f32 %v3192_v24, %v3189_v40  ;;  %v1514_v45 = vadd.f32 1.0, %v2065_v30 }
 0x37d   :  { %739 = vrot.lane.b32.xlu2 %v3144_v62, %s2110_s18  ;;  %2066 = vrcp.f32 %v1513_v10  ;;  %v3816_v10 = vld [vmem:[#allocation23_spill] sm:$0xff] }
 0x37e   :  { %1572 = vperm.xlu1 %2027, %v1995_v3   ;;  %2068 = vrcp.f32 %v1514_v45 }
 0x383   :  { %v2067_v20 = vpop.eup %2066 }
 0x384   :  { %v2069_v15 = vpop.eup %2068  ;;  %v3203_v5 = vmul.f32 %v2067_v20, %v2749_v2 }
 0x385   :  { %758 = vrot.lane.b32.xlu2 %v3144_v62, %s2112_s20  ;;  %v3206_v3 = vmul.f32 %v2069_v15, %v2801_v28 }
 0x386   :  { %1588 = vperm.xlu1 %2027, %v1996_v21  }
 0x387   :  { %v1519_v61 = vadd.f32 %v3206_v3, %v3203_v5 }
 0x38d   :  { %777 = vrot.lane.b32.xlu2 %v3144_v62, %s2114_s22 }
 0x395   :  { %796 = vrot.lane.b32.xlu2 %v3144_v62, %s2115_s23 }
 0x39f   :  { %1286 = vadd.xlane.f32.xlu0 %v1285_v36 }
 0x3b3   :  { %1606 = vperm.xlu0 %2029, %v1997_v60  }
 0x3b7   :  { %v655_v12 = vpop.permute.xlu2 %654 }
 0x3bb   :  { %1624 = vperm.xlu0 %2029, %v1998_v26   ;;  %v3817_v26 = vld [vmem:[#allocation33_spill] sm:$0xff] }
 0x3be   :  { %1520 = vadd.xlane.f32.xlu2 %v1519_v61 }
 0x3bf   :  { %v670_v31 = vpop.permute.xlu2 %669 }
 0x3c7   :  { %v691_v37 = vpop.permute.xlu2 %690 }
 0x3cc   :  { %v3217_v13 = vpop.f32.mrf.mxu0  ;;  %v3219_v14 = vpop.f32.mrf.mxu1 }
 0x3cf   :  { %v708_v27 = vpop.permute.xlu2 %707  ;;  %v710_v41 = vpop.permute.xlu0 %709 }
 0x3d0   :  { %v653_v55 = vpop.permute.xlu1 %652  ;;  %v711_v39 = vsel %vm180_vm5, %v708_v27, %v710_v41  ;;  %v712_v9 = vsel %vm180_vm5, %v710_v41, %v708_v27  ;;  %v3818_v27 = vld [vmem:[#allocation20_spill] sm:$0xff]  ;;  %v3819_v41 = vld [vmem:[#allocation21_spill] sm:$0xff] }
 0x3d1   :  { %v656_v35 = vsel %vm102_vm2, %v653_v55, %v655_v12  ;;  %v657_v34 = vsel %vm102_vm2, %v655_v12, %v653_v55  ;;  %v713_v30 = vmul.f32 %v712_v9, %v3815_v51  ;;  %v714_v45 = vmul.f32 %v711_v39, %v3816_v10 }
 0x3d2   :  { %v658_v42 = vmul.f32 %v657_v34, %v3811_v57  ;;  %v659_v46 = vmul.f32 %v656_v35, %v3812_v54 }
 0x3d4   :  { %v75_v15 = vpop.f32.mrf.mxu0  ;;  %v93_v12 = vpop.f32.mrf.mxu1  ;;  %v665_v61 = vmul.f32 %v3817_v26, %v658_v42 }
 0x3d5   :  { %v3823_v15 = vld [vmem:[#allocation26_spill] sm:$0xff] }
 0x3d6   :  { %1634 = vperm.xlu2 %2028, %v1999_v6  }
 0x3d7   :  { %v740_v2 = vpop.permute.xlu2 %739  ;;  %v757_v59 = vpop.permute.xlu0 %756 }
 0x3d8   :  { %v672_v21 = vpop.permute.xlu1 %671 }
 0x3d9   :  { %v673_v28 = vsel %vm126_vm3, %v670_v31, %v672_v21  ;;  %v674_v49 = vsel %vm126_vm3, %v672_v21, %v670_v31  ;;  %v666_v31 = vmul.f32 %v3817_v26, %v659_v46 }
 0x3da   :  { %v675_v7 = vmul.f32 %v674_v49, %v2451_v56  ;;  %v676_v0 = vmul.f32 %v673_v28, %v3810_v29  ;;  %v3820_v49 = vld [vmem:[#allocation7_spill] sm:$0xff] }
 0x3dc   :  { %v682_v16 = vmul.f32 %v3814_v52, %v675_v7  ;;  %v683_v36 = vmul.f32 %v3814_v52, %v676_v0  ;;  %v3821_v7 = vld [vmem:[#allocation8_spill] sm:$0xff]  ;;  %v2078_v52 = vld [vmem:[%s3667_s3 + $0xc0] sm:$0xff] }
 0x3dd   :  { %v720_v0 = vmul.f32 %v3821_v7, %v713_v30  ;;  %v3822_v30 = vld [vmem:[#allocation10_spill] sm:$0xff] }
 0x3de   :  { %1652 = vperm.xlu2 %2028, %v3813_v25   ;;  %v684_v21 = vadd.f32 %v682_v16, %v665_v61  ;;  %v685_v28 = vadd.f32 %v683_v36, %v666_v31 }
 0x3df   :  { %v759_v22 = vpop.permute.xlu2 %758  ;;  %v776_v39 = vpop.permute.xlu0 %775 }
 0x3e0   :  { %v689_v58 = vpop.permute.xlu1 %688  ;;  %v760_v42 = vsel %vm245_vm7, %v757_v59, %v759_v22  ;;  %v761_v46 = vsel %vm245_vm7, %v759_v22, %v757_v59  ;;  %v3824_v59 = vld [vmem:[#allocation27_spill] sm:$0xff] }
 0x3e1   :  { %v692_v60 = vsel %vm153_vm4, %v689_v58, %v691_v37  ;;  %v693_v20 = vsel %vm153_vm4, %v691_v37, %v689_v58  ;;  %v721_v37 = vmul.f32 %v3821_v7, %v714_v45  ;;  %v732_v45 = vmul.f32 %v3822_v30, %v3144_v62 }
 0x3e2   :  { %v694_v55 = vmul.f32 %v693_v20, %v3818_v27  ;;  %v695_v6 = vmul.f32 %v692_v60, %v3819_v41  ;;  %v731_v20 = vmul.f32 %v3822_v30, %v3142_v1  ;;  %v762_v12 = vmul.f32 %v760_v42, %v3823_v15  ;;  %v3829_v42 = vld [vmem:[#allocation29_spill] sm:$0xff] }
 0x3e3   :  { %v763_v22 = vmul.f32 %v761_v46, %v3824_v59  ;;  %v3830_v46 = vld [vmem:[#allocation5_spill] sm:$0xff] }
 0x3e4   :  { %v701_v35 = vmul.f32 %v3820_v49, %v694_v55  ;;  %v702_v34 = vmul.f32 %v3820_v49, %v695_v6  ;;  %v3825_v55 = vld [vmem:[#allocation24_spill] sm:$0xff] }
 0x3e6   :  { %v703_v9 = vadd.f32 %v701_v35, %v684_v21  ;;  %v704_v25 = vadd.f32 %v702_v34, %v685_v28  ;;  %1670 = vperm.xlu2 %2028, %v2078_v52   ;;  %v3826_v21 = vld [vmem:[#allocation25_spill] sm:$0xff]  ;;  %v3827_v35 = vld [vmem:[#allocation6_spill] sm:$0xff] }
 0x3e7   :  { %v778_v16 = vpop.permute.xlu2 %777 }
 0x3e8   :  { %v722_v36 = vadd.f32 %v720_v0, %v703_v9  ;;  %v723_v58 = vadd.f32 %v721_v37, %v704_v25  ;;  %v738_v60 = vpop.permute.xlu1 %737  ;;  %v779_v31 = vsel %vm272_vm8, %v776_v39, %v778_v16  ;;  %v780_v62 = vsel %vm272_vm8, %v778_v16, %v776_v39  ;;  %v3828_v0 = vld [vmem:[#allocation28_spill] sm:$0xff]  ;;  %v795_v16 = vpop.permute.xlu0 %794 }
 0x3e9   :  { %v741_v26 = vsel %vm218_vm6, %v738_v60, %v740_v2  ;;  %v742_v61 = vsel %vm218_vm6, %v740_v2, %v738_v60  ;;  %v781_v37 = vmul.f32 %v779_v31, %v3828_v0  ;;  %v782_v2 = vmul.f32 %v780_v62, %v3829_v42  ;;  %v3832_v31 = vld [vmem:[#allocation30_spill] sm:$0xff]  ;;  %v3833_v62 = vld [vmem:[#allocation31_spill] sm:$0xff] }
 0x3ea   :  { %v743_v6 = vmul.f32 %v741_v26, %v3825_v55  ;;  %v744_v1 = vmul.f32 %v742_v61, %v3826_v21  ;;  %v733_v28 = vadd.f32 %v731_v20, %v722_v36  ;;  %v734_v49 = vadd.f32 %v732_v45, %v723_v58  ;;  %v3831_v20 = vld [vmem:[#allocation35_spill] sm:$0xff] }
 0x3eb   :  { %v769_v9 = vmul.f32 %v3830_v46, %v762_v12  ;;  %v770_v25 = vmul.f32 %v3830_v46, %v763_v22  ;;  %v788_v26 = vmul.f32 %v3831_v20, %v781_v37  ;;  %v789_v61 = vmul.f32 %v3831_v20, %v782_v2  ;;  %v3835_v46 = vld [vmem:[#allocation37_spill] sm:$0xff] }
 0x3ec   :  { %v750_v34 = vmul.f32 %v3827_v35, %v743_v6  ;;  %v751_v7 = vmul.f32 %v3827_v35, %v744_v1  ;;  %v3834_v6 = vld [vmem:[#allocation38_spill] sm:$0xff] }
 0x3ee   :  { %v752_v52 = vadd.f32 %v750_v34, %v733_v28  ;;  %v753_v39 = vadd.f32 %v751_v7, %v734_v49 }
 0x3ef   :  { %v797_v30 = vpop.permute.xlu2 %796 }
 0x3f0   :  { %v798_v36 = vsel %vm299_vm9, %v795_v16, %v797_v30  ;;  %v799_v58 = vsel %vm299_vm9, %v797_v30, %v795_v16  ;;  %v771_v45 = vadd.f32 %v769_v9, %v752_v52  ;;  %v772_v60 = vadd.f32 %v770_v25, %v753_v39  ;;  %v2079_v25 = vld [vmem:[%s3670_s6] sm:$0xff]  ;;  %v2080_v30 = vld [vmem:[%s3670_s6 + $0x8] sm:$0xff] }
 0x3f1   :  { %v800_v12 = vmul.f32 %v798_v36, %v3832_v31  ;;  %v801_v22 = vmul.f32 %v799_v58, %v3833_v62  ;;  %v3339_v58 = vpop.permute.xlu1 %1572 }
 0x3f2   :  { %v790_v49 = vadd.f32 %v788_v26, %v771_v45  ;;  %v791_v35 = vadd.f32 %v789_v61, %v772_v60 }
 0x3f3   :  { %v807_v1 = vmul.f32 %v3834_v6, %v800_v12  ;;  %v808_v28 = vmul.f32 %v3834_v6, %v801_v22 }
 0x3f5   :  { %v809_v34 = vadd.f32 %v807_v1, %v790_v49  ;;  %v810_v7 = vadd.f32 %v808_v28, %v791_v35 }
 0x3f7   :  { %v818_v16 = vadd.f32 %v3835_v46, %v809_v34  ;;  %v819_v9 = vadd.f32 %v3835_v46, %v810_v7 }
 0x3f9   :  { %v3292_v37 = vmul.f32 %v818_v16, %v3217_v13  ;;  %v3295_v2 = vmul.f32 %v819_v9, %v3219_v14  ;;  %v3343_v60 = vpop.permute.xlu1 %1588 }
 0x3fb   :  { %911 = vrot.lane.b32.xlu0 %v3295_v2, %s2110_s18  ;;  %826 = vrot.lane.b32.xlu1 %v3295_v2, %s2109_s17 }
 0x3fc   :  { %824 = vrot.lane.b32.xlu2 %v3292_v37, %s2109_s17 }
 0x403   :  { %930 = vrot.lane.b32.xlu0 %v3295_v2, %s2112_s20  ;;  %843 = vrot.lane.b32.xlu1 %v3295_v2, %s2108_s16 }
 0x404   :  { %841 = vrot.lane.b32.xlu2 %v3292_v37, %s2108_s16 }
 0x40b   :  { %949 = vrot.lane.b32.xlu0 %v3295_v2, %s2114_s22  ;;  %862 = vrot.lane.b32.xlu1 %v3295_v2, %s2111_s19 }
 0x40c   :  { %860 = vrot.lane.b32.xlu2 %v3292_v37, %s2111_s19 }
 0x412   :  { %v1287_v13 = vpop.xlane.xlu0 %1286 }
 0x413   :  { %v1288_v14 = vmul.f32 0.00390625, %v1287_v13  ;;  %968 = vrot.lane.b32.xlu0 %v3295_v2, %s2115_s23  ;;  %881 = vrot.lane.b32.xlu1 %v3295_v2, %s2113_s21 }
 0x414   :  { %879 = vrot.lane.b32.xlu2 %v3292_v37, %s2113_s21 }
 0x415   :  { %1308 = vmatpush.msrb.mxu0 %v1288_v14 }
 0x416   :  { %1981 = vmatmul.msk.f32.vlgmr.msrb.gmra.mxu0 %vm45_vm1, %v2079_v25 }
 0x41b   :  { %909 = vrot.lane.b32.xlu1 %v3292_v37, %s2110_s18 }
 0x423   :  { %928 = vrot.lane.b32.xlu1 %v3292_v37, %s2112_s20 }
 0x425   :  { %v3347_v12 = vpop.permute.xlu0 %1606 }
 0x42b   :  { %947 = vrot.lane.b32.xlu1 %v3292_v37, %s2114_s22 }
 0x42d   :  { %v3349_v28 = vpop.permute.xlu0 %1624 }
 0x431   :  { %v1521_v52 = vpop.xlane.xlu2 %1520 }
 0x432   :  { %v1522_v39 = vmul.f32 0.00390625, %v1521_v52 }
 0x433   :  { %966 = vrot.lane.b32.xlu1 %v3292_v37, %s2115_s23 }
 0x434   :  { %1542 = vmatpush.msrb.mxu1 %v1522_v39 }
 0x435   :  { %1994 = vmatmul.msk.f32.vlgmr.msrb.gmra.mxu1 %vm45_vm1, %v2080_v30 }
 0x439   :  { %v3337_v36 = vpop.permute.xlu2 %1634 }
 0x441   :  { %v3341_v45 = vpop.permute.xlu2 %1652 }
 0x442   :  { %3836 = vst [vmem:[#allocation19_spill] sm:$0xff] %v3341_v45 }
 0x449   :  { %v3345_v20 = vpop.permute.xlu2 %1670 }
 0x44a   :  { %3837 = vst [vmem:[#allocation17_spill] sm:$0xff] %v3345_v20 }
 0x456   :  { %v825_v61 = vpop.permute.xlu2 %824 }
 0x45e   :  { %v842_v1 = vpop.permute.xlu2 %841 }
 0x466   :  { %v861_v34 = vpop.permute.xlu2 %860 }
 0x46d   :  { %v827_v26 = vpop.permute.xlu1 %826  ;;  %v912_v35 = vpop.permute.xlu0 %911 }
 0x46e   :  { %v829_v9 = vsel %vm102_vm2, %v827_v26, %v825_v61  ;;  %v828_v25 = vsel %vm102_vm2, %v825_v61, %v827_v26  ;;  %v880_v52 = vpop.permute.xlu2 %879 }
 0x46f   :  { %v830_v4 = vmul.f32 %v829_v9, %v3811_v57  ;;  %v831_v61 = vmul.f32 %v828_v25, %v3812_v54  ;;  %v3839_v9 = vld [vmem:[#allocation40_spill] sm:$0xff] }
 0x475   :  { %v844_v22 = vpop.permute.xlu1 %843  ;;  %v931_v13 = vpop.permute.xlu0 %930 }
 0x476   :  { %v846_v46 = vsel %vm126_vm3, %v844_v22, %v842_v1  ;;  %v845_v16 = vsel %vm126_vm3, %v842_v1, %v844_v22 }
 0x477   :  { %v847_v39 = vmul.f32 %v846_v46, %v2451_v56  ;;  %v848_v63 = vmul.f32 %v845_v16, %v3810_v29 }
 0x47d   :  { %v863_v6 = vpop.permute.xlu1 %862 }
 0x47e   :  { %v865_v14 = vsel %vm153_vm4, %v863_v6, %v861_v34  ;;  %v864_v30 = vsel %vm153_vm4, %v861_v34, %v863_v6  ;;  %v3838_v6 = vld [vmem:[#allocation43_spill] sm:$0xff] }
 0x47f   :  { %v866_v20 = vmul.f32 %v865_v14, %v3818_v27  ;;  %v867_v56 = vmul.f32 %v864_v30, %v3819_v41  ;;  %v854_v34 = vmul.f32 %v3838_v6, %v847_v39  ;;  %v855_v44 = vmul.f32 %v3838_v6, %v848_v63  ;;  %v3840_v14 = vld [vmem:[#allocation14_spill] sm:$0xff] }
 0x480   :  { %v837_v27 = vmul.f32 %v3839_v9, %v830_v4 }
 0x481   :  { %v873_v45 = vmul.f32 %v3840_v14, %v866_v20  ;;  %v874_v54 = vmul.f32 %v3840_v14, %v867_v56 }
 0x482   :  { %v856_v25 = vadd.f32 %v854_v34, %v837_v27 }
 0x485   :  { %v882_v49 = vpop.permute.xlu1 %881 }
 0x486   :  { %v884_v22 = vsel %vm180_vm5, %v882_v49, %v880_v52  ;;  %v883_v48 = vsel %vm180_vm5, %v880_v52, %v882_v49  ;;  %v838_v49 = vmul.f32 %v3839_v9, %v831_v61  ;;  %v3841_v52 = vld [vmem:[#allocation11_spill] sm:$0xff] }
 0x487   :  { %v885_v29 = vmul.f32 %v884_v22, %v3815_v51  ;;  %v886_v57 = vmul.f32 %v883_v48, %v3816_v10  ;;  %v950_v48 = vpop.permute.xlu0 %949  ;;  %v875_v10 = vadd.f32 %v873_v45, %v856_v25 }
 0x488   :  { %v857_v39 = vadd.f32 %v855_v44, %v838_v49 }
 0x489   :  { %v892_v51 = vmul.f32 %v3841_v52, %v885_v29  ;;  %v893_v4 = vmul.f32 %v3841_v52, %v886_v57  ;;  %v3843_v29 = vld [vmem:[#allocation34_spill] sm:$0xff]  ;;  %v3845_v52 = vld [vmem:[#allocation39_spill] sm:$0xff] }
 0x48b   :  { %v894_v6 = vadd.f32 %v892_v51, %v875_v10 }
 0x48d   :  { %v910_v7 = vpop.permute.xlu1 %909 }
 0x48e   :  { %v913_v41 = vsel %vm218_vm6, %v910_v7, %v912_v35  ;;  %v914_v63 = vsel %vm218_vm6, %v912_v35, %v910_v7 }
 0x48f   :  { %v915_v20 = vmul.f32 %v913_v41, %v3825_v55  ;;  %v969_v41 = vpop.permute.xlu0 %968 }
 0x493   :  { %v1310_v1 = vpop.f32.mrf.mxu0 }
 0x494   :  { %v1313_v26 = vsub.f32 0.0, %v1310_v1  ;;  %v876_v1 = vadd.f32 %v874_v54, %v857_v39 }
 0x495   :  { %v929_v46 = vpop.permute.xlu1 %928 }
 0x496   :  { %v1314_v16 = vmul.f32 1.442695, %v1313_v26  ;;  %v932_v30 = vsel %vm245_vm7, %v929_v46, %v931_v13  ;;  %v933_v22 = vsel %vm245_vm7, %v931_v13, %v929_v46  ;;  %v916_v26 = vmul.f32 %v914_v63, %v3826_v21  ;;  %v3842_v13 = vld [vmem:[#allocation13_spill] sm:$0xff] }
 0x497   :  { %v895_v35 = vadd.f32 %v893_v4, %v876_v1  ;;  %v934_v7 = vmul.f32 %v932_v30, %v3823_v15  ;;  %v935_v34 = vmul.f32 %v933_v22, %v3824_v59  ;;  %v904_v46 = vmul.f32 %v3842_v13, %v3295_v2  ;;  %v3844_v15 = vld [vmem:[#allocation36_spill] sm:$0xff]  ;;  %v3846_v1 = vld [vmem:[#allocation42_spill] sm:$0xff] }
 0x498   :  { %2070 = vpow2.f32 %v1314_v16  ;;  %v903_v21 = vmul.f32 %v3842_v13, %v3292_v37  ;;  %v922_v16 = vmul.f32 %v3843_v29, %v915_v20  ;;  %v923_v57 = vmul.f32 %v3843_v29, %v916_v26 }
 0x499   :  { %v906_v49 = vadd.f32 %v904_v46, %v895_v35  ;;  %v941_v54 = vmul.f32 %v3844_v15, %v934_v7  ;;  %v942_v59 = vmul.f32 %v3844_v15, %v935_v34  ;;  %v2004_v15 = vld [vmem:[%s3668_s4 + $0x10] sm:$0xff] }
 0x49a   :  { %v905_v14 = vadd.f32 %v903_v21, %v894_v6 }
 0x49b   :  { %v925_v25 = vadd.f32 %v923_v57, %v906_v49  ;;  %v2011_v49 = vld [vmem:[%s3667_s3 + $0x108] sm:$0xff] }
 0x49c   :  { %v924_v2 = vadd.f32 %v922_v16, %v905_v14 }
 0x49d   :  { %v948_v61 = vpop.permute.xlu1 %947  ;;  %v944_v4 = vadd.f32 %v942_v59, %v925_v25  ;;  %v2006_v59 = vld [vmem:[%s3667_s3 + $0xe0] sm:$0xff] }
 0x49e   :  { %v2071_v56 = vpop.eup %2070  ;;  %v951_v44 = vsel %vm272_vm8, %v948_v61, %v950_v48  ;;  %v952_v45 = vsel %vm272_vm8, %v950_v48, %v948_v61  ;;  %v943_v48 = vadd.f32 %v941_v54, %v924_v2  ;;  %v2005_v54 = vld [vmem:[%s3667_s3 + $0xd8] sm:$0xff]  ;;  %v2008_v2 = vld [vmem:[%s3667_s3 + $0xf0] sm:$0xff] }
 0x49f   :  { %v1316_v55 = vadd.f32 1.0, %v2071_v56  ;;  %v953_v9 = vmul.f32 %v951_v44, %v3828_v0  ;;  %v954_v27 = vmul.f32 %v952_v45, %v3829_v42  ;;  %v3847_v44 = vld [vmem:[#allocation41_spill] sm:$0xff] }
 0x4a1   :  { %2072 = vrcp.f32 %v1316_v55  ;;  %v960_v37 = vmul.f32 %v3845_v52, %v953_v9  ;;  %v961_v51 = vmul.f32 %v3845_v52, %v954_v27 }
 0x4a3   :  { %v962_v30 = vadd.f32 %v960_v37, %v943_v48  ;;  %v963_v22 = vadd.f32 %v961_v51, %v944_v4  ;;  %v3491_v48 = vpop.f32.mrf.mxu2 }
 0x4a5   :  { %v967_v63 = vpop.permute.xlu1 %966 }
 0x4a6   :  { %v970_v39 = vsel %vm299_vm9, %v967_v63, %v969_v41  ;;  %v971_v0 = vsel %vm299_vm9, %v969_v41, %v967_v63  ;;  %v2007_v41 = vld [vmem:[%s3667_s3 + $0xe8] sm:$0xff] }
 0x4a7   :  { %v2073_v42 = vpop.eup %2072  ;;  %v972_v10 = vmul.f32 %v970_v39, %v3832_v31  ;;  %v973_v20 = vmul.f32 %v971_v0, %v3833_v62 }
 0x4a8   :  { %1320 = vperm.xlu1 %2027, %v2073_v42  }
 0x4a9   :  { %v979_v26 = vmul.f32 %v3846_v1, %v972_v10  ;;  %v980_v61 = vmul.f32 %v3846_v1, %v973_v20  ;;  %v3493_v10 = vpop.f32.mrf.mxu3 }
 0x4ab   :  { %v981_v56 = vadd.f32 %v979_v26, %v962_v30  ;;  %v982_v6 = vadd.f32 %v980_v61, %v963_v22  ;;  %v1023_v1 = vpop.f32.mrf.mxu2 }
 0x4ad   :  { %v990_v45 = vadd.f32 %v3847_v44, %v981_v56  ;;  %v991_v35 = vadd.f32 %v3847_v44, %v982_v6 }
 0x4af   :  { %992 = vst [vmem:[#allocation2] sm:$0xff] %v990_v45 }
 0x4b0   :  { %993 = vst [vmem:[#allocation2 + $0x8] sm:$0xff] %v991_v35 }
 0x4b2   :  { %v1544_v55 = vpop.f32.mrf.mxu1 }
 0x4b3   :  { %v1547_v7 = vsub.f32 0.0, %v1544_v55 }
 0x4b5   :  { %v1548_v31 = vmul.f32 1.442695, %v1547_v7 }
 0x4b7   :  { %2074 = vpow2.f32 %v1548_v31 }
 0x4bd   :  { %v2075_v62 = vpop.eup %2074 }
 0x4be   :  { %v1550_v34 = vadd.f32 1.0, %v2075_v62 }
 0x4c0   :  { %2076 = vrcp.f32 %v1550_v34 }
 0x4c6   :  { %v2077_v13 = vpop.eup %2076 }
 0x4c7   :  { %1554 = vperm.xlu1 %2027, %v2077_v13  }
 0x51a   :  { %v1321_v46 = vpop.permute.xlu1 %1320 }
 0x51b   :  { %v1323_v29 = vmul.f32 %v1321_v46, %v3189_v40  ;;  %v1324_v16 = vmul.f32 %v1321_v46, %v3192_v24  ;;  %v2002_v40 = vld [vmem:[%s3667_s3 + $0xc8] sm:$0xff]  ;;  %v2003_v24 = vld [vmem:[%s3667_s3 + $0xd0] sm:$0xff] }
 0x539   :  { %v1555_v21 = vpop.permute.xlu1 %1554 }
 0x53a   :  { %v1557_v57 = vmul.f32 %v1555_v21, %v3203_v5  ;;  %v1558_v9 = vmul.f32 %v1555_v21, %v3206_v3  ;;  %v2009_v5 = vld [vmem:[%s3667_s3 + $0xf8] sm:$0xff]  ;;  %v2010_v3 = vld [vmem:[%s3667_s3 + $0x100] sm:$0xff]  ;;  %v1041_v21 = vpop.f32.mrf.mxu3 }
 0x53c   :  { %v3425_v27 = vadd.f32 %v1557_v57, %v1323_v29  ;;  %v3427_v14 = vadd.f32 %v1558_v9, %v1324_v16 }
 0x53e   :  { %1580 = vrot.lane.b32.xlu2 %v3427_v14, %s2108_s16  ;;  %1578 = vrot.lane.b32.xlu0 %v3425_v27, %s2108_s16  ;;  %v1637_v1 = vmul.f32 %v3337_v36, %v3425_v27 }
 0x53f   :  { %1562 = vrot.lane.b32.xlu1 %v3425_v27, %s2109_s17 }
 0x546   :  { %1614 = vrot.lane.b32.xlu2 %v3425_v27, %s2113_s21  ;;  %1644 = vrot.lane.b32.xlu0 %v3427_v14, %s2110_s18 }
 0x547   :  { %1564 = vrot.lane.b32.xlu1 %v3427_v14, %s2109_s17 }
 0x54e   :  { %1688 = vperm.xlu2 %2028, %v2002_v40   ;;  %1662 = vrot.lane.b32.xlu0 %v3427_v14, %s2112_s20 }
 0x54f   :  { %1596 = vrot.lane.b32.xlu1 %v3425_v27, %s2111_s19 }
 0x556   :  { %1706 = vperm.xlu2 %2028, %v2003_v24   ;;  %1680 = vrot.lane.b32.xlu0 %v3427_v14, %s2114_s22 }
 0x557   :  { %1598 = vrot.lane.b32.xlu1 %v3427_v14, %s2111_s19 }
 0x55e   :  { %1698 = vrot.lane.b32.xlu0 %v3427_v14, %s2115_s23 }
 0x55f   :  { %1616 = vrot.lane.b32.xlu1 %v3427_v14, %s2113_s21 }
 0x566   :  { %1796 = vperm.xlu0 %2029, %v2009_v5  }
 0x567   :  { %1642 = vrot.lane.b32.xlu1 %v3425_v27, %s2110_s18 }
 0x56e   :  { %1814 = vperm.xlu0 %2029, %v2010_v3  }
 0x56f   :  { %1660 = vrot.lane.b32.xlu1 %v3425_v27, %s2112_s20 }
 0x576   :  { %1832 = vperm.xlu0 %2029, %v2011_v49  }
 0x577   :  { %1678 = vrot.lane.b32.xlu1 %v3425_v27, %s2114_s22 }
 0x57f   :  { %1696 = vrot.lane.b32.xlu1 %v3425_v27, %s2115_s23 }
 0x587   :  { %1716 = vperm.xlu1 %2027, %v2004_v15  }
 0x58f   :  { %1734 = vperm.xlu1 %2027, %v2005_v54  }
 0x597   :  { %1750 = vperm.xlu1 %2027, %v2006_v59  }
 0x598   :  { %v1581_v42 = vpop.permute.xlu2 %1580 }
 0x59f   :  { %1768 = vperm.xlu1 %2027, %v2007_v41  }
 0x5a0   :  { %v1615_v44 = vpop.permute.xlu2 %1614 }
 0x5a7   :  { %1786 = vperm.xlu1 %2027, %v2008_v2  }
 0x5b0   :  { %v1579_v51 = vpop.permute.xlu0 %1578 }
 0x5b1   :  { %v1563_v25 = vpop.permute.xlu1 %1562  ;;  %v1582_v26 = vsel %vm126_vm3, %v1579_v51, %v1581_v42  ;;  %v1583_v61 = vsel %vm126_vm3, %v1581_v42, %v1579_v51 }
 0x5b2   :  { %v1584_v31 = vmul.f32 %v1583_v61, %v2911_v32  ;;  %v1585_v62 = vmul.f32 %v1582_v26, %v2913_v43  ;;  %v3848_v26 = vld [vmem:[#allocation19_spill] sm:$0xff] }
 0x5b4   :  { %v1591_v40 = vmul.f32 %v3343_v60, %v1584_v31  ;;  %v1592_v24 = vmul.f32 %v3343_v60, %v1585_v62  ;;  %v3851_v31 = vld [vmem:[#allocation17_spill] sm:$0xff] }
 0x5b8   :  { %v1645_v0 = vpop.permute.xlu0 %1644 }
 0x5b9   :  { %v1565_v52 = vpop.permute.xlu1 %1564 }
 0x5ba   :  { %v1566_v20 = vsel %vm102_vm2, %v1563_v25, %v1565_v52  ;;  %v1567_v30 = vsel %vm102_vm2, %v1565_v52, %v1563_v25 }
 0x5bb   :  { %v1568_v45 = vmul.f32 %v1567_v30, %v2905_v11  ;;  %v1569_v35 = vmul.f32 %v1566_v20, %v2907_v18 }
 0x5bd   :  { %v1575_v29 = vmul.f32 %v3339_v58, %v1568_v45  ;;  %v1576_v16 = vmul.f32 %v3339_v58, %v1569_v35  ;;  %v3850_v45 = vld [vmem:[#allocation15_spill] sm:$0xff] }
 0x5bf   :  { %v1593_v54 = vadd.f32 %v1591_v40, %v1575_v29  ;;  %v1594_v58 = vadd.f32 %v1592_v24, %v1576_v16  ;;  %v3852_v40 = vld [vmem:[#allocation16_spill] sm:$0xff] }
 0x5c0   :  { %v1663_v22 = vpop.permute.xlu0 %1662 }
 0x5c1   :  { %v1597_v37 = vpop.permute.xlu1 %1596 }
 0x5c8   :  { %v1681_v59 = vpop.permute.xlu0 %1680 }
 0x5c9   :  { %v1599_v63 = vpop.permute.xlu1 %1598 }
 0x5ca   :  { %v1600_v56 = vsel %vm153_vm4, %v1597_v37, %v1599_v63  ;;  %v1601_v6 = vsel %vm153_vm4, %v1599_v63, %v1597_v37 }
 0x5cb   :  { %v1602_v34 = vmul.f32 %v1601_v6, %v2932_v53  ;;  %v1603_v13 = vmul.f32 %v1600_v56, %v2934_v38  ;;  %v3849_v6 = vld [vmem:[#allocation12_spill] sm:$0xff] }
 0x5cd   :  { %v1609_v5 = vmul.f32 %v3347_v12, %v1602_v34  ;;  %v1610_v3 = vmul.f32 %v3347_v12, %v1603_v13 }
 0x5cf   :  { %v1611_v12 = vadd.f32 %v1609_v5, %v1593_v54  ;;  %v1612_v52 = vadd.f32 %v1610_v3, %v1594_v58  ;;  %v3853_v5 = vld [vmem:[#allocation44_spill] sm:$0xff] }
 0x5d0   :  { %v1699_v13 = vpop.permute.xlu0 %1698 }
 0x5d1   :  { %v1617_v39 = vpop.permute.xlu1 %1616 }
 0x5d2   :  { %v1618_v55 = vsel %vm180_vm5, %v1615_v44, %v1617_v39  ;;  %v1619_v7 = vsel %vm180_vm5, %v1617_v39, %v1615_v44  ;;  %v1689_v39 = vpop.permute.xlu2 %1688 }
 0x5d3   :  { %v1620_v57 = vmul.f32 %v1619_v7, %v2975_v23  ;;  %v1621_v9 = vmul.f32 %v1618_v55, %v2977_v50 }
 0x5d5   :  { %v1627_v41 = vmul.f32 %v3349_v28, %v1620_v57  ;;  %v1628_v2 = vmul.f32 %v3349_v28, %v1621_v9 }
 0x5d7   :  { %v1629_v42 = vadd.f32 %v1627_v41, %v1611_v12 }
 0x5d9   :  { %v1643_v4 = vpop.permute.xlu1 %1642  ;;  %v1639_v7 = vadd.f32 %v1637_v1, %v1629_v42 }
 0x5da   :  { %v1646_v49 = vsel %vm218_vm6, %v1643_v4, %v1645_v0  ;;  %v1647_v15 = vsel %vm218_vm6, %v1645_v0, %v1643_v4  ;;  %v1630_v4 = vadd.f32 %v1628_v2, %v1612_v52 }
 0x5db   :  { %v1648_v37 = vmul.f32 %v1646_v49, %v2962_v19  ;;  %v1649_v51 = vmul.f32 %v1647_v15, %v2964_v47  ;;  %v1707_v49 = vpop.permute.xlu2 %1706 }
 0x5dd   :  { %v1655_v61 = vmul.f32 %v3848_v26, %v1648_v37  ;;  %v1656_v56 = vmul.f32 %v3848_v26, %v1649_v51  ;;  %v2014_v51 = vld [vmem:[%s3668_s4 + $0x18] sm:$0xff] }
 0x5e1   :  { %v1661_v46 = vpop.permute.xlu1 %1660 }
 0x5e2   :  { %v1664_v60 = vsel %vm245_vm7, %v1661_v46, %v1663_v22  ;;  %v1665_v25 = vsel %vm245_vm7, %v1663_v22, %v1661_v46  ;;  %v1638_v22 = vmul.f32 %v3337_v36, %v3427_v14  ;;  %v1657_v46 = vadd.f32 %v1655_v61, %v1639_v7 }
 0x5e3   :  { %v1666_v20 = vmul.f32 %v1664_v60, %v2987_v33  ;;  %v1667_v30 = vmul.f32 %v1665_v25, %v2989_v17 }
 0x5e4   :  { %v1640_v55 = vadd.f32 %v1638_v22, %v1630_v4 }
 0x5e5   :  { %v1673_v62 = vmul.f32 %v3851_v31, %v1666_v20  ;;  %v1674_v34 = vmul.f32 %v3851_v31, %v1667_v30 }
 0x5e6   :  { %v1658_v14 = vadd.f32 %v1656_v56, %v1640_v55 }
 0x5e7   :  { %v1675_v57 = vadd.f32 %v1673_v62, %v1657_v46 }
 0x5e8   :  { %v1676_v9 = vadd.f32 %v1674_v34, %v1658_v14 }
 0x5e9   :  { %v1679_v63 = vpop.permute.xlu1 %1678 }
 0x5ea   :  { %v1682_v0 = vsel %vm272_vm8, %v1679_v63, %v1681_v59  ;;  %v1683_v28 = vsel %vm272_vm8, %v1681_v59, %v1679_v63 }
 0x5eb   :  { %v1684_v44 = vmul.f32 %v1682_v0, %v3849_v6  ;;  %v1685_v35 = vmul.f32 %v1683_v28, %v3850_v45 }
 0x5ed   :  { %v1691_v21 = vmul.f32 %v1689_v39, %v1684_v44  ;;  %v1692_v29 = vmul.f32 %v1689_v39, %v1685_v35  ;;  %v1797_v39 = vpop.permute.xlu0 %1796 }
 0x5ef   :  { %v1694_v58 = vadd.f32 %v1692_v29, %v1676_v9  ;;  %v1693_v59 = vadd.f32 %v1691_v21, %v1675_v57 }
 0x5f1   :  { %v1697_v36 = vpop.permute.xlu1 %1696 }
 0x5f2   :  { %v1700_v27 = vsel %vm299_vm9, %v1697_v36, %v1699_v13  ;;  %v1701_v16 = vsel %vm299_vm9, %v1699_v13, %v1697_v36 }
 0x5f3   :  { %v1702_v24 = vmul.f32 %v1700_v27, %v3852_v40  ;;  %v1703_v3 = vmul.f32 %v1701_v16, %v3853_v5 }
 0x5f5   :  { %v1709_v15 = vmul.f32 %v1707_v49, %v1702_v24  ;;  %v1710_v54 = vmul.f32 %v1707_v49, %v1703_v3  ;;  %v1815_v42 = vpop.permute.xlu0 %1814 }
 0x5f7   :  { %v1712_v41 = vadd.f32 %v1710_v54, %v1694_v58  ;;  %v1711_v2 = vadd.f32 %v1709_v15, %v1693_v59 }
 0x5f9   :  { %v1717_v60 = vpop.permute.xlu1 %1716 }
 0x5fa   :  { %v1719_v25 = vadd.f32 %v1717_v60, %v1711_v2  ;;  %v1720_v12 = vadd.f32 %v1717_v60, %v1712_v41 }
 0x5fc   :  { %v3560_v52 = vmul.f32 %v1719_v25, %v3491_v48  ;;  %v3563_v37 = vmul.f32 %v1720_v12, %v3493_v10  ;;  %v2012_v48 = vld [vmem:[%s3667_s3 + $0x110] sm:$0xff]  ;;  %v2013_v10 = vld [vmem:[%s3667_s3 + $0x118] sm:$0xff]  ;;  %s2116_s3 = smov [#allocation2]  }
 0x5fd   :  { %v3606_v22 = vpop.permute.xlu0 %1832  ;;  %s1890_s4 = sshll.u32 %s2116_s3, 4  ;;  %s1891_s4 = int_to_ptr.vmem [resolvable:$true] %s1890_s4 }
 0x5fe   :  { %1806 = vrot.lane.b32.xlu1 %v3563_v37, %s2110_s18  ;;  %1726 = vrot.lane.b32.xlu2 %v3563_v37, %s2109_s17 }
 0x5ff   :  { %1724 = vrot.lane.b32.xlu0 %v3560_v52, %s2109_s17 }
 0x601   :  { %v1735_v63 = vpop.permute.xlu1 %1734 }
 0x606   :  { %1824 = vrot.lane.b32.xlu1 %v3563_v37, %s2112_s20  ;;  %1742 = vrot.lane.b32.xlu2 %v3563_v37, %s2108_s16 }
 0x607   :  { %1740 = vrot.lane.b32.xlu0 %v3560_v52, %s2108_s16 }
 0x609   :  { %v1751_v28 = vpop.permute.xlu1 %1750 }
 0x60e   :  { %1842 = vrot.lane.b32.xlu1 %v3563_v37, %s2114_s22  ;;  %1760 = vrot.lane.b32.xlu2 %v3563_v37, %s2111_s19 }
 0x60f   :  { %1758 = vrot.lane.b32.xlu0 %v3560_v52, %s2111_s19 }
 0x611   :  { %v1769_v20 = vpop.permute.xlu1 %1768 }
 0x616   :  { %1850 = vperm.xlu1 %2027, %v2012_v48   ;;  %1778 = vrot.lane.b32.xlu2 %v3563_v37, %s2113_s21 }
 0x617   :  { %1776 = vrot.lane.b32.xlu0 %v3560_v52, %s2113_s21 }
 0x619   :  { %v1787_v26 = vpop.permute.xlu1 %1786 }
 0x61e   :  { %1804 = vrot.lane.b32.xlu2 %v3560_v52, %s2110_s18 }
 0x61f   :  { %1858 = vrot.lane.b32.xlu0 %v3560_v52, %s2115_s23 }
 0x626   :  { %1822 = vrot.lane.b32.xlu2 %v3560_v52, %s2112_s20 }
 0x627   :  { %1868 = vperm.xlu0 %2029, %v2013_v10  }
 0x62e   :  { %1840 = vrot.lane.b32.xlu2 %v3560_v52, %s2114_s22  ;;  %s1892_s22 = sshll.u32 %s3671_s7, 4  ;;  %s1893_s22 = int_to_ptr.hbm [resolvable:$true] %s1892_s22 }
 0x636   :  { %1860 = vrot.lane.b32.xlu2 %v3563_v37, %s2115_s23  ;;  %s2117_s23 = smov 256  }
 0x63e   :  { %1878 = vperm.xlu2 %2028, %v2014_v51  }
 0x658   :  { %v1727_v0 = vpop.permute.xlu2 %1726 }
 0x660   :  { %v1743_v4 = vpop.permute.xlu2 %1742 }
 0x668   :  { %v1761_v30 = vpop.permute.xlu2 %1760 }
 0x670   :  { %v1779_v1 = vpop.permute.xlu2 %1778  ;;  %v1807_v44 = vpop.permute.xlu1 %1806 }
 0x671   :  { %v1725_v61 = vpop.permute.xlu0 %1724 }
 0x672   :  { %v1728_v62 = vsel %vm102_vm2, %v1725_v61, %v1727_v0  ;;  %v1729_v34 = vsel %vm102_vm2, %v1727_v0, %v1725_v61 }
 0x673   :  { %v1730_v27 = vmul.f32 %v1729_v34, %v2905_v11  ;;  %v1731_v16 = vmul.f32 %v1728_v62, %v2907_v18 }
 0x675   :  { %v1737_v49 = vmul.f32 %v1735_v63, %v1730_v27  ;;  %v1738_v15 = vmul.f32 %v1735_v63, %v1731_v16 }
 0x678   :  { %v1805_v56 = vpop.permute.xlu2 %1804  ;;  %v1825_v21 = vpop.permute.xlu1 %1824 }
 0x679   :  { %v1741_v35 = vpop.permute.xlu0 %1740  ;;  %v1808_v58 = vsel %vm218_vm6, %v1805_v56, %v1807_v44 }
 0x67a   :  { %v1744_v55 = vsel %vm126_vm3, %v1741_v35, %v1743_v4  ;;  %v1745_v7 = vsel %vm126_vm3, %v1743_v4, %v1741_v35  ;;  %v1810_v25 = vmul.f32 %v1808_v58, %v2962_v19 }
 0x67b   :  { %v1746_v29 = vmul.f32 %v1745_v7, %v2911_v32  ;;  %v1747_v36 = vmul.f32 %v1744_v55, %v2913_v43  ;;  %v1809_v32 = vsel %vm218_vm6, %v1807_v44, %v1805_v56 }
 0x67c   :  { %v1811_v12 = vmul.f32 %v1809_v32, %v2964_v47  ;;  %v1817_v19 = vmul.f32 %v1815_v42, %v1810_v25 }
 0x67d   :  { %v1753_v24 = vmul.f32 %v1751_v28, %v1746_v29  ;;  %v1754_v3 = vmul.f32 %v1751_v28, %v1747_v36 }
 0x67f   :  { %v1756_v41 = vadd.f32 %v1754_v3, %v1738_v15 }
 0x680   :  { %v1823_v31 = vpop.permute.xlu2 %1822  ;;  %v1843_v51 = vpop.permute.xlu1 %1842 }
 0x681   :  { %v1759_v13 = vpop.permute.xlu0 %1758  ;;  %v1826_v48 = vsel %vm245_vm7, %v1823_v31, %v1825_v21  ;;  %v1827_v10 = vsel %vm245_vm7, %v1825_v21, %v1823_v31 }
 0x682   :  { %v1762_v46 = vsel %vm153_vm4, %v1759_v13, %v1761_v30  ;;  %v1763_v14 = vsel %vm153_vm4, %v1761_v30, %v1759_v13  ;;  %v1828_v47 = vmul.f32 %v1826_v48, %v2987_v33  ;;  %v1829_v61 = vmul.f32 %v1827_v10, %v2989_v17 }
 0x683   :  { %v1764_v57 = vmul.f32 %v1763_v14, %v2932_v53  ;;  %v1765_v9 = vmul.f32 %v1762_v46, %v2934_v38  ;;  %v1755_v38 = vadd.f32 %v1753_v24, %v1737_v49 }
 0x685   :  { %v1771_v43 = vmul.f32 %v1769_v20, %v1764_v57  ;;  %v1772_v59 = vmul.f32 %v1769_v20, %v1765_v9  ;;  %v1800_v20 = vmul.f32 %v1797_v39, %v3563_v37 }
 0x687   :  { %v1773_v63 = vadd.f32 %v1771_v43, %v1755_v38  ;;  %v1774_v0 = vadd.f32 %v1772_v59, %v1756_v41 }
 0x688   :  { %v1841_v54 = vpop.permute.xlu2 %1840  ;;  %v1851_v46 = vpop.permute.xlu1 %1850 }
 0x689   :  { %v1777_v11 = vpop.permute.xlu0 %1776  ;;  %v1844_v56 = vsel %vm272_vm8, %v1841_v54, %v1843_v51  ;;  %v1845_v44 = vsel %vm272_vm8, %v1843_v51, %v1841_v54 }
 0x68a   :  { %v1780_v18 = vsel %vm180_vm5, %v1777_v11, %v1779_v1  ;;  %v1781_v53 = vsel %vm180_vm5, %v1779_v1, %v1777_v11  ;;  %v1818_v1 = vmul.f32 %v1815_v42, %v1811_v12  ;;  %v1846_v33 = vmul.f32 %v1844_v56, %v3849_v6 }
 0x68b   :  { %v1782_v2 = vmul.f32 %v1781_v53, %v2975_v23  ;;  %v1783_v60 = vmul.f32 %v1780_v18, %v2977_v50  ;;  %v1799_v50 = vmul.f32 %v1797_v39, %v3560_v52  ;;  %v1835_v52 = vmul.f32 %v3606_v22, %v1828_v47 }
 0x68c   :  { %v1836_v39 = vmul.f32 %v3606_v22, %v1829_v61  ;;  %v1847_v17 = vmul.f32 %v1845_v44, %v3850_v45  ;;  %v1853_v14 = vmul.f32 %v1851_v46, %v1846_v33 }
 0x68d   :  { %v1789_v28 = vmul.f32 %v1787_v26, %v1782_v2  ;;  %v1790_v4 = vmul.f32 %v1787_v26, %v1783_v60 }
 0x68e   :  { %v1854_v21 = vmul.f32 %v1851_v46, %v1847_v17 }
 0x68f   :  { %v1791_v23 = vadd.f32 %v1789_v28, %v1773_v63  ;;  %v1792_v30 = vadd.f32 %v1790_v4, %v1774_v0 }
 0x690   :  { %v1861_v37 = vpop.permute.xlu2 %1860 }
 0x691   :  { %v1801_v35 = vadd.f32 %v1799_v50, %v1791_v23  ;;  %v1802_v26 = vadd.f32 %v1800_v20, %v1792_v30  ;;  %v1859_v55 = vpop.permute.xlu0 %1858 }
 0x692   :  { %v1862_v42 = vsel %vm299_vm9, %v1859_v55, %v1861_v37  ;;  %v1863_v62 = vsel %vm299_vm9, %v1861_v37, %v1859_v55 }
 0x693   :  { %v1820_v7 = vadd.f32 %v1818_v1, %v1802_v26  ;;  %v1819_v31 = vadd.f32 %v1817_v19, %v1801_v35  ;;  %v1864_v29 = vmul.f32 %v1862_v42, %v3852_v40  ;;  %v1865_v36 = vmul.f32 %v1863_v62, %v3853_v5 }
 0x695   :  { %v1838_v34 = vadd.f32 %v1836_v39, %v1820_v7  ;;  %v1837_v13 = vadd.f32 %v1835_v52, %v1819_v31 }
 0x697   :  { %v1856_v27 = vadd.f32 %v1854_v21, %v1838_v34  ;;  %v1855_v6 = vadd.f32 %v1853_v14, %v1837_v13 }
 0x698   :  { %v1879_v8 = vpop.permute.xlu2 %1878 }
 0x699   :  { %v1869_v22 = vpop.permute.xlu0 %1868 }
 0x69a   :  { %v1871_v16 = vmul.f32 %v1869_v22, %v1864_v29  ;;  %v1872_v45 = vmul.f32 %v1869_v22, %v1865_v36 }
 0x69c   :  { %v1873_v57 = vadd.f32 %v1871_v16, %v1855_v6  ;;  %v1874_v9 = vadd.f32 %v1872_v45, %v1856_v27 }
 0x69e   :  { %v1881_v24 = vadd.f32 %v1879_v8, %v1873_v57  ;;  %v1882_v3 = vadd.f32 %v1879_v8, %v1874_v9 }
 0x6a0   :  { %1884 = vst [vmem:[#allocation2 + $0x10] sm:$0xff] %v1881_v24 }
 0x6a1   :  { %1885 = vst [vmem:[#allocation2 + $0x18] sm:$0xff] %v1882_v3 }
 0x6a2   :  { %1898 = dma.vmem_to_hbm [thread:$0]  %s1891_s4, 512, %s1893_s22, [#allocation3], %s2117_s23, %s2117_s23, %s2108_s16  }
 0x6a3   :  { %2105 = dma.done.wait [#allocation3], 512  }
 0x6a4   :  { %2106 = vsyncadd [#allocation3], 4294966784 }
 0x6a5   :  { %1903 = vsyncpa [#allocation3], 1 }

</bundles_post_ra>
